<compile_context>
chip_gen: v7x
topology: tpu7x:2x2x1
jax: 0.10.0
libtpu: 0.0.40
codegen_flags: <defaults>
</compile_context>

<pallas_src>
import functools

import jax
import jax.numpy as jnp
from jax.experimental import pallas as pl
from jax.experimental.pallas import tpu as pltpu

THETA = 0.8  # cdcconv theta


# ------------------------------- fused kernel -------------------------------

def _feature_extract_kernel(x_ref, mask_ref, w1_ref, b1_ref, w3_ref, b3_ref,
                            o_ref, buf_a, buf_b, *, H, W, Cout, head, halo):
    """Whole FeatureExtract forward for one batch element.

    Layouts:
      x_ref : (1, Cin, (H+2)*(W+2))  zero-padded, flattened NCHW input
      buf_* : (Cout, Lbuf) VMEM scratch; pixel (i, j) of an activation lives at
              lane head + i*(W+2) + j; pad columns / halo strips stay zero.
      o_ref : (1, Cout, H*(W+2))     lane-dense padded row slab (one store);
              the wrapper drops the 2 pad columns per row.
    """
    Wp = W + 2
    Lc = H * Wp            # contiguous lane window covering all output pixels
    q0 = Wp + 1            # flat offset of pixel (0,0) in the padded input

    # --- zero only the halo strips the 3x3 taps can read (<= Wp+1 lanes each
    # side of the data window).  Done every grid step -> safe under megacore
    # "parallel" sharding where scratch is per-core. ---
    zstrip = jnp.zeros((Cout, halo), dtype=buf_a.dtype)
    buf_a[:, head - halo:head] = zstrip
    buf_a[:, head + Lc:head + Lc + halo] = zstrip
    buf_b[:, head - halo:head] = zstrip
    buf_b[:, head + Lc:head + Lc + halo] = zstrip

    # validity mask over the data window, broadcast ONCE (no broadcast CSE).
    maskb = jnp.broadcast_to(mask_ref[...], (Cout, Lc))

    def store_padded(buf, val):
        # masked store keeps the padding columns inside the window at zero
        buf[:, head:head + Lc] = (val * maskb).astype(buf.dtype)

    def conv3x3(buf, base, rows, bias):
        # 9 accumulating MXU matmuls; RHS = shifted views of the padded
        # activation resident in VMEM.  No im2col / concat temp is built.
        acc = None
        for t in range(9):
            ky, kx = divmod(t, 3)
            d = (ky - 1) * Wp + (kx - 1)
            tap = buf[:, head + d:head + d + Lc]                 # (Cout, Lc)
            w_t = w3_ref[t, base:base + rows, :]                 # (rows, Cout)
            p = jnp.dot(w_t, tap, preferred_element_type=jnp.float32)
            acc = p if acc is None else acc + p
        return acc + bias

    # ---- stem 1x1 conv: (Cout, Cin) @ (Cin, Lc), channel-major ----
    xin = x_ref[0, :, q0:q0 + Lc].astype(w1_ref.dtype)           # (Cin, Lc)
    xf = jnp.dot(w1_ref[...], xin,
                 preferred_element_type=jnp.float32) + b1_ref[...]
    store_padded(buf_a, xf)

    # ---- two EdgeBlocks, ping-ponging between the two scratch buffers ----
    bufs = (buf_a, buf_b)
    src = 0
    out_val = None
    for blk in range(2):
        a, b = bufs[src], bufs[1 - src]
        base = blk * 4 * Cout

        xp = conv3x3(a, base, Cout,
                     b3_ref[base:base + Cout, :])                 # process
        store_padded(b, xp)

        rc = conv3x3(b, base + Cout, 2 * Cout,
                     b3_ref[base + Cout:base + 3 * Cout, :])      # res1 ++ cdc
        r1 = jnp.maximum(rc[:Cout], 0.0)                          # ReLU branch
        cdc = rc[Cout:]                                           # cdc branch
        store_padded(a, r1)                                       # block input dead

        r2 = conv3x3(a, base + 3 * Cout, Cout,
                     b3_ref[base + 3 * Cout:base + 4 * Cout, :])  # res2
        out_val = r2 + cdc
        if blk == 0:
            store_padded(b, out_val)                              # feeds block 2
            src = 1 - src

    # ---- ONE lane-dense store of the padded row slab (288 lanes) ----
    o_ref[0, :, :] = out_val.astype(o_ref.dtype)


# --------------------------------- wrapper ----------------------------------

@functools.partial(jax.jit, static_argnames=("compute_dtype",))
def feature_extract(x_nchw, kp, compute_dtype=jnp.float32):
    """x_nchw: (B, Cin, H, W);  kp: prepared kernel params (prepare_params).

    compute_dtype: jnp.float32 (default, v5e) or jnp.bfloat16 (v6e / v7x);
    MXU accumulation is always f32, HBM input/output stay in x.dtype.
    """
    B, Cin, H, W = x_nchw.shape
    Cout = kp['b1'].shape[0]
    Hp, Wp = H + 2, W + 2
    Lp = Hp * Wp
    Lc = H * Wp
    q0 = Wp + 1
    halo = ((Wp + 1 + 31) // 32) * 32        # zero-halo lanes needed per side
    head = ((halo + 127) // 128) * 128       # lane-aligned start of data window
    Lbuf = head + Lc + halo

    # Zero-pad + flatten; with allow_input_fusion XLA fuses this producer into
    # the pallas_call operand instead of materializing a padded copy in HBM.
    xpad = jnp.pad(x_nchw, ((0, 0), (0, 0), (1, 1), (1, 1))).reshape(B, Cin, Lp)
    # validity mask over the data window (real pixel columns vs pad columns)
    col = (jnp.arange(Lc, dtype=jnp.int32) + q0) % Wp
    mask = ((col >= 1) & (col <= W)).astype(jnp.float32).reshape(1, Lc)

    w1 = kp['w1'].astype(compute_dtype)
    w3 = kp['w3'].astype(compute_dtype)

    kernel = functools.partial(_feature_extract_kernel,
                               H=H, W=W, Cout=Cout, head=head, halo=halo)
    out = pl.pallas_call(
        kernel,
        out_shape=jax.ShapeDtypeStruct((B, Cout, Lc), x_nchw.dtype),
        grid=(B,),
        in_specs=[
            pl.BlockSpec((1, Cin, Lp), lambda b: (b, 0, 0)),
            pl.BlockSpec((1, Lc), lambda b: (0, 0)),
            pl.BlockSpec((Cout, Cin), lambda b: (0, 0)),
            pl.BlockSpec((Cout, 1), lambda b: (0, 0)),
            pl.BlockSpec((9, 8 * Cout, Cout), lambda b: (0, 0, 0)),
            pl.BlockSpec((8 * Cout, 1), lambda b: (0, 0)),
        ],
        out_specs=pl.BlockSpec((1, Cout, Lc), lambda b: (b, 0, 0)),
        scratch_shapes=[pltpu.VMEM((Cout, Lbuf), compute_dtype),
                        pltpu.VMEM((Cout, Lbuf), compute_dtype)],
        compiler_params=pltpu.CompilerParams(
            dimension_semantics=("parallel",),
            allow_input_fusion=[True, False, False, False, False, False]),
    )(xpad, mask, w1, kp['b1'], w3, kp['b3'])

    # drop the 2 padding columns per row -> NCHW (lane-dense kernel store,
    # compaction handled by a trivial XLA slice copy here).
    return out.reshape(B, Cout, H, Wp)[:, :, :, :W]


# ------------------------ parameters: init & preparation --------------------

def init_params(key, cin, cout):
    """Raw params in HWIO / (Cin,Cout) format (consumed by the JAX reference)."""
    ks = jax.random.split(key, 4)

    def w3(k, ci, co):
        return jax.random.normal(k, (3, 3, ci, co), jnp.float32) / jnp.sqrt(9.0 * ci)

    def w1(k, ci, co):
        return jax.random.normal(k, (ci, co), jnp.float32) / jnp.sqrt(float(ci))

    def bias(k, co):
        return 0.01 * jax.random.normal(k, (co,), jnp.float32)

    def block(k0):
        kk = jax.random.split(k0, 7)
        return {
            'process_w': w3(kk[0], cout, cout), 'process_b': bias(kk[1], cout),
            'res1_w': w3(kk[2], cout, cout), 'res1_b': bias(kk[3], cout),
            'res2_w': w3(kk[4], cout, cout), 'res2_b': bias(kk[5], cout),
            'cdc_w': w3(kk[6], cout, cout),
        }

    return {
        'conv_w': w1(ks[0], cin, cout),
        'conv_b': bias(ks[1], cout),
        'block1': block(ks[2]),
        'block2': block(ks[3]),
    }


def _w3mat(w_hwio):
    """(3,3,Cin,Cout) HWIO -> channel-major matmul weight (Cout, 9*Cin),
    with K index = (ky*3+kx)*Cin + ci (matches the kernel's tap order)."""
    kh, kw, ci, co = w_hwio.shape
    return jnp.transpose(w_hwio.reshape(kh * kw * ci, co))


def prepare_params(p):
    """One-time repack: fold cdc center tap, pack both blocks' 3x3 weights
    tap-major as (9, 8*Cout, Cout) so the kernel never lane-slices weights."""
    def block(bp):
        cout = bp['process_b'].shape[0]
        proc_w = _w3mat(bp['process_w'])
        res1_w = _w3mat(bp['res1_w'])
        res2_w = _w3mat(bp['res2_w'])
        ksum = bp['cdc_w'].sum(axis=(0, 1))                       # (Cin, Cout)
        cdc_eff = bp['cdc_w'].at[1, 1].add(-THETA * ksum)         # exact fold
        cdc_wm = _w3mat(cdc_eff)
        # row order per block: [process; res1; cdc; res2] (res1/cdc adjacent so
        # the kernel computes them as one rows=2*Cout conv).
        w = jnp.concatenate([proc_w, res1_w, cdc_wm, res2_w], axis=0)
        b = jnp.concatenate([bp['process_b'], bp['res1_b'],
                             jnp.zeros((cout,), jnp.float32),
                             bp['res2_b']]).reshape(-1, 1)
        return w, b

    w_b1, b_b1 = block(p['block1'])
    w_b2, b_b2 = block(p['block2'])
    cout = p['conv_b'].shape[0]
    w3 = jnp.concatenate([w_b1, w_b2], axis=0)                    # (8*Cout, 9*Cout)
    w3t = w3.reshape(8 * cout, 9, cout).transpose(1, 0, 2)        # (9, 8*Cout, Cout)
    return {
        'w1': jnp.transpose(p['conv_w']),              # (Cout, Cin)
        'b1': p['conv_b'].reshape(-1, 1),              # (Cout, 1)
        'w3': w3t,                                     # (9, 8*Cout, Cout)
        'b3': jnp.concatenate([b_b1, b_b2], axis=0),   # (8*Cout, 1)
    }


# ------------------------------ pure-JAX reference ---------------------------

def _ref_feature_extract(x_nchw, params):
    dn = ('NHWC', 'HWIO', 'NHWC')

    def c1(x, w, b):
        w4 = w.reshape(1, 1, *w.shape)
        return jax.lax.conv_general_dilated(x, w4, (1, 1), 'VALID',
                                            dimension_numbers=dn) + b.reshape(1, 1, 1, -1)

    def c3(x, w, b=None):
        out = jax.lax.conv_general_dilated(x, w, (1, 1), 'SAME', dimension_numbers=dn)
        if b is not None:
            out = out + b.reshape(1, 1, 1, -1)
        return out

    def eb(x, p):
        xp = c3(x, p['process_w'], p['process_b'])
        r = c3(jnp.maximum(c3(xp, p['res1_w'], p['res1_b']), 0.0),
               p['res2_w'], p['res2_b'])
        out_normal = c3(xp, p['cdc_w'])
        kd = p['cdc_w'].sum(axis=(0, 1)).reshape(1, 1, *p['cdc_w'].shape[2:])
        out_diff = jax.lax.conv_general_dilated(xp, kd, (1, 1), 'VALID',
                                                dimension_numbers=dn)
        return r + out_normal - THETA * out_diff

    x = jnp.transpose(x_nchw, (0, 2, 3, 1))
    xf = c1(x, params['conv_w'], params['conv_b'])
    xf2 = eb(eb(xf, params['block1']), params['block2'])
    return jnp.transpose(xf2, (0, 3, 1, 2))


# ---------------------------------- main -------------------------------------

if __name__ == "__main__":
    key = jax.random.PRNGKey(0)
    kx, kp = jax.random.split(key)

    B, Cin, H, W = 2, 4, 16, 16    # PyTorch NCHW input
    Cout = 16

    x = jax.random.normal(kx, (B, Cin, H, W), jnp.float32)
    raw_params = init_params(kp, Cin, Cout)
    kparams = prepare_params(raw_params)

    ref = _ref_feature_extract(x, raw_params)

    # f32 path (default; v5e): tight check against the f32 XLA reference.
    out = jax.block_until_ready(feature_extract(x, kparams))
    assert out.shape == (B, Cout, H, W), out.shape
    max_err = float(jnp.max(jnp.abs(out - ref)))
    assert jnp.allclose(out, ref, rtol=1e-3, atol=1e-3), f"f32 max abs err {max_err}"

    # bf16 compute path (recommended on v6e/v7x): gross-error sanity check only.
    out_bf16 = jax.block_until_ready(
        feature_extract(x, kparams, compute_dtype=jnp.bfloat16))
    err_bf16 = float(jnp.max(jnp.abs(out_bf16 - ref)))
    assert err_bf16 < 0.1 * (1.0 + float(jnp.max(jnp.abs(ref)))), \
        f"bf16 max abs err {err_bf16}"

    print("KERNEL_OK")
</pallas_src>

<mosaic_0001>
module attributes {stable_mosaic.version = 11 : i64} {
  func.func @_feature_extract_kernel(%arg0: i32, %arg1: memref<1x4x324xf32, #tpu.memory_space<vmem>>, %arg2: memref<1x288xf32, #tpu.memory_space<vmem>>, %arg3: memref<16x4xf32, #tpu.memory_space<vmem>>, %arg4: memref<16x1xf32, #tpu.memory_space<vmem>>, %arg5: memref<9x128x16xf32, #tpu.memory_space<vmem>>, %arg6: memref<128x1xf32, #tpu.memory_space<vmem>>, %arg7: memref<1x16x288xf32, #tpu.memory_space<vmem>>, %arg8: memref<16x448xf32, #tpu.memory_space<vmem>>, %arg9: memref<16x448xf32, #tpu.memory_space<vmem>>) attributes {dimension_semantics = [#tpu.dimension_semantics<parallel>], iteration_bounds = array<i64: 2>, scalar_prefetch = 0 : i64, scratch_operands = 2 : i64, tpu.core_type = #tpu.core_type<tc>, window_params = [{transform_indices = @transform_0, window_bounds = array<i64: 1, 4, 324>}, {pipeline_mode = #tpu.pipeline_mode<synchronous>, transform_indices = @transform_1, window_bounds = array<i64: 1, 288>}, {pipeline_mode = #tpu.pipeline_mode<synchronous>, transform_indices = @transform_2, window_bounds = array<i64: 16, 4>}, {pipeline_mode = #tpu.pipeline_mode<synchronous>, transform_indices = @transform_3, window_bounds = array<i64: 16, 1>}, {pipeline_mode = #tpu.pipeline_mode<synchronous>, transform_indices = @transform_4, window_bounds = array<i64: 9, 128, 16>}, {pipeline_mode = #tpu.pipeline_mode<synchronous>, transform_indices = @transform_5, window_bounds = array<i64: 128, 1>}, {transform_indices = @transform_6, window_bounds = array<i64: 1, 16, 288>}]} {
    %cst = arith.constant 0.000000e+00 : f32
    %0 = vector.broadcast %cst : f32 to vector<16x32xf32>
    %c0 = arith.constant 0 : index
    %c96 = arith.constant 96 : index
    %1 = vector.load %arg8[%c0, %c96] : memref<16x448xf32, #tpu.memory_space<vmem>>, vector<16x32xf32>
    tpu.vector_store %arg8[%c0, %c96], %0 {strides = array<i32>} : memref<16x448xf32, #tpu.memory_space<vmem>>, vector<16x32xf32>,
    %c0_0 = arith.constant 0 : index
    %c416 = arith.constant 416 : index
    %2 = vector.load %arg8[%c0_0, %c416] : memref<16x448xf32, #tpu.memory_space<vmem>>, vector<16x32xf32>
    tpu.vector_store %arg8[%c0_0, %c416], %0 {strides = array<i32>} : memref<16x448xf32, #tpu.memory_space<vmem>>, vector<16x32xf32>,
    %c0_1 = arith.constant 0 : index
    %c96_2 = arith.constant 96 : index
    %3 = vector.load %arg9[%c0_1, %c96_2] : memref<16x448xf32, #tpu.memory_space<vmem>>, vector<16x32xf32>
    tpu.vector_store %arg9[%c0_1, %c96_2], %0 {strides = array<i32>} : memref<16x448xf32, #tpu.memory_space<vmem>>, vector<16x32xf32>,
    %c0_3 = arith.constant 0 : index
    %c416_4 = arith.constant 416 : index
    %4 = vector.load %arg9[%c0_3, %c416_4] : memref<16x448xf32, #tpu.memory_space<vmem>>, vector<16x32xf32>
    tpu.vector_store %arg9[%c0_3, %c416_4], %0 {strides = array<i32>} : memref<16x448xf32, #tpu.memory_space<vmem>>, vector<16x32xf32>,
    %c0_5 = arith.constant 0 : index
    %c0_6 = arith.constant 0 : index
    %5 = vector.load %arg2[%c0_5, %c0_6] : memref<1x288xf32, #tpu.memory_space<vmem>>, vector<1x288xf32>
    %6 = vector.shape_cast %5 : vector<1x288xf32> to vector<1x288xf32>
    %7 = vector.broadcast %6 : vector<1x288xf32> to vector<16x288xf32>
    %c0_7 = arith.constant 0 : index
    %c0_8 = arith.constant 0 : index
    %c19 = arith.constant 19 : index
    %8 = vector.load %arg1[%c0_7, %c0_8, %c19] : memref<1x4x324xf32, #tpu.memory_space<vmem>>, vector<1x4x288xf32>
    %9 = vector.shape_cast %8 : vector<1x4x288xf32> to vector<4x288xf32>
    %c0_9 = arith.constant 0 : index
    %c0_10 = arith.constant 0 : index
    %10 = vector.load %arg3[%c0_9, %c0_10] : memref<16x4xf32, #tpu.memory_space<vmem>>, vector<16x4xf32>
    %cst_11 = arith.constant dense<0.000000e+00> : vector<16x288xf32>
    %11 = tpu.matmul %10, %9, %cst_11 {dimension_numbers = #tpu.dot_dimension_numbers<[1], [0], [0], [1], [0, 0, 1, 1], [], []>} : vector<16x4xf32>, vector<4x288xf32>, vector<16x288xf32> -> vector<16x288xf32>
    %c0_12 = arith.constant 0 : index
    %c0_13 = arith.constant 0 : index
    %12 = vector.load %arg4[%c0_12, %c0_13] : memref<16x1xf32, #tpu.memory_space<vmem>>, vector<16x1xf32>
    %13 = vector.broadcast %12 : vector<16x1xf32> to vector<16x288xf32>
    %14 = arith.addf %11, %13 : vector<16x288xf32>
    %15 = arith.mulf %14, %7 : vector<16x288xf32>
    %c0_14 = arith.constant 0 : index
    %c128 = arith.constant 128 : index
    %16 = vector.load %arg8[%c0_14, %c128] : memref<16x448xf32, #tpu.memory_space<vmem>>, vector<16x288xf32>
    tpu.vector_store %arg8[%c0_14, %c128], %15 {strides = array<i32>} : memref<16x448xf32, #tpu.memory_space<vmem>>, vector<16x288xf32>,
    %c0_15 = arith.constant 0 : index
    %c0_16 = arith.constant 0 : index
    %17 = vector.load %arg6[%c0_15, %c0_16] : memref<128x1xf32, #tpu.memory_space<vmem>>, vector<16x1xf32>
    %c0_17 = arith.constant 0 : index
    %c109 = arith.constant 109 : index
    %18 = vector.load %arg8[%c0_17, %c109] : memref<16x448xf32, #tpu.memory_space<vmem>>, vector<16x288xf32>
    %c0_18 = arith.constant 0 : index
    %c0_19 = arith.constant 0 : index
    %c0_20 = arith.constant 0 : index
    %19 = vector.load %arg5[%c0_18, %c0_19, %c0_20] : memref<9x128x16xf32, #tpu.memory_space<vmem>>, vector<1x16x16xf32>
    %20 = vector.shape_cast %19 : vector<1x16x16xf32> to vector<16x16xf32>
    %cst_21 = arith.constant dense<0.000000e+00> : vector<16x288xf32>
    %21 = tpu.matmul %20, %18, %cst_21 {dimension_numbers = #tpu.dot_dimension_numbers<[1], [0], [0], [1], [0, 0, 1, 1], [], []>} : vector<16x16xf32>, vector<16x288xf32>, vector<16x288xf32> -> vector<16x288xf32>
    %c0_22 = arith.constant 0 : index
    %c110 = arith.constant 110 : index
    %22 = vector.load %arg8[%c0_22, %c110] : memref<16x448xf32, #tpu.memory_space<vmem>>, vector<16x288xf32>
    %c1 = arith.constant 1 : index
    %c0_23 = arith.constant 0 : index
    %c0_24 = arith.constant 0 : index
    %23 = vector.load %arg5[%c1, %c0_23, %c0_24] : memref<9x128x16xf32, #tpu.memory_space<vmem>>, vector<1x16x16xf32>
    %24 = vector.shape_cast %23 : vector<1x16x16xf32> to vector<16x16xf32>
    %cst_25 = arith.constant dense<0.000000e+00> : vector<16x288xf32>
    %25 = tpu.matmul %24, %22, %cst_25 {dimension_numbers = #tpu.dot_dimension_numbers<[1], [0], [0], [1], [0, 0, 1, 1], [], []>} : vector<16x16xf32>, vector<16x288xf32>, vector<16x288xf32> -> vector<16x288xf32>
    %26 = arith.addf %21, %25 : vector<16x288xf32>
    %c0_26 = arith.constant 0 : index
    %c111 = arith.constant 111 : index
    %27 = vector.load %arg8[%c0_26, %c111] : memref<16x448xf32, #tpu.memory_space<vmem>>, vector<16x288xf32>
    %c2 = arith.constant 2 : index
    %c0_27 = arith.constant 0 : index
    %c0_28 = arith.constant 0 : index
    %28 = vector.load %arg5[%c2, %c0_27, %c0_28] : memref<9x128x16xf32, #tpu.memory_space<vmem>>, vector<1x16x16xf32>
    %29 = vector.shape_cast %28 : vector<1x16x16xf32> to vector<16x16xf32>
    %cst_29 = arith.constant dense<0.000000e+00> : vector<16x288xf32>
    %30 = tpu.matmul %29, %27, %cst_29 {dimension_numbers = #tpu.dot_dimension_numbers<[1], [0], [0], [1], [0, 0, 1, 1], [], []>} : vector<16x16xf32>, vector<16x288xf32>, vector<16x288xf32> -> vector<16x288xf32>
    %31 = arith.addf %26, %30 : vector<16x288xf32>
    %c0_30 = arith.constant 0 : index
    %c127 = arith.constant 127 : index
    %32 = vector.load %arg8[%c0_30, %c127] : memref<16x448xf32, #tpu.memory_space<vmem>>, vector<16x288xf32>
    %c3 = arith.constant 3 : index
    %c0_31 = arith.constant 0 : index
    %c0_32 = arith.constant 0 : index
    %33 = vector.load %arg5[%c3, %c0_31, %c0_32] : memref<9x128x16xf32, #tpu.memory_space<vmem>>, vector<1x16x16xf32>
    %34 = vector.shape_cast %33 : vector<1x16x16xf32> to vector<16x16xf32>
    %cst_33 = arith.constant dense<0.000000e+00> : vector<16x288xf32>
    %35 = tpu.matmul %34, %32, %cst_33 {dimension_numbers = #tpu.dot_dimension_numbers<[1], [0], [0], [1], [0, 0, 1, 1], [], []>} : vector<16x16xf32>, vector<16x288xf32>, vector<16x288xf32> -> vector<16x288xf32>
    %36 = arith.addf %31, %35 : vector<16x288xf32>
    %c0_34 = arith.constant 0 : index
    %c128_35 = arith.constant 128 : index
    %37 = vector.load %arg8[%c0_34, %c128_35] : memref<16x448xf32, #tpu.memory_space<vmem>>, vector<16x288xf32>
    %c4 = arith.constant 4 : index
    %c0_36 = arith.constant 0 : index
    %c0_37 = arith.constant 0 : index
    %38 = vector.load %arg5[%c4, %c0_36, %c0_37] : memref<9x128x16xf32, #tpu.memory_space<vmem>>, vector<1x16x16xf32>
    %39 = vector.shape_cast %38 : vector<1x16x16xf32> to vector<16x16xf32>
    %cst_38 = arith.constant dense<0.000000e+00> : vector<16x288xf32>
    %40 = tpu.matmul %39, %37, %cst_38 {dimension_numbers = #tpu.dot_dimension_numbers<[1], [0], [0], [1], [0, 0, 1, 1], [], []>} : vector<16x16xf32>, vector<16x288xf32>, vector<16x288xf32> -> vector<16x288xf32>
    %41 = arith.addf %36, %40 : vector<16x288xf32>
    %c0_39 = arith.constant 0 : index
    %c129 = arith.constant 129 : index
    %42 = vector.load %arg8[%c0_39, %c129] : memref<16x448xf32, #tpu.memory_space<vmem>>, vector<16x288xf32>
    %c5 = arith.constant 5 : index
    %c0_40 = arith.constant 0 : index
    %c0_41 = arith.constant 0 : index
    %43 = vector.load %arg5[%c5, %c0_40, %c0_41] : memref<9x128x16xf32, #tpu.memory_space<vmem>>, vector<1x16x16xf32>
    %44 = vector.shape_cast %43 : vector<1x16x16xf32> to vector<16x16xf32>
    %cst_42 = arith.constant dense<0.000000e+00> : vector<16x288xf32>
    %45 = tpu.matmul %44, %42, %cst_42 {dimension_numbers = #tpu.dot_dimension_numbers<[1], [0], [0], [1], [0, 0, 1, 1], [], []>} : vector<16x16xf32>, vector<16x288xf32>, vector<16x288xf32> -> vector<16x288xf32>
    %46 = arith.addf %41, %45 : vector<16x288xf32>
    %c0_43 = arith.constant 0 : index
    %c145 = arith.constant 145 : index
    %47 = vector.load %arg8[%c0_43, %c145] : memref<16x448xf32, #tpu.memory_space<vmem>>, vector<16x288xf32>
    %c6 = arith.constant 6 : index
    %c0_44 = arith.constant 0 : index
    %c0_45 = arith.constant 0 : index
    %48 = vector.load %arg5[%c6, %c0_44, %c0_45] : memref<9x128x16xf32, #tpu.memory_space<vmem>>, vector<1x16x16xf32>
    %49 = vector.shape_cast %48 : vector<1x16x16xf32> to vector<16x16xf32>
    %cst_46 = arith.constant dense<0.000000e+00> : vector<16x288xf32>
    %50 = tpu.matmul %49, %47, %cst_46 {dimension_numbers = #tpu.dot_dimension_numbers<[1], [0], [0], [1], [0, 0, 1, 1], [], []>} : vector<16x16xf32>, vector<16x288xf32>, vector<16x288xf32> -> vector<16x288xf32>
    %51 = arith.addf %46, %50 : vector<16x288xf32>
    %c0_47 = arith.constant 0 : index
    %c146 = arith.constant 146 : index
    %52 = vector.load %arg8[%c0_47, %c146] : memref<16x448xf32, #tpu.memory_space<vmem>>, vector<16x288xf32>
    %c7 = arith.constant 7 : index
    %c0_48 = arith.constant 0 : index
    %c0_49 = arith.constant 0 : index
    %53 = vector.load %arg5[%c7, %c0_48, %c0_49] : memref<9x128x16xf32, #tpu.memory_space<vmem>>, vector<1x16x16xf32>
    %54 = vector.shape_cast %53 : vector<1x16x16xf32> to vector<16x16xf32>
    %cst_50 = arith.constant dense<0.000000e+00> : vector<16x288xf32>
    %55 = tpu.matmul %54, %52, %cst_50 {dimension_numbers = #tpu.dot_dimension_numbers<[1], [0], [0], [1], [0, 0, 1, 1], [], []>} : vector<16x16xf32>, vector<16x288xf32>, vector<16x288xf32> -> vector<16x288xf32>
    %56 = arith.addf %51, %55 : vector<16x288xf32>
    %c0_51 = arith.constant 0 : index
    %c147 = arith.constant 147 : index
    %57 = vector.load %arg8[%c0_51, %c147] : memref<16x448xf32, #tpu.memory_space<vmem>>, vector<16x288xf32>
    %c8 = arith.constant 8 : index
    %c0_52 = arith.constant 0 : index
    %c0_53 = arith.constant 0 : index
    %58 = vector.load %arg5[%c8, %c0_52, %c0_53] : memref<9x128x16xf32, #tpu.memory_space<vmem>>, vector<1x16x16xf32>
    %59 = vector.shape_cast %58 : vector<1x16x16xf32> to vector<16x16xf32>
    %cst_54 = arith.constant dense<0.000000e+00> : vector<16x288xf32>
    %60 = tpu.matmul %59, %57, %cst_54 {dimension_numbers = #tpu.dot_dimension_numbers<[1], [0], [0], [1], [0, 0, 1, 1], [], []>} : vector<16x16xf32>, vector<16x288xf32>, vector<16x288xf32> -> vector<16x288xf32>
    %61 = arith.addf %56, %60 : vector<16x288xf32>
    %62 = vector.broadcast %17 : vector<16x1xf32> to vector<16x288xf32>
    %63 = arith.addf %61, %62 : vector<16x288xf32>
    %64 = arith.mulf %63, %7 : vector<16x288xf32>
    %c0_55 = arith.constant 0 : index
    %c128_56 = arith.constant 128 : index
    %65 = vector.load %arg9[%c0_55, %c128_56] : memref<16x448xf32, #tpu.memory_space<vmem>>, vector<16x288xf32>
    tpu.vector_store %arg9[%c0_55, %c128_56], %64 {strides = array<i32>} : memref<16x448xf32, #tpu.memory_space<vmem>>, vector<16x288xf32>,
    %c16 = arith.constant 16 : index
    %c0_57 = arith.constant 0 : index
    %66 = vector.load %arg6[%c16, %c0_57] : memref<128x1xf32, #tpu.memory_space<vmem>>, vector<32x1xf32>
    %c0_58 = arith.constant 0 : index
    %c109_59 = arith.constant 109 : index
    %67 = vector.load %arg9[%c0_58, %c109_59] : memref<16x448xf32, #tpu.memory_space<vmem>>, vector<16x288xf32>
    %c0_60 = arith.constant 0 : index
    %c16_61 = arith.constant 16 : index
    %c0_62 = arith.constant 0 : index
    %68 = vector.load %arg5[%c0_60, %c16_61, %c0_62] : memref<9x128x16xf32, #tpu.memory_space<vmem>>, vector<1x32x16xf32>
    %69 = vector.shape_cast %68 : vector<1x32x16xf32> to vector<32x16xf32>
    %cst_63 = arith.constant dense<0.000000e+00> : vector<32x288xf32>
    %70 = tpu.matmul %69, %67, %cst_63 {dimension_numbers = #tpu.dot_dimension_numbers<[1], [0], [0], [1], [0, 0, 1, 1], [], []>} : vector<32x16xf32>, vector<16x288xf32>, vector<32x288xf32> -> vector<32x288xf32>
    %c0_64 = arith.constant 0 : index
    %c110_65 = arith.constant 110 : index
    %71 = vector.load %arg9[%c0_64, %c110_65] : memref<16x448xf32, #tpu.memory_space<vmem>>, vector<16x288xf32>
    %c1_66 = arith.constant 1 : index
    %c16_67 = arith.constant 16 : index
    %c0_68 = arith.constant 0 : index
    %72 = vector.load %arg5[%c1_66, %c16_67, %c0_68] : memref<9x128x16xf32, #tpu.memory_space<vmem>>, vector<1x32x16xf32>
    %73 = vector.shape_cast %72 : vector<1x32x16xf32> to vector<32x16xf32>
    %cst_69 = arith.constant dense<0.000000e+00> : vector<32x288xf32>
    %74 = tpu.matmul %73, %71, %cst_69 {dimension_numbers = #tpu.dot_dimension_numbers<[1], [0], [0], [1], [0, 0, 1, 1], [], []>} : vector<32x16xf32>, vector<16x288xf32>, vector<32x288xf32> -> vector<32x288xf32>
    %75 = arith.addf %70, %74 : vector<32x288xf32>
    %c0_70 = arith.constant 0 : index
    %c111_71 = arith.constant 111 : index
    %76 = vector.load %arg9[%c0_70, %c111_71] : memref<16x448xf32, #tpu.memory_space<vmem>>, vector<16x288xf32>
    %c2_72 = arith.constant 2 : index
    %c16_73 = arith.constant 16 : index
    %c0_74 = arith.constant 0 : index
    %77 = vector.load %arg5[%c2_72, %c16_73, %c0_74] : memref<9x128x16xf32, #tpu.memory_space<vmem>>, vector<1x32x16xf32>
    %78 = vector.shape_cast %77 : vector<1x32x16xf32> to vector<32x16xf32>
    %cst_75 = arith.constant dense<0.000000e+00> : vector<32x288xf32>
    %79 = tpu.matmul %78, %76, %cst_75 {dimension_numbers = #tpu.dot_dimension_numbers<[1], [0], [0], [1], [0, 0, 1, 1], [], []>} : vector<32x16xf32>, vector<16x288xf32>, vector<32x288xf32> -> vector<32x288xf32>
    %80 = arith.addf %75, %79 : vector<32x288xf32>
    %c0_76 = arith.constant 0 : index
    %c127_77 = arith.constant 127 : index
    %81 = vector.load %arg9[%c0_76, %c127_77] : memref<16x448xf32, #tpu.memory_space<vmem>>, vector<16x288xf32>
    %c3_78 = arith.constant 3 : index
    %c16_79 = arith.constant 16 : index
    %c0_80 = arith.constant 0 : index
    %82 = vector.load %arg5[%c3_78, %c16_79, %c0_80] : memref<9x128x16xf32, #tpu.memory_space<vmem>>, vector<1x32x16xf32>
    %83 = vector.shape_cast %82 : vector<1x32x16xf32> to vector<32x16xf32>
    %cst_81 = arith.constant dense<0.000000e+00> : vector<32x288xf32>
    %84 = tpu.matmul %83, %81, %cst_81 {dimension_numbers = #tpu.dot_dimension_numbers<[1], [0], [0], [1], [0, 0, 1, 1], [], []>} : vector<32x16xf32>, vector<16x288xf32>, vector<32x288xf32> -> vector<32x288xf32>
    %85 = arith.addf %80, %84 : vector<32x288xf32>
    %c0_82 = arith.constant 0 : index
    %c128_83 = arith.constant 128 : index
    %86 = vector.load %arg9[%c0_82, %c128_83] : memref<16x448xf32, #tpu.memory_space<vmem>>, vector<16x288xf32>
    %c4_84 = arith.constant 4 : index
    %c16_85 = arith.constant 16 : index
    %c0_86 = arith.constant 0 : index
    %87 = vector.load %arg5[%c4_84, %c16_85, %c0_86] : memref<9x128x16xf32, #tpu.memory_space<vmem>>, vector<1x32x16xf32>
    %88 = vector.shape_cast %87 : vector<1x32x16xf32> to vector<32x16xf32>
    %cst_87 = arith.constant dense<0.000000e+00> : vector<32x288xf32>
    %89 = tpu.matmul %88, %86, %cst_87 {dimension_numbers = #tpu.dot_dimension_numbers<[1], [0], [0], [1], [0, 0, 1, 1], [], []>} : vector<32x16xf32>, vector<16x288xf32>, vector<32x288xf32> -> vector<32x288xf32>
    %90 = arith.addf %85, %89 : vector<32x288xf32>
    %c0_88 = arith.constant 0 : index
    %c129_89 = arith.constant 129 : index
    %91 = vector.load %arg9[%c0_88, %c129_89] : memref<16x448xf32, #tpu.memory_space<vmem>>, vector<16x288xf32>
    %c5_90 = arith.constant 5 : index
    %c16_91 = arith.constant 16 : index
    %c0_92 = arith.constant 0 : index
    %92 = vector.load %arg5[%c5_90, %c16_91, %c0_92] : memref<9x128x16xf32, #tpu.memory_space<vmem>>, vector<1x32x16xf32>
    %93 = vector.shape_cast %92 : vector<1x32x16xf32> to vector<32x16xf32>
    %cst_93 = arith.constant dense<0.000000e+00> : vector<32x288xf32>
    %94 = tpu.matmul %93, %91, %cst_93 {dimension_numbers = #tpu.dot_dimension_numbers<[1], [0], [0], [1], [0, 0, 1, 1], [], []>} : vector<32x16xf32>, vector<16x288xf32>, vector<32x288xf32> -> vector<32x288xf32>
    %95 = arith.addf %90, %94 : vector<32x288xf32>
    %c0_94 = arith.constant 0 : index
    %c145_95 = arith.constant 145 : index
    %96 = vector.load %arg9[%c0_94, %c145_95] : memref<16x448xf32, #tpu.memory_space<vmem>>, vector<16x288xf32>
    %c6_96 = arith.constant 6 : index
    %c16_97 = arith.constant 16 : index
    %c0_98 = arith.constant 0 : index
    %97 = vector.load %arg5[%c6_96, %c16_97, %c0_98] : memref<9x128x16xf32, #tpu.memory_space<vmem>>, vector<1x32x16xf32>
    %98 = vector.shape_cast %97 : vector<1x32x16xf32> to vector<32x16xf32>
    %cst_99 = arith.constant dense<0.000000e+00> : vector<32x288xf32>
    %99 = tpu.matmul %98, %96, %cst_99 {dimension_numbers = #tpu.dot_dimension_numbers<[1], [0], [0], [1], [0, 0, 1, 1], [], []>} : vector<32x16xf32>, vector<16x288xf32>, vector<32x288xf32> -> vector<32x288xf32>
    %100 = arith.addf %95, %99 : vector<32x288xf32>
    %c0_100 = arith.constant 0 : index
    %c146_101 = arith.constant 146 : index
    %101 = vector.load %arg9[%c0_100, %c146_101] : memref<16x448xf32, #tpu.memory_space<vmem>>, vector<16x288xf32>
    %c7_102 = arith.constant 7 : index
    %c16_103 = arith.constant 16 : index
    %c0_104 = arith.constant 0 : index
    %102 = vector.load %arg5[%c7_102, %c16_103, %c0_104] : memref<9x128x16xf32, #tpu.memory_space<vmem>>, vector<1x32x16xf32>
    %103 = vector.shape_cast %102 : vector<1x32x16xf32> to vector<32x16xf32>
    %cst_105 = arith.constant dense<0.000000e+00> : vector<32x288xf32>
    %104 = tpu.matmul %103, %101, %cst_105 {dimension_numbers = #tpu.dot_dimension_numbers<[1], [0], [0], [1], [0, 0, 1, 1], [], []>} : vector<32x16xf32>, vector<16x288xf32>, vector<32x288xf32> -> vector<32x288xf32>
    %105 = arith.addf %100, %104 : vector<32x288xf32>
    %c0_106 = arith.constant 0 : index
    %c147_107 = arith.constant 147 : index
    %106 = vector.load %arg9[%c0_106, %c147_107] : memref<16x448xf32, #tpu.memory_space<vmem>>, vector<16x288xf32>
    %c8_108 = arith.constant 8 : index
    %c16_109 = arith.constant 16 : index
    %c0_110 = arith.constant 0 : index
    %107 = vector.load %arg5[%c8_108, %c16_109, %c0_110] : memref<9x128x16xf32, #tpu.memory_space<vmem>>, vector<1x32x16xf32>
    %108 = vector.shape_cast %107 : vector<1x32x16xf32> to vector<32x16xf32>
    %cst_111 = arith.constant dense<0.000000e+00> : vector<32x288xf32>
    %109 = tpu.matmul %108, %106, %cst_111 {dimension_numbers = #tpu.dot_dimension_numbers<[1], [0], [0], [1], [0, 0, 1, 1], [], []>} : vector<32x16xf32>, vector<16x288xf32>, vector<32x288xf32> -> vector<32x288xf32>
    %110 = arith.addf %105, %109 : vector<32x288xf32>
    %111 = vector.broadcast %66 : vector<32x1xf32> to vector<32x288xf32>
    %112 = arith.addf %110, %111 : vector<32x288xf32>
    %113 = vector.extract_strided_slice %112 {offsets = [0, 0], sizes = [16, 288], strides = [1, 1]} : vector<32x288xf32> to vector<16x288xf32>
    %cst_112 = arith.constant 0.000000e+00 : f32
    %114 = vector.broadcast %cst_112 : f32 to vector<16x288xf32>
    %115 = arith.maximumf %113, %114 : vector<16x288xf32>
    %116 = vector.extract_strided_slice %112 {offsets = [16, 0], sizes = [16, 288], strides = [1, 1]} : vector<32x288xf32> to vector<16x288xf32>
    %117 = arith.mulf %115, %7 : vector<16x288xf32>
    %c0_113 = arith.constant 0 : index
    %c128_114 = arith.constant 128 : index
    %118 = vector.load %arg8[%c0_113, %c128_114] : memref<16x448xf32, #tpu.memory_space<vmem>>, vector<16x288xf32>
    tpu.vector_store %arg8[%c0_113, %c128_114], %117 {strides = array<i32>} : memref<16x448xf32, #tpu.memory_space<vmem>>, vector<16x288xf32>,
    %c48 = arith.constant 48 : index
    %c0_115 = arith.constant 0 : index
    %119 = vector.load %arg6[%c48, %c0_115] : memref<128x1xf32, #tpu.memory_space<vmem>>, vector<16x1xf32>
    %c0_116 = arith.constant 0 : index
    %c109_117 = arith.constant 109 : index
    %120 = vector.load %arg8[%c0_116, %c109_117] : memref<16x448xf32, #tpu.memory_space<vmem>>, vector<16x288xf32>
    %c0_118 = arith.constant 0 : index
    %c48_119 = arith.constant 48 : index
    %c0_120 = arith.constant 0 : index
    %121 = vector.load %arg5[%c0_118, %c48_119, %c0_120] : memref<9x128x16xf32, #tpu.memory_space<vmem>>, vector<1x16x16xf32>
    %122 = vector.shape_cast %121 : vector<1x16x16xf32> to vector<16x16xf32>
    %cst_121 = arith.constant dense<0.000000e+00> : vector<16x288xf32>
    %123 = tpu.matmul %122, %120, %cst_121 {dimension_numbers = #tpu.dot_dimension_numbers<[1], [0], [0], [1], [0, 0, 1, 1], [], []>} : vector<16x16xf32>, vector<16x288xf32>, vector<16x288xf32> -> vector<16x288xf32>
    %c0_122 = arith.constant 0 : index
    %c110_123 = arith.constant 110 : index
    %124 = vector.load %arg8[%c0_122, %c110_123] : memref<16x448xf32, #tpu.memory_space<vmem>>, vector<16x288xf32>
    %c1_124 = arith.constant 1 : index
    %c48_125 = arith.constant 48 : index
    %c0_126 = arith.constant 0 : index
    %125 = vector.load %arg5[%c1_124, %c48_125, %c0_126] : memref<9x128x16xf32, #tpu.memory_space<vmem>>, vector<1x16x16xf32>
    %126 = vector.shape_cast %125 : vector<1x16x16xf32> to vector<16x16xf32>
    %cst_127 = arith.constant dense<0.000000e+00> : vector<16x288xf32>
    %127 = tpu.matmul %126, %124, %cst_127 {dimension_numbers = #tpu.dot_dimension_numbers<[1], [0], [0], [1], [0, 0, 1, 1], [], []>} : vector<16x16xf32>, vector<16x288xf32>, vector<16x288xf32> -> vector<16x288xf32>
    %128 = arith.addf %123, %127 : vector<16x288xf32>
    %c0_128 = arith.constant 0 : index
    %c111_129 = arith.constant 111 : index
    %129 = vector.load %arg8[%c0_128, %c111_129] : memref<16x448xf32, #tpu.memory_space<vmem>>, vector<16x288xf32>
    %c2_130 = arith.constant 2 : index
    %c48_131 = arith.constant 48 : index
    %c0_132 = arith.constant 0 : index
    %130 = vector.load %arg5[%c2_130, %c48_131, %c0_132] : memref<9x128x16xf32, #tpu.memory_space<vmem>>, vector<1x16x16xf32>
    %131 = vector.shape_cast %130 : vector<1x16x16xf32> to vector<16x16xf32>
    %cst_133 = arith.constant dense<0.000000e+00> : vector<16x288xf32>
    %132 = tpu.matmul %131, %129, %cst_133 {dimension_numbers = #tpu.dot_dimension_numbers<[1], [0], [0], [1], [0, 0, 1, 1], [], []>} : vector<16x16xf32>, vector<16x288xf32>, vector<16x288xf32> -> vector<16x288xf32>
    %133 = arith.addf %128, %132 : vector<16x288xf32>
    %c0_134 = arith.constant 0 : index
    %c127_135 = arith.constant 127 : index
    %134 = vector.load %arg8[%c0_134, %c127_135] : memref<16x448xf32, #tpu.memory_space<vmem>>, vector<16x288xf32>
    %c3_136 = arith.constant 3 : index
    %c48_137 = arith.constant 48 : index
    %c0_138 = arith.constant 0 : index
    %135 = vector.load %arg5[%c3_136, %c48_137, %c0_138] : memref<9x128x16xf32, #tpu.memory_space<vmem>>, vector<1x16x16xf32>
    %136 = vector.shape_cast %135 : vector<1x16x16xf32> to vector<16x16xf32>
    %cst_139 = arith.constant dense<0.000000e+00> : vector<16x288xf32>
    %137 = tpu.matmul %136, %134, %cst_139 {dimension_numbers = #tpu.dot_dimension_numbers<[1], [0], [0], [1], [0, 0, 1, 1], [], []>} : vector<16x16xf32>, vector<16x288xf32>, vector<16x288xf32> -> vector<16x288xf32>
    %138 = arith.addf %133, %137 : vector<16x288xf32>
    %c0_140 = arith.constant 0 : index
    %c128_141 = arith.constant 128 : index
    %139 = vector.load %arg8[%c0_140, %c128_141] : memref<16x448xf32, #tpu.memory_space<vmem>>, vector<16x288xf32>
    %c4_142 = arith.constant 4 : index
    %c48_143 = arith.constant 48 : index
    %c0_144 = arith.constant 0 : index
    %140 = vector.load %arg5[%c4_142, %c48_143, %c0_144] : memref<9x128x16xf32, #tpu.memory_space<vmem>>, vector<1x16x16xf32>
    %141 = vector.shape_cast %140 : vector<1x16x16xf32> to vector<16x16xf32>
    %cst_145 = arith.constant dense<0.000000e+00> : vector<16x288xf32>
    %142 = tpu.matmul %141, %139, %cst_145 {dimension_numbers = #tpu.dot_dimension_numbers<[1], [0], [0], [1], [0, 0, 1, 1], [], []>} : vector<16x16xf32>, vector<16x288xf32>, vector<16x288xf32> -> vector<16x288xf32>
    %143 = arith.addf %138, %142 : vector<16x288xf32>
    %c0_146 = arith.constant 0 : index
    %c129_147 = arith.constant 129 : index
    %144 = vector.load %arg8[%c0_146, %c129_147] : memref<16x448xf32, #tpu.memory_space<vmem>>, vector<16x288xf32>
    %c5_148 = arith.constant 5 : index
    %c48_149 = arith.constant 48 : index
    %c0_150 = arith.constant 0 : index
    %145 = vector.load %arg5[%c5_148, %c48_149, %c0_150] : memref<9x128x16xf32, #tpu.memory_space<vmem>>, vector<1x16x16xf32>
    %146 = vector.shape_cast %145 : vector<1x16x16xf32> to vector<16x16xf32>
    %cst_151 = arith.constant dense<0.000000e+00> : vector<16x288xf32>
    %147 = tpu.matmul %146, %144, %cst_151 {dimension_numbers = #tpu.dot_dimension_numbers<[1], [0], [0], [1], [0, 0, 1, 1], [], []>} : vector<16x16xf32>, vector<16x288xf32>, vector<16x288xf32> -> vector<16x288xf32>
    %148 = arith.addf %143, %147 : vector<16x288xf32>
    %c0_152 = arith.constant 0 : index
    %c145_153 = arith.constant 145 : index
    %149 = vector.load %arg8[%c0_152, %c145_153] : memref<16x448xf32, #tpu.memory_space<vmem>>, vector<16x288xf32>
    %c6_154 = arith.constant 6 : index
    %c48_155 = arith.constant 48 : index
    %c0_156 = arith.constant 0 : index
    %150 = vector.load %arg5[%c6_154, %c48_155, %c0_156] : memref<9x128x16xf32, #tpu.memory_space<vmem>>, vector<1x16x16xf32>
    %151 = vector.shape_cast %150 : vector<1x16x16xf32> to vector<16x16xf32>
    %cst_157 = arith.constant dense<0.000000e+00> : vector<16x288xf32>
    %152 = tpu.matmul %151, %149, %cst_157 {dimension_numbers = #tpu.dot_dimension_numbers<[1], [0], [0], [1], [0, 0, 1, 1], [], []>} : vector<16x16xf32>, vector<16x288xf32>, vector<16x288xf32> -> vector<16x288xf32>
    %153 = arith.addf %148, %152 : vector<16x288xf32>
    %c0_158 = arith.constant 0 : index
    %c146_159 = arith.constant 146 : index
    %154 = vector.load %arg8[%c0_158, %c146_159] : memref<16x448xf32, #tpu.memory_space<vmem>>, vector<16x288xf32>
    %c7_160 = arith.constant 7 : index
    %c48_161 = arith.constant 48 : index
    %c0_162 = arith.constant 0 : index
    %155 = vector.load %arg5[%c7_160, %c48_161, %c0_162] : memref<9x128x16xf32, #tpu.memory_space<vmem>>, vector<1x16x16xf32>
    %156 = vector.shape_cast %155 : vector<1x16x16xf32> to vector<16x16xf32>
    %cst_163 = arith.constant dense<0.000000e+00> : vector<16x288xf32>
    %157 = tpu.matmul %156, %154, %cst_163 {dimension_numbers = #tpu.dot_dimension_numbers<[1], [0], [0], [1], [0, 0, 1, 1], [], []>} : vector<16x16xf32>, vector<16x288xf32>, vector<16x288xf32> -> vector<16x288xf32>
    %158 = arith.addf %153, %157 : vector<16x288xf32>
    %c0_164 = arith.constant 0 : index
    %c147_165 = arith.constant 147 : index
    %159 = vector.load %arg8[%c0_164, %c147_165] : memref<16x448xf32, #tpu.memory_space<vmem>>, vector<16x288xf32>
    %c8_166 = arith.constant 8 : index
    %c48_167 = arith.constant 48 : index
    %c0_168 = arith.constant 0 : index
    %160 = vector.load %arg5[%c8_166, %c48_167, %c0_168] : memref<9x128x16xf32, #tpu.memory_space<vmem>>, vector<1x16x16xf32>
    %161 = vector.shape_cast %160 : vector<1x16x16xf32> to vector<16x16xf32>
    %cst_169 = arith.constant dense<0.000000e+00> : vector<16x288xf32>
    %162 = tpu.matmul %161, %159, %cst_169 {dimension_numbers = #tpu.dot_dimension_numbers<[1], [0], [0], [1], [0, 0, 1, 1], [], []>} : vector<16x16xf32>, vector<16x288xf32>, vector<16x288xf32> -> vector<16x288xf32>
    %163 = arith.addf %158, %162 : vector<16x288xf32>
    %164 = vector.broadcast %119 : vector<16x1xf32> to vector<16x288xf32>
    %165 = arith.addf %163, %164 : vector<16x288xf32>
    %166 = arith.addf %165, %116 : vector<16x288xf32>
    %167 = arith.mulf %166, %7 : vector<16x288xf32>
    %c0_170 = arith.constant 0 : index
    %c128_171 = arith.constant 128 : index
    %168 = vector.load %arg9[%c0_170, %c128_171] : memref<16x448xf32, #tpu.memory_space<vmem>>, vector<16x288xf32>
    tpu.vector_store %arg9[%c0_170, %c128_171], %167 {strides = array<i32>} : memref<16x448xf32, #tpu.memory_space<vmem>>, vector<16x288xf32>,
    %c64 = arith.constant 64 : index
    %c0_172 = arith.constant 0 : index
    %169 = vector.load %arg6[%c64, %c0_172] : memref<128x1xf32, #tpu.memory_space<vmem>>, vector<16x1xf32>
    %c0_173 = arith.constant 0 : index
    %c109_174 = arith.constant 109 : index
    %170 = vector.load %arg9[%c0_173, %c109_174] : memref<16x448xf32, #tpu.memory_space<vmem>>, vector<16x288xf32>
    %c0_175 = arith.constant 0 : index
    %c64_176 = arith.constant 64 : index
    %c0_177 = arith.constant 0 : index
    %171 = vector.load %arg5[%c0_175, %c64_176, %c0_177] : memref<9x128x16xf32, #tpu.memory_space<vmem>>, vector<1x16x16xf32>
    %172 = vector.shape_cast %171 : vector<1x16x16xf32> to vector<16x16xf32>
    %cst_178 = arith.constant dense<0.000000e+00> : vector<16x288xf32>
    %173 = tpu.matmul %172, %170, %cst_178 {dimension_numbers = #tpu.dot_dimension_numbers<[1], [0], [0], [1], [0, 0, 1, 1], [], []>} : vector<16x16xf32>, vector<16x288xf32>, vector<16x288xf32> -> vector<16x288xf32>
    %c0_179 = arith.constant 0 : index
    %c110_180 = arith.constant 110 : index
    %174 = vector.load %arg9[%c0_179, %c110_180] : memref<16x448xf32, #tpu.memory_space<vmem>>, vector<16x288xf32>
    %c1_181 = arith.constant 1 : index
    %c64_182 = arith.constant 64 : index
    %c0_183 = arith.constant 0 : index
    %175 = vector.load %arg5[%c1_181, %c64_182, %c0_183] : memref<9x128x16xf32, #tpu.memory_space<vmem>>, vector<1x16x16xf32>
    %176 = vector.shape_cast %175 : vector<1x16x16xf32> to vector<16x16xf32>
    %cst_184 = arith.constant dense<0.000000e+00> : vector<16x288xf32>
    %177 = tpu.matmul %176, %174, %cst_184 {dimension_numbers = #tpu.dot_dimension_numbers<[1], [0], [0], [1], [0, 0, 1, 1], [], []>} : vector<16x16xf32>, vector<16x288xf32>, vector<16x288xf32> -> vector<16x288xf32>
    %178 = arith.addf %173, %177 : vector<16x288xf32>
    %c0_185 = arith.constant 0 : index
    %c111_186 = arith.constant 111 : index
    %179 = vector.load %arg9[%c0_185, %c111_186] : memref<16x448xf32, #tpu.memory_space<vmem>>, vector<16x288xf32>
    %c2_187 = arith.constant 2 : index
    %c64_188 = arith.constant 64 : index
    %c0_189 = arith.constant 0 : index
    %180 = vector.load %arg5[%c2_187, %c64_188, %c0_189] : memref<9x128x16xf32, #tpu.memory_space<vmem>>, vector<1x16x16xf32>
    %181 = vector.shape_cast %180 : vector<1x16x16xf32> to vector<16x16xf32>
    %cst_190 = arith.constant dense<0.000000e+00> : vector<16x288xf32>
    %182 = tpu.matmul %181, %179, %cst_190 {dimension_numbers = #tpu.dot_dimension_numbers<[1], [0], [0], [1], [0, 0, 1, 1], [], []>} : vector<16x16xf32>, vector<16x288xf32>, vector<16x288xf32> -> vector<16x288xf32>
    %183 = arith.addf %178, %182 : vector<16x288xf32>
    %c0_191 = arith.constant 0 : index
    %c127_192 = arith.constant 127 : index
    %184 = vector.load %arg9[%c0_191, %c127_192] : memref<16x448xf32, #tpu.memory_space<vmem>>, vector<16x288xf32>
    %c3_193 = arith.constant 3 : index
    %c64_194 = arith.constant 64 : index
    %c0_195 = arith.constant 0 : index
    %185 = vector.load %arg5[%c3_193, %c64_194, %c0_195] : memref<9x128x16xf32, #tpu.memory_space<vmem>>, vector<1x16x16xf32>
    %186 = vector.shape_cast %185 : vector<1x16x16xf32> to vector<16x16xf32>
    %cst_196 = arith.constant dense<0.000000e+00> : vector<16x288xf32>
    %187 = tpu.matmul %186, %184, %cst_196 {dimension_numbers = #tpu.dot_dimension_numbers<[1], [0], [0], [1], [0, 0, 1, 1], [], []>} : vector<16x16xf32>, vector<16x288xf32>, vector<16x288xf32> -> vector<16x288xf32>
    %188 = arith.addf %183, %187 : vector<16x288xf32>
    %c0_197 = arith.constant 0 : index
    %c128_198 = arith.constant 128 : index
    %189 = vector.load %arg9[%c0_197, %c128_198] : memref<16x448xf32, #tpu.memory_space<vmem>>, vector<16x288xf32>
    %c4_199 = arith.constant 4 : index
    %c64_200 = arith.constant 64 : index
    %c0_201 = arith.constant 0 : index
    %190 = vector.load %arg5[%c4_199, %c64_200, %c0_201] : memref<9x128x16xf32, #tpu.memory_space<vmem>>, vector<1x16x16xf32>
    %191 = vector.shape_cast %190 : vector<1x16x16xf32> to vector<16x16xf32>
    %cst_202 = arith.constant dense<0.000000e+00> : vector<16x288xf32>
    %192 = tpu.matmul %191, %189, %cst_202 {dimension_numbers = #tpu.dot_dimension_numbers<[1], [0], [0], [1], [0, 0, 1, 1], [], []>} : vector<16x16xf32>, vector<16x288xf32>, vector<16x288xf32> -> vector<16x288xf32>
    %193 = arith.addf %188, %192 : vector<16x288xf32>
    %c0_203 = arith.constant 0 : index
    %c129_204 = arith.constant 129 : index
    %194 = vector.load %arg9[%c0_203, %c129_204] : memref<16x448xf32, #tpu.memory_space<vmem>>, vector<16x288xf32>
    %c5_205 = arith.constant 5 : index
    %c64_206 = arith.constant 64 : index
    %c0_207 = arith.constant 0 : index
    %195 = vector.load %arg5[%c5_205, %c64_206, %c0_207] : memref<9x128x16xf32, #tpu.memory_space<vmem>>, vector<1x16x16xf32>
    %196 = vector.shape_cast %195 : vector<1x16x16xf32> to vector<16x16xf32>
    %cst_208 = arith.constant dense<0.000000e+00> : vector<16x288xf32>
    %197 = tpu.matmul %196, %194, %cst_208 {dimension_numbers = #tpu.dot_dimension_numbers<[1], [0], [0], [1], [0, 0, 1, 1], [], []>} : vector<16x16xf32>, vector<16x288xf32>, vector<16x288xf32> -> vector<16x288xf32>
    %198 = arith.addf %193, %197 : vector<16x288xf32>
    %c0_209 = arith.constant 0 : index
    %c145_210 = arith.constant 145 : index
    %199 = vector.load %arg9[%c0_209, %c145_210] : memref<16x448xf32, #tpu.memory_space<vmem>>, vector<16x288xf32>
    %c6_211 = arith.constant 6 : index
    %c64_212 = arith.constant 64 : index
    %c0_213 = arith.constant 0 : index
    %200 = vector.load %arg5[%c6_211, %c64_212, %c0_213] : memref<9x128x16xf32, #tpu.memory_space<vmem>>, vector<1x16x16xf32>
    %201 = vector.shape_cast %200 : vector<1x16x16xf32> to vector<16x16xf32>
    %cst_214 = arith.constant dense<0.000000e+00> : vector<16x288xf32>
    %202 = tpu.matmul %201, %199, %cst_214 {dimension_numbers = #tpu.dot_dimension_numbers<[1], [0], [0], [1], [0, 0, 1, 1], [], []>} : vector<16x16xf32>, vector<16x288xf32>, vector<16x288xf32> -> vector<16x288xf32>
    %203 = arith.addf %198, %202 : vector<16x288xf32>
    %c0_215 = arith.constant 0 : index
    %c146_216 = arith.constant 146 : index
    %204 = vector.load %arg9[%c0_215, %c146_216] : memref<16x448xf32, #tpu.memory_space<vmem>>, vector<16x288xf32>
    %c7_217 = arith.constant 7 : index
    %c64_218 = arith.constant 64 : index
    %c0_219 = arith.constant 0 : index
    %205 = vector.load %arg5[%c7_217, %c64_218, %c0_219] : memref<9x128x16xf32, #tpu.memory_space<vmem>>, vector<1x16x16xf32>
    %206 = vector.shape_cast %205 : vector<1x16x16xf32> to vector<16x16xf32>
    %cst_220 = arith.constant dense<0.000000e+00> : vector<16x288xf32>
    %207 = tpu.matmul %206, %204, %cst_220 {dimension_numbers = #tpu.dot_dimension_numbers<[1], [0], [0], [1], [0, 0, 1, 1], [], []>} : vector<16x16xf32>, vector<16x288xf32>, vector<16x288xf32> -> vector<16x288xf32>
    %208 = arith.addf %203, %207 : vector<16x288xf32>
    %c0_221 = arith.constant 0 : index
    %c147_222 = arith.constant 147 : index
    %209 = vector.load %arg9[%c0_221, %c147_222] : memref<16x448xf32, #tpu.memory_space<vmem>>, vector<16x288xf32>
    %c8_223 = arith.constant 8 : index
    %c64_224 = arith.constant 64 : index
    %c0_225 = arith.constant 0 : index
    %210 = vector.load %arg5[%c8_223, %c64_224, %c0_225] : memref<9x128x16xf32, #tpu.memory_space<vmem>>, vector<1x16x16xf32>
    %211 = vector.shape_cast %210 : vector<1x16x16xf32> to vector<16x16xf32>
    %cst_226 = arith.constant dense<0.000000e+00> : vector<16x288xf32>
    %212 = tpu.matmul %211, %209, %cst_226 {dimension_numbers = #tpu.dot_dimension_numbers<[1], [0], [0], [1], [0, 0, 1, 1], [], []>} : vector<16x16xf32>, vector<16x288xf32>, vector<16x288xf32> -> vector<16x288xf32>
    %213 = arith.addf %208, %212 : vector<16x288xf32>
    %214 = vector.broadcast %169 : vector<16x1xf32> to vector<16x288xf32>
    %215 = arith.addf %213, %214 : vector<16x288xf32>
    %216 = arith.mulf %215, %7 : vector<16x288xf32>
    %c0_227 = arith.constant 0 : index
    %c128_228 = arith.constant 128 : index
    %217 = vector.load %arg8[%c0_227, %c128_228] : memref<16x448xf32, #tpu.memory_space<vmem>>, vector<16x288xf32>
    tpu.vector_store %arg8[%c0_227, %c128_228], %216 {strides = array<i32>} : memref<16x448xf32, #tpu.memory_space<vmem>>, vector<16x288xf32>,
    %c80 = arith.constant 80 : index
    %c0_229 = arith.constant 0 : index
    %218 = vector.load %arg6[%c80, %c0_229] : memref<128x1xf32, #tpu.memory_space<vmem>>, vector<32x1xf32>
    %c0_230 = arith.constant 0 : index
    %c109_231 = arith.constant 109 : index
    %219 = vector.load %arg8[%c0_230, %c109_231] : memref<16x448xf32, #tpu.memory_space<vmem>>, vector<16x288xf32>
    %c0_232 = arith.constant 0 : index
    %c80_233 = arith.constant 80 : index
    %c0_234 = arith.constant 0 : index
    %220 = vector.load %arg5[%c0_232, %c80_233, %c0_234] : memref<9x128x16xf32, #tpu.memory_space<vmem>>, vector<1x32x16xf32>
    %221 = vector.shape_cast %220 : vector<1x32x16xf32> to vector<32x16xf32>
    %cst_235 = arith.constant dense<0.000000e+00> : vector<32x288xf32>
    %222 = tpu.matmul %221, %219, %cst_235 {dimension_numbers = #tpu.dot_dimension_numbers<[1], [0], [0], [1], [0, 0, 1, 1], [], []>} : vector<32x16xf32>, vector<16x288xf32>, vector<32x288xf32> -> vector<32x288xf32>
    %c0_236 = arith.constant 0 : index
    %c110_237 = arith.constant 110 : index
    %223 = vector.load %arg8[%c0_236, %c110_237] : memref<16x448xf32, #tpu.memory_space<vmem>>, vector<16x288xf32>
    %c1_238 = arith.constant 1 : index
    %c80_239 = arith.constant 80 : index
    %c0_240 = arith.constant 0 : index
    %224 = vector.load %arg5[%c1_238, %c80_239, %c0_240] : memref<9x128x16xf32, #tpu.memory_space<vmem>>, vector<1x32x16xf32>
    %225 = vector.shape_cast %224 : vector<1x32x16xf32> to vector<32x16xf32>
    %cst_241 = arith.constant dense<0.000000e+00> : vector<32x288xf32>
    %226 = tpu.matmul %225, %223, %cst_241 {dimension_numbers = #tpu.dot_dimension_numbers<[1], [0], [0], [1], [0, 0, 1, 1], [], []>} : vector<32x16xf32>, vector<16x288xf32>, vector<32x288xf32> -> vector<32x288xf32>
    %227 = arith.addf %222, %226 : vector<32x288xf32>
    %c0_242 = arith.constant 0 : index
    %c111_243 = arith.constant 111 : index
    %228 = vector.load %arg8[%c0_242, %c111_243] : memref<16x448xf32, #tpu.memory_space<vmem>>, vector<16x288xf32>
    %c2_244 = arith.constant 2 : index
    %c80_245 = arith.constant 80 : index
    %c0_246 = arith.constant 0 : index
    %229 = vector.load %arg5[%c2_244, %c80_245, %c0_246] : memref<9x128x16xf32, #tpu.memory_space<vmem>>, vector<1x32x16xf32>
    %230 = vector.shape_cast %229 : vector<1x32x16xf32> to vector<32x16xf32>
    %cst_247 = arith.constant dense<0.000000e+00> : vector<32x288xf32>
    %231 = tpu.matmul %230, %228, %cst_247 {dimension_numbers = #tpu.dot_dimension_numbers<[1], [0], [0], [1], [0, 0, 1, 1], [], []>} : vector<32x16xf32>, vector<16x288xf32>, vector<32x288xf32> -> vector<32x288xf32>
    %232 = arith.addf %227, %231 : vector<32x288xf32>
    %c0_248 = arith.constant 0 : index
    %c127_249 = arith.constant 127 : index
    %233 = vector.load %arg8[%c0_248, %c127_249] : memref<16x448xf32, #tpu.memory_space<vmem>>, vector<16x288xf32>
    %c3_250 = arith.constant 3 : index
    %c80_251 = arith.constant 80 : index
    %c0_252 = arith.constant 0 : index
    %234 = vector.load %arg5[%c3_250, %c80_251, %c0_252] : memref<9x128x16xf32, #tpu.memory_space<vmem>>, vector<1x32x16xf32>
    %235 = vector.shape_cast %234 : vector<1x32x16xf32> to vector<32x16xf32>
    %cst_253 = arith.constant dense<0.000000e+00> : vector<32x288xf32>
    %236 = tpu.matmul %235, %233, %cst_253 {dimension_numbers = #tpu.dot_dimension_numbers<[1], [0], [0], [1], [0, 0, 1, 1], [], []>} : vector<32x16xf32>, vector<16x288xf32>, vector<32x288xf32> -> vector<32x288xf32>
    %237 = arith.addf %232, %236 : vector<32x288xf32>
    %c0_254 = arith.constant 0 : index
    %c128_255 = arith.constant 128 : index
    %238 = vector.load %arg8[%c0_254, %c128_255] : memref<16x448xf32, #tpu.memory_space<vmem>>, vector<16x288xf32>
    %c4_256 = arith.constant 4 : index
    %c80_257 = arith.constant 80 : index
    %c0_258 = arith.constant 0 : index
    %239 = vector.load %arg5[%c4_256, %c80_257, %c0_258] : memref<9x128x16xf32, #tpu.memory_space<vmem>>, vector<1x32x16xf32>
    %240 = vector.shape_cast %239 : vector<1x32x16xf32> to vector<32x16xf32>
    %cst_259 = arith.constant dense<0.000000e+00> : vector<32x288xf32>
    %241 = tpu.matmul %240, %238, %cst_259 {dimension_numbers = #tpu.dot_dimension_numbers<[1], [0], [0], [1], [0, 0, 1, 1], [], []>} : vector<32x16xf32>, vector<16x288xf32>, vector<32x288xf32> -> vector<32x288xf32>
    %242 = arith.addf %237, %241 : vector<32x288xf32>
    %c0_260 = arith.constant 0 : index
    %c129_261 = arith.constant 129 : index
    %243 = vector.load %arg8[%c0_260, %c129_261] : memref<16x448xf32, #tpu.memory_space<vmem>>, vector<16x288xf32>
    %c5_262 = arith.constant 5 : index
    %c80_263 = arith.constant 80 : index
    %c0_264 = arith.constant 0 : index
    %244 = vector.load %arg5[%c5_262, %c80_263, %c0_264] : memref<9x128x16xf32, #tpu.memory_space<vmem>>, vector<1x32x16xf32>
    %245 = vector.shape_cast %244 : vector<1x32x16xf32> to vector<32x16xf32>
    %cst_265 = arith.constant dense<0.000000e+00> : vector<32x288xf32>
    %246 = tpu.matmul %245, %243, %cst_265 {dimension_numbers = #tpu.dot_dimension_numbers<[1], [0], [0], [1], [0, 0, 1, 1], [], []>} : vector<32x16xf32>, vector<16x288xf32>, vector<32x288xf32> -> vector<32x288xf32>
    %247 = arith.addf %242, %246 : vector<32x288xf32>
    %c0_266 = arith.constant 0 : index
    %c145_267 = arith.constant 145 : index
    %248 = vector.load %arg8[%c0_266, %c145_267] : memref<16x448xf32, #tpu.memory_space<vmem>>, vector<16x288xf32>
    %c6_268 = arith.constant 6 : index
    %c80_269 = arith.constant 80 : index
    %c0_270 = arith.constant 0 : index
    %249 = vector.load %arg5[%c6_268, %c80_269, %c0_270] : memref<9x128x16xf32, #tpu.memory_space<vmem>>, vector<1x32x16xf32>
    %250 = vector.shape_cast %249 : vector<1x32x16xf32> to vector<32x16xf32>
    %cst_271 = arith.constant dense<0.000000e+00> : vector<32x288xf32>
    %251 = tpu.matmul %250, %248, %cst_271 {dimension_numbers = #tpu.dot_dimension_numbers<[1], [0], [0], [1], [0, 0, 1, 1], [], []>} : vector<32x16xf32>, vector<16x288xf32>, vector<32x288xf32> -> vector<32x288xf32>
    %252 = arith.addf %247, %251 : vector<32x288xf32>
    %c0_272 = arith.constant 0 : index
    %c146_273 = arith.constant 146 : index
    %253 = vector.load %arg8[%c0_272, %c146_273] : memref<16x448xf32, #tpu.memory_space<vmem>>, vector<16x288xf32>
    %c7_274 = arith.constant 7 : index
    %c80_275 = arith.constant 80 : index
    %c0_276 = arith.constant 0 : index
    %254 = vector.load %arg5[%c7_274, %c80_275, %c0_276] : memref<9x128x16xf32, #tpu.memory_space<vmem>>, vector<1x32x16xf32>
    %255 = vector.shape_cast %254 : vector<1x32x16xf32> to vector<32x16xf32>
    %cst_277 = arith.constant dense<0.000000e+00> : vector<32x288xf32>
    %256 = tpu.matmul %255, %253, %cst_277 {dimension_numbers = #tpu.dot_dimension_numbers<[1], [0], [0], [1], [0, 0, 1, 1], [], []>} : vector<32x16xf32>, vector<16x288xf32>, vector<32x288xf32> -> vector<32x288xf32>
    %257 = arith.addf %252, %256 : vector<32x288xf32>
    %c0_278 = arith.constant 0 : index
    %c147_279 = arith.constant 147 : index
    %258 = vector.load %arg8[%c0_278, %c147_279] : memref<16x448xf32, #tpu.memory_space<vmem>>, vector<16x288xf32>
    %c8_280 = arith.constant 8 : index
    %c80_281 = arith.constant 80 : index
    %c0_282 = arith.constant 0 : index
    %259 = vector.load %arg5[%c8_280, %c80_281, %c0_282] : memref<9x128x16xf32, #tpu.memory_space<vmem>>, vector<1x32x16xf32>
    %260 = vector.shape_cast %259 : vector<1x32x16xf32> to vector<32x16xf32>
    %cst_283 = arith.constant dense<0.000000e+00> : vector<32x288xf32>
    %261 = tpu.matmul %260, %258, %cst_283 {dimension_numbers = #tpu.dot_dimension_numbers<[1], [0], [0], [1], [0, 0, 1, 1], [], []>} : vector<32x16xf32>, vector<16x288xf32>, vector<32x288xf32> -> vector<32x288xf32>
    %262 = arith.addf %257, %261 : vector<32x288xf32>
    %263 = vector.broadcast %218 : vector<32x1xf32> to vector<32x288xf32>
    %264 = arith.addf %262, %263 : vector<32x288xf32>
    %265 = vector.extract_strided_slice %264 {offsets = [0, 0], sizes = [16, 288], strides = [1, 1]} : vector<32x288xf32> to vector<16x288xf32>
    %cst_284 = arith.constant 0.000000e+00 : f32
    %266 = vector.broadcast %cst_284 : f32 to vector<16x288xf32>
    %267 = arith.maximumf %265, %266 : vector<16x288xf32>
    %268 = vector.extract_strided_slice %264 {offsets = [16, 0], sizes = [16, 288], strides = [1, 1]} : vector<32x288xf32> to vector<16x288xf32>
    %269 = arith.mulf %267, %7 : vector<16x288xf32>
    %c0_285 = arith.constant 0 : index
    %c128_286 = arith.constant 128 : index
    %270 = vector.load %arg9[%c0_285, %c128_286] : memref<16x448xf32, #tpu.memory_space<vmem>>, vector<16x288xf32>
    tpu.vector_store %arg9[%c0_285, %c128_286], %269 {strides = array<i32>} : memref<16x448xf32, #tpu.memory_space<vmem>>, vector<16x288xf32>,
    %c112 = arith.constant 112 : index
    %c0_287 = arith.constant 0 : index
    %271 = vector.load %arg6[%c112, %c0_287] : memref<128x1xf32, #tpu.memory_space<vmem>>, vector<16x1xf32>
    %c0_288 = arith.constant 0 : index
    %c109_289 = arith.constant 109 : index
    %272 = vector.load %arg9[%c0_288, %c109_289] : memref<16x448xf32, #tpu.memory_space<vmem>>, vector<16x288xf32>
    %c0_290 = arith.constant 0 : index
    %c112_291 = arith.constant 112 : index
    %c0_292 = arith.constant 0 : index
    %273 = vector.load %arg5[%c0_290, %c112_291, %c0_292] : memref<9x128x16xf32, #tpu.memory_space<vmem>>, vector<1x16x16xf32>
    %274 = vector.shape_cast %273 : vector<1x16x16xf32> to vector<16x16xf32>
    %cst_293 = arith.constant dense<0.000000e+00> : vector<16x288xf32>
    %275 = tpu.matmul %274, %272, %cst_293 {dimension_numbers = #tpu.dot_dimension_numbers<[1], [0], [0], [1], [0, 0, 1, 1], [], []>} : vector<16x16xf32>, vector<16x288xf32>, vector<16x288xf32> -> vector<16x288xf32>
    %c0_294 = arith.constant 0 : index
    %c110_295 = arith.constant 110 : index
    %276 = vector.load %arg9[%c0_294, %c110_295] : memref<16x448xf32, #tpu.memory_space<vmem>>, vector<16x288xf32>
    %c1_296 = arith.constant 1 : index
    %c112_297 = arith.constant 112 : index
    %c0_298 = arith.constant 0 : index
    %277 = vector.load %arg5[%c1_296, %c112_297, %c0_298] : memref<9x128x16xf32, #tpu.memory_space<vmem>>, vector<1x16x16xf32>
    %278 = vector.shape_cast %277 : vector<1x16x16xf32> to vector<16x16xf32>
    %cst_299 = arith.constant dense<0.000000e+00> : vector<16x288xf32>
    %279 = tpu.matmul %278, %276, %cst_299 {dimension_numbers = #tpu.dot_dimension_numbers<[1], [0], [0], [1], [0, 0, 1, 1], [], []>} : vector<16x16xf32>, vector<16x288xf32>, vector<16x288xf32> -> vector<16x288xf32>
    %280 = arith.addf %275, %279 : vector<16x288xf32>
    %c0_300 = arith.constant 0 : index
    %c111_301 = arith.constant 111 : index
    %281 = vector.load %arg9[%c0_300, %c111_301] : memref<16x448xf32, #tpu.memory_space<vmem>>, vector<16x288xf32>
    %c2_302 = arith.constant 2 : index
    %c112_303 = arith.constant 112 : index
    %c0_304 = arith.constant 0 : index
    %282 = vector.load %arg5[%c2_302, %c112_303, %c0_304] : memref<9x128x16xf32, #tpu.memory_space<vmem>>, vector<1x16x16xf32>
    %283 = vector.shape_cast %282 : vector<1x16x16xf32> to vector<16x16xf32>
    %cst_305 = arith.constant dense<0.000000e+00> : vector<16x288xf32>
    %284 = tpu.matmul %283, %281, %cst_305 {dimension_numbers = #tpu.dot_dimension_numbers<[1], [0], [0], [1], [0, 0, 1, 1], [], []>} : vector<16x16xf32>, vector<16x288xf32>, vector<16x288xf32> -> vector<16x288xf32>
    %285 = arith.addf %280, %284 : vector<16x288xf32>
    %c0_306 = arith.constant 0 : index
    %c127_307 = arith.constant 127 : index
    %286 = vector.load %arg9[%c0_306, %c127_307] : memref<16x448xf32, #tpu.memory_space<vmem>>, vector<16x288xf32>
    %c3_308 = arith.constant 3 : index
    %c112_309 = arith.constant 112 : index
    %c0_310 = arith.constant 0 : index
    %287 = vector.load %arg5[%c3_308, %c112_309, %c0_310] : memref<9x128x16xf32, #tpu.memory_space<vmem>>, vector<1x16x16xf32>
    %288 = vector.shape_cast %287 : vector<1x16x16xf32> to vector<16x16xf32>
    %cst_311 = arith.constant dense<0.000000e+00> : vector<16x288xf32>
    %289 = tpu.matmul %288, %286, %cst_311 {dimension_numbers = #tpu.dot_dimension_numbers<[1], [0], [0], [1], [0, 0, 1, 1], [], []>} : vector<16x16xf32>, vector<16x288xf32>, vector<16x288xf32> -> vector<16x288xf32>
    %290 = arith.addf %285, %289 : vector<16x288xf32>
    %c0_312 = arith.constant 0 : index
    %c128_313 = arith.constant 128 : index
    %291 = vector.load %arg9[%c0_312, %c128_313] : memref<16x448xf32, #tpu.memory_space<vmem>>, vector<16x288xf32>
    %c4_314 = arith.constant 4 : index
    %c112_315 = arith.constant 112 : index
    %c0_316 = arith.constant 0 : index
    %292 = vector.load %arg5[%c4_314, %c112_315, %c0_316] : memref<9x128x16xf32, #tpu.memory_space<vmem>>, vector<1x16x16xf32>
    %293 = vector.shape_cast %292 : vector<1x16x16xf32> to vector<16x16xf32>
    %cst_317 = arith.constant dense<0.000000e+00> : vector<16x288xf32>
    %294 = tpu.matmul %293, %291, %cst_317 {dimension_numbers = #tpu.dot_dimension_numbers<[1], [0], [0], [1], [0, 0, 1, 1], [], []>} : vector<16x16xf32>, vector<16x288xf32>, vector<16x288xf32> -> vector<16x288xf32>
    %295 = arith.addf %290, %294 : vector<16x288xf32>
    %c0_318 = arith.constant 0 : index
    %c129_319 = arith.constant 129 : index
    %296 = vector.load %arg9[%c0_318, %c129_319] : memref<16x448xf32, #tpu.memory_space<vmem>>, vector<16x288xf32>
    %c5_320 = arith.constant 5 : index
    %c112_321 = arith.constant 112 : index
    %c0_322 = arith.constant 0 : index
    %297 = vector.load %arg5[%c5_320, %c112_321, %c0_322] : memref<9x128x16xf32, #tpu.memory_space<vmem>>, vector<1x16x16xf32>
    %298 = vector.shape_cast %297 : vector<1x16x16xf32> to vector<16x16xf32>
    %cst_323 = arith.constant dense<0.000000e+00> : vector<16x288xf32>
    %299 = tpu.matmul %298, %296, %cst_323 {dimension_numbers = #tpu.dot_dimension_numbers<[1], [0], [0], [1], [0, 0, 1, 1], [], []>} : vector<16x16xf32>, vector<16x288xf32>, vector<16x288xf32> -> vector<16x288xf32>
    %300 = arith.addf %295, %299 : vector<16x288xf32>
    %c0_324 = arith.constant 0 : index
    %c145_325 = arith.constant 145 : index
    %301 = vector.load %arg9[%c0_324, %c145_325] : memref<16x448xf32, #tpu.memory_space<vmem>>, vector<16x288xf32>
    %c6_326 = arith.constant 6 : index
    %c112_327 = arith.constant 112 : index
    %c0_328 = arith.constant 0 : index
    %302 = vector.load %arg5[%c6_326, %c112_327, %c0_328] : memref<9x128x16xf32, #tpu.memory_space<vmem>>, vector<1x16x16xf32>
    %303 = vector.shape_cast %302 : vector<1x16x16xf32> to vector<16x16xf32>
    %cst_329 = arith.constant dense<0.000000e+00> : vector<16x288xf32>
    %304 = tpu.matmul %303, %301, %cst_329 {dimension_numbers = #tpu.dot_dimension_numbers<[1], [0], [0], [1], [0, 0, 1, 1], [], []>} : vector<16x16xf32>, vector<16x288xf32>, vector<16x288xf32> -> vector<16x288xf32>
    %305 = arith.addf %300, %304 : vector<16x288xf32>
    %c0_330 = arith.constant 0 : index
    %c146_331 = arith.constant 146 : index
    %306 = vector.load %arg9[%c0_330, %c146_331] : memref<16x448xf32, #tpu.memory_space<vmem>>, vector<16x288xf32>
    %c7_332 = arith.constant 7 : index
    %c112_333 = arith.constant 112 : index
    %c0_334 = arith.constant 0 : index
    %307 = vector.load %arg5[%c7_332, %c112_333, %c0_334] : memref<9x128x16xf32, #tpu.memory_space<vmem>>, vector<1x16x16xf32>
    %308 = vector.shape_cast %307 : vector<1x16x16xf32> to vector<16x16xf32>
    %cst_335 = arith.constant dense<0.000000e+00> : vector<16x288xf32>
    %309 = tpu.matmul %308, %306, %cst_335 {dimension_numbers = #tpu.dot_dimension_numbers<[1], [0], [0], [1], [0, 0, 1, 1], [], []>} : vector<16x16xf32>, vector<16x288xf32>, vector<16x288xf32> -> vector<16x288xf32>
    %310 = arith.addf %305, %309 : vector<16x288xf32>
    %c0_336 = arith.constant 0 : index
    %c147_337 = arith.constant 147 : index
    %311 = vector.load %arg9[%c0_336, %c147_337] : memref<16x448xf32, #tpu.memory_space<vmem>>, vector<16x288xf32>
    %c8_338 = arith.constant 8 : index
    %c112_339 = arith.constant 112 : index
    %c0_340 = arith.constant 0 : index
    %312 = vector.load %arg5[%c8_338, %c112_339, %c0_340] : memref<9x128x16xf32, #tpu.memory_space<vmem>>, vector<1x16x16xf32>
    %313 = vector.shape_cast %312 : vector<1x16x16xf32> to vector<16x16xf32>
    %cst_341 = arith.constant dense<0.000000e+00> : vector<16x288xf32>
    %314 = tpu.matmul %313, %311, %cst_341 {dimension_numbers = #tpu.dot_dimension_numbers<[1], [0], [0], [1], [0, 0, 1, 1], [], []>} : vector<16x16xf32>, vector<16x288xf32>, vector<16x288xf32> -> vector<16x288xf32>
    %315 = arith.addf %310, %314 : vector<16x288xf32>
    %316 = vector.broadcast %271 : vector<16x1xf32> to vector<16x288xf32>
    %317 = arith.addf %315, %316 : vector<16x288xf32>
    %318 = arith.addf %317, %268 : vector<16x288xf32>
    %c0_342 = arith.constant 0 : index
    %c0_343 = arith.constant 0 : index
    %c0_344 = arith.constant 0 : index
    %319 = vector.load %arg7[%c0_342, %c0_343, %c0_344] : memref<1x16x288xf32, #tpu.memory_space<vmem>>, vector<1x16x288xf32>
    %320 = vector.shape_cast %319 : vector<1x16x288xf32> to vector<16x288xf32>
    %321 = vector.shape_cast %318 : vector<16x288xf32> to vector<1x16x288xf32>
    tpu.vector_store %arg7[%c0_342, %c0_343, %c0_344], %321 {strides = array<i32>} : memref<1x16x288xf32, #tpu.memory_space<vmem>>, vector<1x16x288xf32>,
    return
  }
  func.func @transform_0(%arg0: i32) -> (i32, i32, i32) {
    %c0_i32 = arith.constant 0 : i32
    %c0_i32_0 = arith.constant 0 : i32
    %c0_i32_1 = arith.constant 0 : i32
    return %arg0, %c0_i32, %c0_i32_0 : i32, i32, i32
  }
  func.func @transform_1(%arg0: i32) -> (i32, i32) {
    %c0_i32 = arith.constant 0 : i32
    %c0_i32_0 = arith.constant 0 : i32
    %c0_i32_1 = arith.constant 0 : i32
    return %c0_i32, %c0_i32_0 : i32, i32
  }
  func.func @transform_2(%arg0: i32) -> (i32, i32) {
    %c0_i32 = arith.constant 0 : i32
    %c0_i32_0 = arith.constant 0 : i32
    %c0_i32_1 = arith.constant 0 : i32
    return %c0_i32, %c0_i32_0 : i32, i32
  }
  func.func @transform_3(%arg0: i32) -> (i32, i32) {
    %c0_i32 = arith.constant 0 : i32
    %c0_i32_0 = arith.constant 0 : i32
    %c0_i32_1 = arith.constant 0 : i32
    return %c0_i32, %c0_i32_0 : i32, i32
  }
  func.func @transform_4(%arg0: i32) -> (i32, i32, i32) {
    %c0_i32 = arith.constant 0 : i32
    %c0_i32_0 = arith.constant 0 : i32
    %c0_i32_1 = arith.constant 0 : i32
    %c0_i32_2 = arith.constant 0 : i32
    return %c0_i32, %c0_i32_0, %c0_i32_1 : i32, i32, i32
  }
  func.func @transform_5(%arg0: i32) -> (i32, i32) {
    %c0_i32 = arith.constant 0 : i32
    %c0_i32_0 = arith.constant 0 : i32
    %c0_i32_1 = arith.constant 0 : i32
    return %c0_i32, %c0_i32_0 : i32, i32
  }
  func.func @transform_6(%arg0: i32) -> (i32, i32, i32) {
    %c0_i32 = arith.constant 0 : i32
    %c0_i32_0 = arith.constant 0 : i32
    %c0_i32_1 = arith.constant 0 : i32
    return %arg0, %c0_i32, %c0_i32_0 : i32, i32, i32
  }
}

</mosaic_0001>

<bundles_post_ra>
// kernel: feature_extract.1
= control target key start
LH: loop header
LB: loop body
LE: loop exit
PB: predicated region body
PF: predicated region fallthrough
CT: control target
= control target key end

     0   :  { %s14495_s21 = smov 0   ;;  %s16458_s0 = inlined_call_operand.vmem [shape: f32[2,4,324], index: 0, kind: input, shape index: {}]   ;;  %s16459_s1 = inlined_call_operand.vmem [shape: f32[1,288], index: 1, kind: input, shape index: {}]   ;;  %s16460_s2 = inlined_call_operand.vmem [shape: f32[16,4], index: 2, kind: input, shape index: {}]   ;;  %s16461_s3 = inlined_call_operand.vmem [shape: f32[16,1], index: 3, kind: input, shape index: {}]   ;;  %s16462_s4 = inlined_call_operand.vmem [shape: f32[9,128,16], index: 4, kind: input, shape index: {}]   ;;  %s16463_s5 = inlined_call_operand.vmem [shape: f32[128,1], index: 5, kind: input, shape index: {}]   ;;  %s16464_s6 = inlined_call_operand.vmem [shape: f32[2,16,288], index: 6, kind: output, shape index: {}]  }
   0x1 LB: > { %s11603_s22 = sadd.s32 4294967295, %s14448_s21   ;;  %p11607_p0 = scmp.ge.s32.totalorder %s14448_s21, 1  ;;  %s14448_s21 = sphi %s14495_s21, %s16_s21  }
   0x2   : > { %p212_p1 = scmp.lt.s32.totalorder %s14448_s21, 3 }
   0x4   : > { %p213_p2 = pnand %p11607_p0, %p212_p1 }
   0x5   : > { %p242_p3 = scmp.lt.s32.totalorder (!%p213_p2), %s11603_s22, 1  ;;  %v281_v0 = vld [vmem:[%s16460_s2] sm:$0xff] (!%p213_p2)  ;;  %vm307_vm0 = vcmask (!%p213_p2), 31744   ;;  %v14450_v1 = vmov (!%p213_p2), 0.0   ;;  %s14451_s29 = smov (!%p213_p2), 109   ;;  %v14452_v4 = vmov (!%p213_p2), 0   ;;  %v264_v17 = vlaneseq (!%p213_p2) }
   0x6   : > { %216 = sbr.rel (%p213_p2) target bundleno = 3172 (0xc64), region = 44  ;;  %12292 = vmatprep.mubr.msk.f32.mxu1 (!%p213_p2), %vm307_vm0, %v281_v0  ;;  %385 = vmatprep.mubr.f32.mxu0 (!%p213_p2), %v14450_v1  ;;  %v283_v5 = vld [vmem:[%s16461_s3] sm:$0xff] (!%p213_p2)  ;;  %v284_v7 = vld [vmem:[%s16461_s3 + $0x8] sm:$0xff] (!%p213_p2)  ;;  %vm314_vm1 = vcmask (!%p213_p2), 1043456   ;;  %vm304_vm2 = vcmask (!%p213_p2), 891904   ;;  %vm252_vm3 = vcmask (!%p213_p2), 1048320  }
   0x7   : > { %13599 = vset.pattern.permute.xlu1 (!%p213_p2), %v14452_v4  ;;  %13600 = vset.pattern.permute.xlu0 (!%p213_p2), %v14452_v4  ;;  %v282_v11 = vld [vmem:[%s16460_s2 + $0x8] sm:$0xff] (!%p213_p2)  ;;  %253 = vst.msk [vmem:[#allocation2] sm:$0xff] (!%p213_p2), %vm252_vm3, %v14450_v1  ;;  %254 = vst.msk [vmem:[#allocation2 + $0x20] sm:$0xff] (!%p213_p2), %vm252_vm3, %v14450_v1  ;;  %vm255_vm4 = vcmask (!%p213_p2), 523520   ;;  %s14453_s12 = smov (!%p213_p2), 19   ;;  %v265_v18 = vshrl.u32 (!%p213_p2), %v264_v17, 7 }
   0x8   : > { %258 = vst.msk [vmem:[#allocation3] sm:$0xff] (!%p213_p2), %vm252_vm3, %v14450_v1  ;;  %259 = vst.msk [vmem:[#allocation3 + $0x20] sm:$0xff] (!%p213_p2), %vm252_vm3, %v14450_v1  ;;  %v262_v20 = vld [vmem:[%s16459_s1] sm:$0x7] (!%p213_p2)  ;;  %vm481_vm5 = vcmask (!%p213_p2), 261120   ;;  %s14454_s15 = smov (!%p213_p2), 17  }
   0x9   : > { %256 = vst.msk [vmem:[#allocation2 + $0x18] sm:$0xff] (!%p213_p2), %vm255_vm4, %v14450_v1  ;;  %257 = vst.msk [vmem:[#allocation2 + $0x38] sm:$0xff] (!%p213_p2), %vm255_vm4, %v14450_v1  ;;  %v274_v19 = vsub.s32 (!%p213_p2), 2, %v265_v18  ;;  %v266_v21 = vsub.s32 (!%p213_p2), 0, %v265_v18  ;;  %v270_v22 = vsub.s32 (!%p213_p2), 1, %v265_v18  ;;  %s14455_s16 = smov (!%p213_p2), 18  }
   0xa   : > { %260 = vst.msk [vmem:[#allocation3 + $0x18] sm:$0xff] (!%p213_p2), %vm255_vm4, %v14450_v1  ;;  %261 = vst.msk [vmem:[#allocation3 + $0x38] sm:$0xff] (!%p213_p2), %vm255_vm4, %v14450_v1  ;;  %s14456_s17 = smov (!%p213_p2), 1   ;;  %s14457_s18 = smov (!%p213_p2), 127   ;;  %v486_v56 = vld [vmem:[%s16463_s5] sm:$0xff] (!%p213_p2)  ;;  %v487_v57 = vld [vmem:[%s16463_s5 + $0x8] sm:$0xff] (!%p213_p2) }
   0xb   : > { %v14546_v25 = vrot.slane (!%p213_p2), %v262_v20, %v274_v19  ;;  %v14548_v26 = vrot.slane (!%p213_p2), %v262_v20, %v266_v21  ;;  %v14550_v29 = vrot.slane (!%p213_p2), %v262_v20, %v270_v22  ;;  %s14458_s19 = smov (!%p213_p2), 111   ;;  %s14459_s20 = smov (!%p213_p2), 110   ;;  %vm525_vm6 = vcmask (!%p213_p2), 146432  }
   0xc   : > { %vm713_vm7 = vcmask (!%p213_p2), 154624   ;;  %vm538_vm8 = vcmask (!%p213_p2), 130048   ;;  %vm903_vm9 = vcmask (!%p213_p2), 138240   ;;  %vm1099_vm10 = vcmask (!%p213_p2), 7168  }
   0xd   : > { %s16466_s22 = smov (!%p242_p3, %s11603_s22), 1  ;;  %vm1458_vm11 = vcmask 1039360   ;;  %vm1648_vm12 = vcmask 908288   ;;  %vm1838_vm13 = vcmask 900096  }
   0xe   : > { %s13579_s25 = smul.u32 12, %s16466_s22  ;;  %v488_v14 = vld [vmem:[#allocation2] sm:$0xff] }
   0xf   : > { %v492_v15 = vld [vmem:[#allocation2 + $0x20] sm:$0xff] }
  0x10   : > { %s246_s28 = scalar_lea.vmem %s16458_s0, %s13579_s25  ;;  %v13601_v16 = vpack.i.bf16 %v492_v15, %v488_v14 }
  0x11   : > { %v279_v2 = vld [vmem:[%s246_s28] sm:$0xff]  ;;  %v280_v6 = vld [vmem:[%s246_s28 + $0x8] sm:$0xf] }
  0x12   : > { %298 = vrot.lane.b32.xlu1 %v279_v2, %s14451_s29  ;;  %v297_v3 = vcombine.high %v279_v2, %v279_v2 }
  0x14   : > { %300 = vrot.lane.b32.xlu0 %v297_v3, %s14451_s29 }
  0x16   : > { %287 = vperm.xlu1 %13599, %v283_v5  }
  0x18   : > { %302 = vrot.lane.b32.xlu0 %v280_v6, %s14451_s29 }
  0x1c   : > { %292 = vperm.xlu0 %13600, %v284_v7  }
  0x20   : > { %13602 = vrot.lane.b32.xlu0 %v13601_v16, %s14453_s12 }
  0x84   : > { %v299_v9 = vpop.permute.xlu1 %298 }
  0x86   : > { %v301_v8 = vpop.permute.xlu0 %300 }
  0x87   : > { %v305_v13 = vsel %vm304_vm2, %v299_v9, %v301_v8 }
  0x8a   : > { %v303_v10 = vpop.permute.xlu0 %302 }
  0x8b   : > { %12290 = vmatprep.subr.msk.mxu1 %vm314_vm1, %v303_v10  ;;  %v306_v12 = vsel %vm304_vm2, %v301_v8, %v303_v10 }
  0x8c   : > { %11610 = vmatprep.subr.msk.mxu0 %vm314_vm1, %v306_v12  ;;  %12291 = vmatpush3.msk.msra.mxu1 %vm314_vm1, %v303_v10 }
  0x8d   : > { %11611 = vmatpush1.msk.msra.mxu0 %vm314_vm1, %v305_v13  ;;  %12293 = vmatmul.mubr.msk.f32.vlgmr.msra.gmra.mrb[0].mxu1 %vm307_vm0, %v282_v11 }
  0x8e   : > { %11612 = vmatmul.mubr.msk.f32.vlgmr.msra.gmra.mrb[0].mxu0 %vm307_vm0, %v281_v0  ;;  %796 = vmatprep.mubr.f32.mxu1 %v14450_v1 }
  0x8f   : > { %391 = vmatprep.mubr.f32.mxu0 %v14450_v1 }
  0x92   : > { %11613 = vmatmul.mubr.msk.f32.gmra.mrb[2].mxu0 %vm307_vm0, %v282_v11 }
  0x93   : > { %609 = vmatprep.mubr.f32.mxu0 %v14450_v1 }
  0x95   : > { %v288_v24 = vpop.permute.xlu1 %287 }
  0x9b   : > { %v293_v23 = vpop.permute.xlu0 %292 }
  0x9f   : > { %v13603_v58 = vpop.permute.xlu0 %13602 }
  0xa0   : > { %v13604_v4 = vunpack.i.l.bf16 %v13603_v58  ;;  %v13605_v12 = vunpack.i.h.bf16 %v13603_v58 }
 0x160   : > { %v12294_v27 = vpop.f32.mrb[0].mxu1 }
 0x161   : > { %v387_v28 = vpop.f32.mrb[0].mxu0  ;;  %v464_v30 = vpop.f32.mrb[1].mxu1  ;;  %v470_v31 = vadd.f32 %v12294_v27, %v293_v23 }
 0x162   : > { %v388_v32 = vadd.f32 %v387_v28, %v288_v24  ;;  %v389_v33 = vpop.f32.mrb[1].mxu0  ;;  %v465_v34 = vadd.f32 %v464_v30, %v288_v24 }
 0x163   : > { %v390_v35 = vadd.f32 %v389_v33, %v288_v24  ;;  %v478_v36 = vmul.f32 %v470_v31, %v14546_v25 }
 0x164   : > { %v14554_v37 = vmul.f32 %v388_v32, %v14548_v26  ;;  %v475_v38 = vmul.f32 %v465_v34, %v14546_v25  ;;  %v14662_v34 = vld [vmem:[%s16462_s4] sm:$0xff] }
 0x165   : > { %v14558_v39 = vmul.f32 %v390_v35, %v14550_v29  ;;  %485 = vst.msk [vmem:[#allocation2 + $0x38] sm:$0xff] %vm481_vm5, %v478_v36  ;;  %v393_v40 = vpop.f32.mrb[2].mxu0 }
 0x166   : > { %482 = vst.msk [vmem:[#allocation2 + $0x18] sm:$0xff] %vm481_vm5, %v475_v38  ;;  %v394_v41 = vadd.f32 %v393_v40, %v293_v23  ;;  %v395_v42 = vpop.f32.mrb[3].mxu0 }
 0x167   : > { %v396_v43 = vadd.f32 %v395_v42, %v293_v23  ;;  %v13626_v44 = vpack.i.bf16 %v14558_v39, %v14554_v37  ;;  %v11617_v42 = vld [vmem:[%s16462_s4 + $0x80] sm:$0xff] }
 0x168   : > { %v14565_v45 = vmul.f32 %v394_v41, %v14548_v26 }
 0x169   : > { %v14568_v46 = vmul.f32 %v396_v43, %v14550_v29  ;;  %13627 = vrot.lane.b32.xlu0 %v13626_v44, %s14454_s15  ;;  %13607 = vrot.lane.b32.xlu1 %v13626_v44, %s14453_s12 }
 0x16a   : > { %v13681_v47 = vpack.i.bf16 %v14565_v45, %v14554_v37  ;;  %v12761_v48 = vpack.c.bf16 %v14565_v45, %v14554_v37 }
 0x16b   : > { %v13631_v49 = vpack.i.bf16 %v14568_v46, %v14565_v45  ;;  %v12759_v50 = vpack.c.bf16 %v14568_v46, %v14558_v39 }
 0x16c   : > { %v14588_v52 = vld [vmem:[#allocation2 + $0x38] sm:$0xff] }
 0x16d   : > { %13612 = vrot.lane.b32.xlu1 %v13626_v44, %s14455_s16  ;;  %13632 = vrot.lane.b32.xlu0 %v13631_v49, %s14455_s16  ;;  %v14586_v51 = vld [vmem:[#allocation2 + $0x18] sm:$0xff]  ;;  %v13686_v54 = vpack.i.bf16 %v14588_v52, %v14568_v46 }
 0x16e   : > { %v13671_v53 = vpack.i.bf16 %v14588_v52, %v14586_v51  ;;  %v13676_v55 = vpack.i.bf16 %v14586_v51, %v14558_v39 }
 0x171   : > { %13637 = vrot.lane.b32.xlu0 %v13601_v16, %s14454_s15  ;;  %13617 = vrot.lane.b32.xlu1 %v13631_v49, %s14453_s12 }
 0x175   : > { %13652 = vrot.lane.b32.xlu0 %v13626_v44, %s14456_s17  ;;  %13622 = vrot.lane.b32.xlu1 %v13601_v16, %s14455_s16 }
 0x179   : > { %13662 = vrot.lane.b32.xlu0 %v13601_v16, %s14456_s17  ;;  %13642 = vrot.lane.b32.xlu1 %v13631_v49, %s14454_s15 }
 0x17d   : > { %13672 = vrot.lane.b32.xlu0 %v13671_v53, %s14454_s15  ;;  %13647 = vrot.lane.b32.xlu1 %v13671_v53, %s14455_s16 }
 0x181   : > { %13687 = vrot.lane.b32.xlu0 %v13686_v54, %s14457_s18  ;;  %13657 = vrot.lane.b32.xlu1 %v13631_v49, %s14456_s17 }
 0x185   : > { %13692 = vrot.lane.b32.xlu0 %v13671_v53, %s14456_s17  ;;  %13667 = vrot.lane.b32.xlu1 %v13671_v53, %s14453_s12 }
 0x189   : > { %13702 = vrot.lane.b32.xlu0 %v13686_v54, %s14458_s19  ;;  %13677 = vrot.lane.b32.xlu1 %v13676_v55, %s14457_s18 }
 0x18d   : > { %13712 = vrot.lane.b32.xlu0 %v13676_v55, %s14459_s20  ;;  %13682 = vrot.lane.b32.xlu1 %v13681_v47, %s14457_s18 }
 0x191   : > { %13722 = vrot.lane.b32.xlu0 %v13681_v47, %s14459_s20  ;;  %13697 = vrot.lane.b32.xlu1 %v13676_v55, %s14458_s19 }
 0x195   : > { %13732 = vrot.lane.b32.xlu0 %v13686_v54, %s14451_s29  ;;  %13707 = vrot.lane.b32.xlu1 %v13681_v47, %s14458_s19 }
 0x199   : > { %2204 = vperm.xlu0 %13600, %v486_v56   ;;  %13717 = vrot.lane.b32.xlu1 %v13686_v54, %s14459_s20 }
 0x19d   : > { %13727 = vrot.lane.b32.xlu1 %v13676_v55, %s14451_s29 }
 0x1a1   : > { %13737 = vrot.lane.b32.xlu1 %v13681_v47, %s14451_s29  ;;  %v14679_v47 = vld [vmem:[%s16462_s4 + $0x8] sm:$0xff] }
 0x1a5   : > { %2209 = vperm.xlu1 %13599, %v487_v57  }
 0x1db   : > { %v14621_v59 = vpop.permute.xlu1 %13607  ;;  %v14623_v60 = vpop.permute.xlu0 %13627 }
 0x1dc   : > { %v13610_v5 = vunpack.i.h.bf16 %v14621_v59  ;;  %v13609_v6 = vunpack.i.l.bf16 %v14621_v59  ;;  %v13630_v27 = vunpack.i.h.bf16 %v14623_v60  ;;  %v13629_v28 = vunpack.i.l.bf16 %v14623_v60 }
 0x1de   : > { %v714_v15 = vsel %vm713_vm7, %v13604_v4, %v13609_v6  ;;  %v715_v17 = vsel %vm713_vm7, %v13609_v6, %v13610_v5  ;;  %v905_v49 = vsel %vm903_vm9, %v13629_v28, %v13630_v27  ;;  %v11618_v6 = vld [vmem:[%s16462_s4 + $0x88] sm:$0xff] }
 0x1df   : > { %v14625_v61 = vpop.permute.xlu1 %13612  ;;  %v14627_v62 = vpop.permute.xlu0 %13632 }
 0x1e0   : > { %v13615_v63 = vunpack.i.h.bf16 %v14625_v61  ;;  %v13614_v0 = vunpack.i.l.bf16 %v14625_v61  ;;  %v13635_v2 = vunpack.i.h.bf16 %v14627_v62  ;;  %v13634_v3 = vunpack.i.l.bf16 %v14627_v62 }
 0x1e2   : > { %v527_v7 = vsel %vm525_vm6, %v13614_v0, %v13615_v63  ;;  %v530_v8 = vsel %vm525_vm6, %v13634_v3, %v13635_v2 }
 0x1e3   : > { %v14641_v9 = vpop.permute.xlu1 %13617  ;;  %v13638_v10 = vpop.permute.xlu0 %13637  ;;  %v12727_v11 = vpack.c.bf16 %v530_v8, %v527_v7 }
 0x1e4   : > { %v13620_v13 = vunpack.i.h.bf16 %v14641_v9  ;;  %v13619_v14 = vunpack.i.l.bf16 %v14641_v9  ;;  %v13640_v30 = vunpack.i.h.bf16 %v13638_v10  ;;  %v13639_v31 = vunpack.i.l.bf16 %v13638_v10 }
 0x1e5   : > { %12728 = vmatprep.subr.bf16.mxu0 %v12727_v11 }
 0x1e6   : > { %v717_v16 = vsel %vm713_vm7, %v13605_v12, %v13619_v14  ;;  %v718_v18 = vsel %vm713_vm7, %v13619_v14, %v13620_v13  ;;  %v904_v43 = vsel %vm903_vm9, %v13639_v31, %v13629_v28  ;;  %v14705_v12 = vld [vmem:[%s16462_s4 + $0x100] sm:$0xff] }
 0x1e7   : > { %v13623_v19 = vpop.permute.xlu1 %13622  ;;  %v14653_v20 = vpop.permute.xlu0 %13652  ;;  %v12735_v21 = vpack.c.bf16 %v718_v18, %v715_v17  ;;  %v12737_v22 = vpack.c.bf16 %v717_v16, %v714_v15 }
 0x1e8   : > { %v13625_v23 = vunpack.i.h.bf16 %v13623_v19  ;;  %v13624_v24 = vunpack.i.l.bf16 %v13623_v19  ;;  %v13654_v4 = vunpack.i.l.bf16 %v14653_v20 }
 0x1e9   : > { %12736 = vmatprep.subr.bf16.mxu1 %v12735_v21  ;;  %v14722_v21 = vld [vmem:[%s16462_s4 + $0x108] sm:$0xff] }
 0x1ea   : > { %v526_v32 = vsel %vm525_vm6, %v13624_v24, %v13614_v0  ;;  %v529_v33 = vsel %vm525_vm6, %v13625_v23, %v13634_v3  ;;  %12738 = vmatpush1.bf16.msra.mxu1 %v12737_v22  ;;  %v13655_v3 = vunpack.i.h.bf16 %v14653_v20 }
 0x1eb   : > { %v14664_v35 = vpop.permute.xlu1 %13642  ;;  %v13663_v36 = vpop.permute.xlu0 %13662  ;;  %v12729_v38 = vpack.c.bf16 %v529_v33, %v526_v32 }
 0x1ec   : > { %v13645_v40 = vunpack.i.h.bf16 %v14664_v35  ;;  %v13644_v41 = vunpack.i.l.bf16 %v14664_v35  ;;  %v13665_v7 = vunpack.i.h.bf16 %v13663_v36  ;;  %v13664_v8 = vunpack.i.l.bf16 %v13663_v36 }
 0x1ed   : > { %12730 = vmatpush1.bf16.msra.mxu0 %v12729_v38  ;;  %11623 = vmatmul.mubr.msk.f32.vlgmr.msra.gmra.mrb[2].mxu1 %vm538_vm8, %v14662_v34  ;;  %v1101_v62 = vsel %vm1099_vm10, %v13654_v4, %v13655_v3 }
 0x1ee   : > { %v907_v44 = vsel %vm903_vm9, %v13640_v30, %v13644_v41  ;;  %802 = vmatprep.mubr.f32.mxu1 %v14450_v1  ;;  %v908_v53 = vsel %vm903_vm9, %v13644_v41, %v13645_v40 }
 0x1ef   : > { %v13648_v54 = vpop.permute.xlu1 %13647  ;;  %v13673_v55 = vpop.permute.xlu0 %13672  ;;  %v12743_v56 = vpack.c.bf16 %v908_v53, %v905_v49  ;;  %v12745_v57 = vpack.c.bf16 %v907_v44, %v904_v43 }
 0x1f0   : > { %v13650_v58 = vunpack.i.h.bf16 %v13648_v54  ;;  %v13649_v0 = vunpack.i.l.bf16 %v13648_v54  ;;  %11619 = vmatmul.mubr.msk.f32.vlgmr.msra.gmra.mrb[4].mxu0 %vm538_vm8, %v11617_v42  ;;  %v13675_v61 = vunpack.i.h.bf16 %v13673_v55 }
 0x1f1   : > { %11624 = vmatmul.mubr.msk.f32.gmra.mrb[4].mxu1 %vm538_vm8, %v14679_v47  ;;  %12744 = vmatprep.subr.bf16.mxu1 %v12743_v56 }
 0x1f2   : > { %12746 = vmatpush1.bf16.msra.mxu1 %v12745_v57  ;;  %615 = vmatprep.mubr.f32.mxu0 %v14450_v1  ;;  %v528_v10 = vsel %vm525_vm6, %v13615_v63, %v13649_v0  ;;  %v531_v11 = vsel %vm525_vm6, %v13635_v2, %v13650_v58  ;;  %v13674_v63 = vunpack.i.l.bf16 %v13673_v55  ;;  %v1100_v2 = vsel %vm1099_vm10, %v13664_v8, %v13654_v4 }
 0x1f3   : > { %v13658_v14 = vpop.permute.xlu1 %13657  ;;  %v14707_v15 = vpop.permute.xlu0 %13687  ;;  %986 = vmatprep.mubr.f32.mxu1 %v14450_v1  ;;  %v12731_v16 = vpack.c.bf16 %v531_v11, %v528_v10  ;;  %v909_v41 = vsel %vm903_vm9, %v13645_v40, %v13675_v61  ;;  %v14751_v40 = vld [vmem:[%s16462_s4 + $0x180] sm:$0xff] }
 0x1f4   : > { %v13660_v17 = vunpack.i.h.bf16 %v13658_v14  ;;  %v13659_v18 = vunpack.i.l.bf16 %v13658_v14  ;;  %11620 = vmatmul.mubr.msk.f32.gmra.mrb[6].mxu0 %vm538_vm8, %v11618_v6  ;;  %v13690_v33 = vunpack.i.h.bf16 %v14707_v15  ;;  %v13689_v36 = vunpack.i.l.bf16 %v14707_v15 }
 0x1f5   : > { %12732 = vmatprep.subr.bf16.mxu0 %v12731_v16  ;;  %11629 = vmatmul.mubr.msk.f32.vlgmr.msra.gmra.mrb[2].mxu1 %vm538_vm8, %v14705_v12  ;;  %v906_v38 = vsel %vm903_vm9, %v13630_v27, %v13674_v63 }
 0x1f6   : > { %v1103_v19 = vsel %vm1099_vm10, %v13665_v7, %v13659_v18  ;;  %12734 = vmatpush3.bf16.msra.mxu0 %v12731_v16  ;;  %12299 = vmatprep.mubr.msk.f32.mxu0 %vm538_vm8, %v11617_v42  ;;  %v1104_v22 = vsel %vm1099_vm10, %v13659_v18, %v13660_v17  ;;  %v12747_v9 = vpack.c.bf16 %v909_v41, %v906_v38 }
 0x1f7   : > { %v13668_v23 = vpop.permute.xlu1 %13667  ;;  %v13693_v24 = vpop.permute.xlu0 %13692  ;;  %992 = vmatprep.mubr.f32.mxu1 %v14450_v1  ;;  %v12751_v28 = vpack.c.bf16 %v1104_v22, %v1101_v62  ;;  %v12753_v30 = vpack.c.bf16 %v1103_v19, %v1100_v2  ;;  %v12763_v18 = vpack.c.bf16 %v14588_v52, %v14586_v51  ;;  %v11645_v51 = vld [vmem:[%s16462_s4 + $0x280] sm:$0xff] }
 0x1f8   : > { %v13670_v31 = vunpack.i.h.bf16 %v13668_v23  ;;  %v13669_v32 = vunpack.i.l.bf16 %v13668_v23  ;;  %v13695_v42 = vunpack.i.h.bf16 %v13693_v24  ;;  %v13694_v43 = vunpack.i.l.bf16 %v13693_v24 }
 0x1f9   : > { %12300 = vmatmul.mubr.msk.f32.vlgmr.msra.gmra.mrb[8].mxu0 %vm538_vm8, %v11618_v6  ;;  %11630 = vmatmul.mubr.msk.f32.gmra.mrb[4].mxu1 %vm538_vm8, %v14722_v21 }
 0x1fa   : > { %12752 = vmatprep.subr.bf16.mxu1 %v12751_v28  ;;  %1182 = vmatprep.mubr.f32.mxu1 %v14450_v1  ;;  %v716_v44 = vsel %vm713_vm7, %v13610_v5, %v13669_v32  ;;  %v719_v49 = vsel %vm713_vm7, %v13620_v13, %v13670_v31  ;;  %v1462_v13 = vsel %vm1458_vm11, %v13689_v36, %v13690_v33 }
 0x1fb   : > { %12754 = vmatpush1.bf16.msra.mxu1 %v12753_v30  ;;  %v14744_v60 = vpop.permute.xlu1 %13677  ;;  %v14746_v27 = vpop.permute.xlu0 %13702  ;;  %v12739_v35 = vpack.c.bf16 %v719_v49, %v716_v44  ;;  %12306 = vmatprep.mubr.msk.f32.mxu0 %vm538_vm8, %v14662_v34  ;;  %v1102_v53 = vsel %vm1099_vm10, %v13655_v3, %v13694_v43  ;;  %v1105_v39 = vsel %vm1099_vm10, %v13660_v17, %v13695_v42 }
 0x1fc   : > { %v13680_v59 = vunpack.i.h.bf16 %v14744_v60  ;;  %v13679_v5 = vunpack.i.l.bf16 %v14744_v60  ;;  %12760 = vmatprep.subr.bf16.mxu1 %v12759_v50  ;;  %v14778_v50 = vld [vmem:[%s16462_s4 + $0x188] sm:$0xff]  ;;  %v12755_v37 = vpack.c.bf16 %v1105_v39, %v1102_v53  ;;  %v13705_v45 = vunpack.i.h.bf16 %v14746_v27 }
 0x1fd   : > { %12740 = vmatprep.subr.bf16.mxu0 %v12739_v35  ;;  %v11652_v53 = vld [vmem:[%s16462_s4 + $0x308] sm:$0xff] }
 0x1fe   : > { %11635 = vmatmul.mubr.msk.f32.vlgmr.msra.gmra.mrb[2].mxu1 %vm538_vm8, %v14751_v40  ;;  %12742 = vmatpush3.bf16.msra.mxu0 %v12739_v35  ;;  %v1460_v34 = vsel %vm1458_vm11, %v13679_v5, %v13680_v59  ;;  %v12771_v49 = vpack.c.bf16 %v13690_v33, %v13680_v59 }
 0x1ff   : > { %12762 = vmatpush1.bf16.msra.mxu1 %v12761_v48  ;;  %v13683_v46 = vpop.permute.xlu1 %13682  ;;  %12748 = vmatprep.subr.bf16.mxu0 %v12747_v9  ;;  %v12767_v54 = vpack.c.bf16 %v1462_v13, %v1460_v34  ;;  %v14780_v57 = vpop.permute.xlu0 %13712  ;;  %v13704_v48 = vunpack.i.l.bf16 %v14746_v27  ;;  %v11658_v27 = vld [vmem:[%s16462_s4 + $0x388] sm:$0xff] }
 0x200   : > { %v13685_v55 = vunpack.i.h.bf16 %v13683_v46  ;;  %v13684_v56 = vunpack.i.l.bf16 %v13683_v46  ;;  %1188 = vmatprep.mubr.f32.mxu1 %v14450_v1  ;;  %v13715_v61 = vunpack.i.h.bf16 %v14780_v57  ;;  %v13714_v63 = vunpack.i.l.bf16 %v14780_v57  ;;  %v11664_v57 = vld [vmem:[%s16462_s4 + $0x408] sm:$0xff] }
 0x201   : > { %12307 = vmatmul.mubr.msk.f32.vlgmr.msra.gmra.mrb[8].mxu0 %vm538_vm8, %v14679_v47  ;;  %12768 = vmatprep.subr.bf16.mxu1 %v12767_v54  ;;  %v14797_v47 = vld [vmem:[%s16462_s4 + $0x200] sm:$0xff]  ;;  %v1652_v10 = vsel %vm1648_vm12, %v13704_v48, %v13705_v45 }
 0x202   : > { %v1459_v20 = vsel %vm1458_vm11, %v13684_v56, %v13679_v5  ;;  %v1461_v58 = vsel %vm1458_vm11, %v13685_v55, %v13689_v36  ;;  %11636 = vmatmul.mubr.msk.f32.gmra.mrb[4].mxu1 %vm538_vm8, %v14778_v50  ;;  %12750 = vmatpush3.bf16.msra.mxu0 %v12747_v9  ;;  %v1840_v24 = vsel %vm1838_vm13, %v13714_v63, %v13715_v61  ;;  %v11646_v36 = vld [vmem:[%s16462_s4 + $0x288] sm:$0xff]  ;;  %v11651_v9 = vld [vmem:[%s16462_s4 + $0x300] sm:$0xff] }
 0x203   : > { %v14791_v0 = vpop.permute.xlu1 %13697  ;;  %12756 = vmatprep.subr.bf16.mxu0 %v12755_v37  ;;  %1349 = vmatprep.mubr.f32.mxu1 %v14450_v1  ;;  %v12769_v3 = vpack.c.bf16 %v1461_v58, %v1459_v20  ;;  %v13723_v7 = vpop.permute.xlu0 %13722  ;;  %v11657_v54 = vld [vmem:[%s16462_s4 + $0x380] sm:$0xff] }
 0x204   : > { %v13700_v4 = vunpack.i.h.bf16 %v14791_v0  ;;  %v13699_v6 = vunpack.i.l.bf16 %v14791_v0  ;;  %12313 = vmatprep.mubr.msk.f32.mxu0 %vm538_vm8, %v14705_v12  ;;  %v11640_v12 = vld [vmem:[%s16462_s4 + $0x208] sm:$0xff]  ;;  %v13725_v41 = vunpack.i.h.bf16 %v13723_v7  ;;  %v13724_v42 = vunpack.i.l.bf16 %v13723_v7 }
 0x206   : > { %11641 = vmatmul.mubr.msk.f32.vlgmr.msra.gmra.mrb[2].mxu1 %vm538_vm8, %v14797_v47  ;;  %v1650_v8 = vsel %vm1648_vm12, %v13699_v6, %v13700_v4  ;;  %v1839_v15 = vsel %vm1838_vm13, %v13724_v42, %v13714_v63  ;;  %v12779_v39 = vpack.c.bf16 %v13705_v45, %v13700_v4 }
 0x207   : > { %12770 = vmatpush1.bf16.msra.mxu1 %v12769_v3  ;;  %v13708_v11 = vpop.permute.xlu1 %13707  ;;  %1355 = vmatprep.mubr.f32.mxu1 %v14450_v1  ;;  %v12775_v14 = vpack.c.bf16 %v1652_v10, %v1650_v8 }
 0x208   : > { %v13710_v16 = vunpack.i.h.bf16 %v13708_v11  ;;  %v13709_v17 = vunpack.i.l.bf16 %v13708_v11 }
 0x209   : > { %12314 = vmatmul.mubr.msk.f32.vlgmr.msra.gmra.mrb[8].mxu0 %vm538_vm8, %v14722_v21  ;;  %12776 = vmatprep.subr.bf16.mxu1 %v12775_v14  ;;  %v14828_v21 = vpop.permute.xlu0 %13732 }
 0x20a   : > { %v1649_v62 = vsel %vm1648_vm12, %v13709_v17, %v13699_v6  ;;  %v1651_v2 = vsel %vm1648_vm12, %v13710_v16, %v13704_v48  ;;  %12758 = vmatpush3.bf16.msra.mxu0 %v12755_v37  ;;  %11642 = vmatmul.mubr.msk.f32.gmra.mrb[4].mxu1 %vm538_vm8, %v11640_v12  ;;  %v13735_v30 = vunpack.i.h.bf16 %v14828_v21  ;;  %v13734_v31 = vunpack.i.l.bf16 %v14828_v21  ;;  %v11663_v37 = vld [vmem:[%s16462_s4 + $0x400] sm:$0xff] }
 0x20b   : > { %12764 = vmatprep.subr.bf16.mxu0 %v12763_v18  ;;  %v13718_v19 = vpop.permute.xlu1 %13717  ;;  %1539 = vmatprep.mubr.f32.mxu1 %v14450_v1  ;;  %v12777_v52 = vpack.c.bf16 %v1651_v2, %v1649_v62  ;;  %v2234_v62 = vld [vmem:[#allocation3] sm:$0xff] }
 0x20c   : > { %v13720_v22 = vunpack.i.h.bf16 %v13718_v19  ;;  %v13719_v23 = vunpack.i.l.bf16 %v13718_v19  ;;  %12320 = vmatprep.mubr.msk.f32.mxu0 %vm538_vm8, %v14751_v40  ;;  %v2031_v60 = vsel %vm304_vm2, %v13734_v31, %v13735_v30  ;;  %v2238_v2 = vld [vmem:[#allocation3 + $0x20] sm:$0xff] }
 0x20e   : > { %11647 = vmatmul.mubr.msk.f32.vlgmr.msra.gmra.mrb[2].mxu1 %vm538_vm8, %v11645_v51  ;;  %v1842_v28 = vsel %vm1838_vm13, %v13719_v23, %v13720_v22  ;;  %v1841_v35 = vsel %vm1838_vm13, %v13725_v41, %v13719_v23  ;;  %v12787_v56 = vpack.c.bf16 %v13720_v22, %v13715_v61  ;;  %v13751_v22 = vpack.i.bf16 %v2238_v2, %v2234_v62 }
 0x20f   : > { %12778 = vmatpush1.bf16.msra.mxu1 %v12777_v52  ;;  %v13728_v32 = vpop.permute.xlu1 %13727  ;;  %1545 = vmatprep.mubr.f32.mxu1 %v14450_v1  ;;  %v12783_v38 = vpack.c.bf16 %v1842_v28, %v1840_v24  ;;  %v12785_v59 = vpack.c.bf16 %v1841_v35, %v1839_v15 }
 0x210   : > { %v13730_v43 = vunpack.i.h.bf16 %v13728_v32  ;;  %v13729_v44 = vunpack.i.l.bf16 %v13728_v32 }
 0x211   : > { %12321 = vmatmul.mubr.msk.f32.vlgmr.msra.gmra.mrb[8].mxu0 %vm538_vm8, %v14778_v50  ;;  %12784 = vmatprep.subr.bf16.mxu1 %v12783_v38 }
 0x212   : > { %12766 = vmatpush3.bf16.msra.mxu0 %v12763_v18  ;;  %11648 = vmatmul.mubr.msk.f32.gmra.mrb[4].mxu1 %vm538_vm8, %v11646_v36  ;;  %v2029_v40 = vsel %vm304_vm2, %v13729_v44, %v13730_v43  ;;  %v12795_v45 = vpack.c.bf16 %v13735_v30, %v13730_v43 }
 0x213   : > { %12772 = vmatprep.subr.bf16.mxu0 %v12771_v49  ;;  %v13738_v5 = vpop.permute.xlu1 %13737  ;;  %1729 = vmatprep.mubr.f32.mxu1 %v14450_v1  ;;  %v12791_v33 = vpack.c.bf16 %v2031_v60, %v2029_v40 }
 0x214   : > { %12327 = vmatprep.mubr.msk.f32.mxu0 %vm538_vm8, %v14797_v47  ;;  %v13740_v13 = vunpack.i.h.bf16 %v13738_v5  ;;  %v13739_v34 = vunpack.i.l.bf16 %v13738_v5  ;;  %v2230_v5 = vld [vmem:[%s16463_s5 + $0x10] sm:$0xff] }
 0x216   : > { %11653 = vmatmul.mubr.msk.f32.vlgmr.msra.gmra.mrb[2].mxu1 %vm538_vm8, %v11651_v9  ;;  %v2028_v46 = vsel %vm304_vm2, %v13739_v34, %v13729_v44  ;;  %v2030_v50 = vsel %vm304_vm2, %v13740_v13, %v13734_v31 }
 0x217   : > { %12786 = vmatpush1.bf16.msra.mxu1 %v12785_v59  ;;  %1735 = vmatprep.mubr.f32.mxu1 %v14450_v1  ;;  %v12793_v55 = vpack.c.bf16 %v2030_v50, %v2028_v46 }
 0x218   : > { %12792 = vmatprep.subr.bf16.mxu1 %v12791_v33  ;;  %v2205_v6 = vpop.permute.xlu0 %2204 }
 0x219   : > { %12328 = vmatmul.mubr.msk.f32.vlgmr.msra.gmra.mrb[8].mxu0 %vm538_vm8, %v11640_v12 }
 0x21a   : > { %12774 = vmatpush3.bf16.msra.mxu0 %v12771_v49  ;;  %11654 = vmatmul.mubr.msk.f32.gmra.mrb[4].mxu1 %vm538_vm8, %v11652_v53 }
 0x21b   : > { %12780 = vmatprep.subr.bf16.mxu0 %v12779_v39  ;;  %1919 = vmatprep.mubr.f32.mxu1 %v14450_v1 }
 0x21c   : > { %12334 = vmatprep.mubr.msk.f32.mxu0 %vm538_vm8, %v11645_v51 }
 0x21e   : > { %11659 = vmatmul.mubr.msk.f32.vlgmr.msra.gmra.mrb[2].mxu1 %vm538_vm8, %v11657_v54 }
 0x21f   : > { %12794 = vmatpush1.bf16.msra.mxu1 %v12793_v55  ;;  %1925 = vmatprep.mubr.f32.mxu1 %v14450_v1 }
 0x221   : > { %12335 = vmatmul.mubr.msk.f32.vlgmr.msra.gmra.mrb[8].mxu0 %vm538_vm8, %v11646_v36 }
 0x222   : > { %12782 = vmatpush3.bf16.msra.mxu0 %v12779_v39  ;;  %11660 = vmatmul.mubr.msk.f32.gmra.mrb[4].mxu1 %vm538_vm8, %v11658_v27 }
 0x223   : > { %12788 = vmatprep.subr.bf16.mxu0 %v12787_v56  ;;  %2108 = vmatprep.mubr.f32.mxu1 %v14450_v1 }
 0x224   : > { %12341 = vmatprep.mubr.msk.f32.mxu0 %vm538_vm8, %v11651_v9  ;;  %v2210_v17 = vpop.permute.xlu1 %2209  ;;  %v2231_v9 = vld [vmem:[%s16463_s5 + $0x18] sm:$0xff] }
 0x226   : > { %11665 = vmatmul.mubr.msk.f32.vlgmr.msra.gmra.mrb[2].mxu1 %vm538_vm8, %v11663_v37 }
 0x227   : > { %2114 = vmatprep.mubr.f32.mxu1 %v14450_v1 }
 0x229   : > { %12342 = vmatmul.mubr.msk.f32.vlgmr.msra.gmra.mrb[8].mxu0 %vm538_vm8, %v11652_v53 }
 0x22a   : > { %12790 = vmatpush3.bf16.msra.mxu0 %v12787_v56  ;;  %11666 = vmatmul.mubr.msk.f32.gmra.mrb[4].mxu1 %vm538_vm8, %v11664_v57 }
 0x22b   : > { %12796 = vmatprep.subr.bf16.mxu0 %v12795_v45  ;;  %12348 = vmatprep.mubr.msk.f32.mxu0 %vm538_vm8, %v11657_v54 }
 0x22c   : > { %6148 = vmatprep.mubr.f32.mxu1 %v14450_v1 }
 0x231   : > { %12349 = vmatmul.mubr.msk.f32.vlgmr.msra.gmra.mrb[8].mxu0 %vm538_vm8, %v11658_v27 }
 0x232   : > { %12798 = vmatpush3.bf16.msra.mxu0 %v12795_v45  ;;  %12355 = vmatprep.mubr.msk.f32.mxu0 %vm538_vm8, %v11663_v37  ;;  %v11670_v45 = vld [vmem:[%s16462_s4 + $0x98] sm:$0xff] }
 0x239   : > { %12356 = vmatmul.mubr.msk.f32.vlgmr.msra.gmra.mrb[8].mxu0 %vm538_vm8, %v11664_v57  ;;  %v11669_v57 = vld [vmem:[%s16462_s4 + $0x90] sm:$0xff] }
 0x23a   : > { %2362 = vmatprep.mubr.f32.mxu0 %v14450_v1 }
 0x2c3   : > { %v611_v48 = vpop.f32.mrb[4].mxu0 }
 0x2c4   : > { %v613_v20 = vpop.f32.mrb[5].mxu0 }
 0x2c7   : > { %v617_v58 = vpop.f32.mrb[6].mxu0 }
 0x2c8   : > { %v619_v0 = vpop.f32.mrb[7].mxu0 }
 0x2f9   : > { %v2110_v47 = vpop.f32.mrb[2].mxu1 }
 0x2fa   : > { %v13159_v3 = vadd.f32 %v2110_v47, %v611_v48  ;;  %v2112_v4 = vpop.f32.mrb[3].mxu1 }
 0x2fb   : > { %v13160_v7 = vadd.f32 %v2112_v4, %v613_v20  ;;  %v11671_v20 = vld [vmem:[%s16462_s4 + $0xa0] sm:$0xff] }
 0x2fc   : > { %v2212_v8 = vadd.f32 %v13159_v3, %v2205_v6 }
 0x2fd   : > { %v2213_v10 = vadd.f32 %v13160_v7, %v2205_v6  ;;  %v2116_v11 = vpop.f32.mrb[4].mxu1 }
 0x2fe   : > { %v14906_v12 = vmul.f32 %v2212_v8, %v14548_v26  ;;  %v13161_v14 = vadd.f32 %v2116_v11, %v617_v58  ;;  %v2118_v16 = vpop.f32.mrb[5].mxu1  ;;  %v11672_v58 = vld [vmem:[%s16462_s4 + $0xa8] sm:$0xff] }
 0x2ff   : > { %v14909_v18 = vmul.f32 %v2213_v10, %v14550_v29  ;;  %v13162_v61 = vadd.f32 %v2118_v16, %v619_v0 }
 0x300   : > { %v2215_v63 = vadd.f32 %v13161_v14, %v2210_v17 }
 0x301   : > { %v2216_v19 = vadd.f32 %v13162_v61, %v2210_v17  ;;  %v13741_v51 = vpack.i.bf16 %v14909_v18, %v14906_v12 }
 0x302   : > { %v14914_v52 = vmul.f32 %v2215_v63, %v14548_v26 }
 0x303   : > { %v14917_v21 = vmul.f32 %v2216_v19, %v14550_v29  ;;  %13742 = vrot.lane.b32.xlu0 %v13741_v51, %s14455_s16 }
 0x304   : > { %v13831_v23 = vpack.i.bf16 %v14914_v52, %v14906_v12  ;;  %v12833_v24 = vpack.c.bf16 %v14914_v52, %v14906_v12 }
 0x305   : > { %v13746_v28 = vpack.i.bf16 %v14917_v21, %v14914_v52  ;;  %v12831_v30 = vpack.c.bf16 %v14917_v21, %v14909_v18  ;;  %v11714_v52 = vld [vmem:[%s16462_s4 + $0x218] sm:$0xff] }
 0x307   : > { %13752 = vrot.lane.b32.xlu0 %v13751_v22, %s14455_s16  ;;  %13747 = vrot.lane.b32.xlu1 %v13746_v28, %s14455_s16 }
 0x30b   : > { %13762 = vrot.lane.b32.xlu0 %v13741_v51, %s14453_s12 }
 0x30c   : > { %v12357_v31 = vpop.f32.mrb[8].mxu0 }
 0x30d   : > { %v2217_v32 = vadd.f32 %v12357_v31, %v2210_v17  ;;  %v2187_v36 = vpop.f32.mrb[9].mxu0 }
 0x30e   : > { %v2214_v38 = vadd.f32 %v2205_v6, %v2187_v36 }
 0x30f   : > { %v2223_v41 = vmul.f32 %v2217_v32, %v14546_v25  ;;  %13772 = vrot.lane.b32.xlu0 %v13751_v22, %s14453_s12 }
 0x310   : > { %v2220_v42 = vmul.f32 %v2214_v38, %v14546_v25 }
 0x311   : > { %2229 = vst.msk [vmem:[#allocation3 + $0x38] sm:$0xff] %vm481_vm5, %v2223_v41 }
 0x312   : > { %2226 = vst.msk [vmem:[#allocation3 + $0x18] sm:$0xff] %vm481_vm5, %v2220_v42 }
 0x313   : > { %13782 = vrot.lane.b32.xlu0 %v13741_v51, %s14454_s15 }
 0x317   : > { %13792 = vrot.lane.b32.xlu0 %v13751_v22, %s14454_s15 }
 0x318   : > { %v14938_v43 = vld [vmem:[#allocation3 + $0x38] sm:$0xff] }
 0x319   : > { %v14940_v44 = vld [vmem:[#allocation3 + $0x18] sm:$0xff]  ;;  %v13836_v40 = vpack.i.bf16 %v14938_v43, %v14917_v21 }
 0x31a   : > { %v13756_v49 = vpack.i.bf16 %v14938_v43, %v14940_v44  ;;  %v13826_v35 = vpack.i.bf16 %v14940_v44, %v14909_v18 }
 0x31b   : > { %13802 = vrot.lane.b32.xlu0 %v13741_v51, %s14456_s17 }
 0x31c   : > { %13757 = vrot.lane.b32.xlu1 %v13756_v49, %s14455_s16 }
 0x31f   : > { %13812 = vrot.lane.b32.xlu0 %v13751_v22, %s14456_s17 }
 0x320   : > { %13767 = vrot.lane.b32.xlu1 %v13746_v28, %s14453_s12 }
 0x323   : > { %13827 = vrot.lane.b32.xlu0 %v13826_v35, %s14457_s18 }
 0x324   : > { %13777 = vrot.lane.b32.xlu1 %v13756_v49, %s14453_s12 }
 0x327   : > { %13832 = vrot.lane.b32.xlu0 %v13831_v23, %s14457_s18 }
 0x328   : > { %13787 = vrot.lane.b32.xlu1 %v13746_v28, %s14454_s15 }
 0x32b   : > { %13837 = vrot.lane.b32.xlu0 %v13836_v40, %s14458_s19 }
 0x32c   : > { %13797 = vrot.lane.b32.xlu1 %v13756_v49, %s14454_s15 }
 0x32f   : > { %13857 = vrot.lane.b32.xlu0 %v13826_v35, %s14459_s20 }
 0x330   : > { %13807 = vrot.lane.b32.xlu1 %v13746_v28, %s14456_s17 }
 0x333   : > { %13862 = vrot.lane.b32.xlu0 %v13831_v23, %s14459_s20 }
 0x334   : > { %13817 = vrot.lane.b32.xlu1 %v13756_v49, %s14456_s17 }
 0x337   : > { %13867 = vrot.lane.b32.xlu0 %v13836_v40, %s14451_s29 }
 0x338   : > { %13822 = vrot.lane.b32.xlu1 %v13836_v40, %s14457_s18 }
 0x33b   : > { %4246 = vperm.xlu0 %13600, %v2230_v5  }
 0x33c   : > { %13842 = vrot.lane.b32.xlu1 %v13826_v35, %s14458_s19 }
 0x340   : > { %13847 = vrot.lane.b32.xlu1 %v13831_v23, %s14458_s19 }
 0x344   : > { %13852 = vrot.lane.b32.xlu1 %v13836_v40, %s14459_s20 }
 0x348   : > { %13872 = vrot.lane.b32.xlu1 %v13826_v35, %s14451_s29 }
 0x34c   : > { %13877 = vrot.lane.b32.xlu1 %v13831_v23, %s14451_s29 }
 0x350   : > { %4251 = vperm.xlu1 %13599, %v2231_v9  }
 0x375   : > { %v13743_v60 = vpop.permute.xlu0 %13742 }
 0x376   : > { %v13745_v15 = vunpack.i.h.bf16 %v13743_v60  ;;  %v13744_v33 = vunpack.i.l.bf16 %v13743_v60  ;;  %v2242_v60 = vld [vmem:[%s16462_s4 + $0x10] sm:$0xff] }
 0x378   : > { %v2275_v55 = vsel %vm525_vm6, %v13744_v33, %v13745_v15 }
 0x379   : > { %v13753_v59 = vpop.permute.xlu0 %13752  ;;  %v13748_v13 = vpop.permute.xlu1 %13747 }
 0x37a   : > { %v13755_v34 = vunpack.i.h.bf16 %v13753_v59  ;;  %v13754_v53 = vunpack.i.l.bf16 %v13753_v59  ;;  %v13750_v39 = vunpack.i.h.bf16 %v13748_v13  ;;  %v13749_v46 = vunpack.i.l.bf16 %v13748_v13  ;;  %v2243_v13 = vld [vmem:[%s16462_s4 + $0x18] sm:$0xff] }
 0x37c   : > { %v2274_v50 = vsel %vm525_vm6, %v13754_v53, %v13744_v33  ;;  %v2277_v54 = vsel %vm525_vm6, %v13755_v34, %v13749_v46  ;;  %v2278_v27 = vsel %vm525_vm6, %v13749_v46, %v13750_v39  ;;  %v2244_v34 = vld [vmem:[%s16462_s4 + $0x20] sm:$0xff] }
 0x37d   : > { %v12799_v56 = vpack.c.bf16 %v2278_v27, %v2275_v55  ;;  %v12801_v37 = vpack.c.bf16 %v2277_v54, %v2274_v50  ;;  %v13763_v48 = vpop.permute.xlu0 %13762  ;;  %v2245_v55 = vld [vmem:[%s16462_s4 + $0x28] sm:$0xff] }
 0x37e   : > { %v13765_v6 = vunpack.i.h.bf16 %v13763_v48  ;;  %v13764_v7 = vunpack.i.l.bf16 %v13763_v48 }
 0x37f   : > { %12800 = vmatprep.subr.bf16.mxu0 %v12799_v56 }
 0x380   : > { %12802 = vmatpush1.bf16.msra.mxu0 %v12801_v37  ;;  %v2489_v19 = vsel %vm713_vm7, %v13764_v7, %v13765_v6 }
 0x381   : > { %v13773_v0 = vpop.permute.xlu0 %13772 }
 0x382   : > { %v13775_v8 = vunpack.i.h.bf16 %v13773_v0  ;;  %v13774_v10 = vunpack.i.l.bf16 %v13773_v0 }
 0x383   : > { %11673 = vmatmul.mubr.msk.f32.vlgmr.msra.gmra.mrb[10].mxu0 %vm538_vm8, %v11669_v57 }
 0x384   : > { %2368 = vmatprep.mubr.f32.mxu0 %v14450_v1  ;;  %v2488_v62 = vsel %vm713_vm7, %v13774_v10, %v13764_v7  ;;  %v11689_v7 = vld [vmem:[%s16462_s4 + $0x110] sm:$0xff] }
 0x385   : > { %v13783_v22 = vpop.permute.xlu0 %13782 }
 0x386   : > { %v13785_v38 = vunpack.i.h.bf16 %v13783_v22  ;;  %v13784_v41 = vunpack.i.l.bf16 %v13783_v22 }
 0x387   : > { %11674 = vmatmul.mubr.msk.f32.gmra.mrb[12].mxu0 %vm538_vm8, %v11670_v45 }
 0x388   : > { %2374 = vmatprep.mubr.f32.mxu0 %v14450_v1 }
 0x38b   : > { %11675 = vmatmul.mubr.msk.f32.gmra.mrb[14].mxu0 %vm538_vm8, %v11671_v20 }
 0x38c   : > { %2380 = vmatprep.mubr.f32.mxu0 %v14450_v1 }
 0x38e   : > { %v13758_v47 = vpop.permute.xlu1 %13757 }
 0x38f   : > { %v13760_v3 = vunpack.i.h.bf16 %v13758_v47  ;;  %v13759_v4 = vunpack.i.l.bf16 %v13758_v47  ;;  %11676 = vmatmul.mubr.msk.f32.gmra.mrb[16].mxu0 %vm538_vm8, %v11672_v58 }
 0x390   : > { %12362 = vmatprep.mubr.msk.f32.mxu0 %vm538_vm8, %v11669_v57 }
 0x391   : > { %v2276_v11 = vsel %vm525_vm6, %v13745_v15, %v13759_v4  ;;  %v2279_v14 = vsel %vm525_vm6, %v13750_v39, %v13760_v3  ;;  %v2707_v15 = vsel %vm903_vm9, %v13784_v41, %v13785_v38  ;;  %v13793_v39 = vpop.permute.xlu0 %13792 }
 0x392   : > { %v13768_v16 = vpop.permute.xlu1 %13767  ;;  %v12803_v17 = vpack.c.bf16 %v2279_v14, %v2276_v11  ;;  %v13795_v46 = vunpack.i.h.bf16 %v13793_v39  ;;  %v13794_v27 = vunpack.i.l.bf16 %v13793_v39  ;;  %v11690_v14 = vld [vmem:[%s16462_s4 + $0x118] sm:$0xff] }
 0x393   : > { %v13770_v61 = vunpack.i.h.bf16 %v13768_v16  ;;  %v13769_v63 = vunpack.i.l.bf16 %v13768_v16  ;;  %v11691_v16 = vld [vmem:[%s16462_s4 + $0x120] sm:$0xff] }
 0x394   : > { %12804 = vmatprep.subr.bf16.mxu0 %v12803_v17 }
 0x395   : > { %v2491_v2 = vsel %vm713_vm7, %v13775_v8, %v13769_v63  ;;  %12806 = vmatpush3.bf16.msra.mxu0 %v12803_v17  ;;  %v2492_v51 = vsel %vm713_vm7, %v13769_v63, %v13770_v61 }
 0x396   : > { %v13778_v23 = vpop.permute.xlu1 %13777  ;;  %v12807_v28 = vpack.c.bf16 %v2492_v51, %v2489_v19  ;;  %v12809_v31 = vpack.c.bf16 %v2491_v2, %v2488_v62  ;;  %v11692_v19 = vld [vmem:[%s16462_s4 + $0x128] sm:$0xff] }
 0x397   : > { %v13780_v32 = vunpack.i.h.bf16 %v13778_v23  ;;  %v13779_v36 = vunpack.i.l.bf16 %v13778_v23 }
 0x398   : > { %12808 = vmatprep.subr.bf16.mxu0 %v12807_v28  ;;  %12363 = vmatmul.mubr.msk.f32.vlgmr.msra.gmra.mrb[18].mxu0 %vm538_vm8, %v11670_v45  ;;  %v2706_v45 = vsel %vm903_vm9, %v13794_v27, %v13784_v41  ;;  %v11702_v41 = vld [vmem:[%s16462_s4 + $0x198] sm:$0xff] }
 0x399   : > { %12810 = vmatpush1.bf16.msra.mxu0 %v12809_v31  ;;  %v2490_v42 = vsel %vm713_vm7, %v13765_v6, %v13779_v36  ;;  %v2493_v49 = vsel %vm713_vm7, %v13770_v61, %v13780_v32  ;;  %12365 = vmatprep.mubr.msk.f32.mxu0 %vm538_vm8, %v11671_v20 }
 0x39a   : > { %v13788_v35 = vpop.permute.xlu1 %13787  ;;  %v12811_v40 = vpack.c.bf16 %v2493_v49, %v2490_v42  ;;  %v11703_v42 = vld [vmem:[%s16462_s4 + $0x1a0] sm:$0xff]  ;;  %v11704_v49 = vld [vmem:[%s16462_s4 + $0x1a8] sm:$0xff] }
 0x39b   : > { %v13790_v5 = vunpack.i.h.bf16 %v13788_v35  ;;  %v13789_v9 = vunpack.i.l.bf16 %v13788_v35 }
 0x39c   : > { %12812 = vmatprep.subr.bf16.mxu0 %v12811_v40  ;;  %12366 = vmatmul.mubr.msk.f32.gmra.mrb[20].mxu0 %vm538_vm8, %v11672_v58  ;;  %v13803_v58 = vpop.permute.xlu0 %13802 }
 0x39d   : > { %2576 = vmatprep.mubr.f32.mxu0 %v14450_v1  ;;  %v2710_v33 = vsel %vm903_vm9, %v13789_v9, %v13790_v5  ;;  %v2709_v56 = vsel %vm903_vm9, %v13795_v46, %v13789_v9  ;;  %v13805_v4 = vunpack.i.h.bf16 %v13803_v58  ;;  %v13804_v6 = vunpack.i.l.bf16 %v13803_v58  ;;  %v11726_v58 = vld [vmem:[%s16462_s4 + $0x298] sm:$0xff] }
 0x39e   : > { %v12815_v59 = vpack.c.bf16 %v2710_v33, %v2707_v15  ;;  %v13798_v53 = vpop.permute.xlu1 %13797  ;;  %v12817_v20 = vpack.c.bf16 %v2709_v56, %v2706_v45  ;;  %v11716_v33 = vld [vmem:[%s16462_s4 + $0x228] sm:$0xff] }
 0x39f   : > { %v13800_v50 = vunpack.i.h.bf16 %v13798_v53  ;;  %v13799_v54 = vunpack.i.l.bf16 %v13798_v53  ;;  %v2937_v10 = vsel %vm1099_vm10, %v13804_v6, %v13805_v4 }
 0x3a0   : > { %11681 = vmatmul.mubr.msk.f32.vlgmr.msra.gmra.mrb[10].mxu0 %vm538_vm8, %v2242_v60  ;;  %v13813_v61 = vpop.permute.xlu0 %13812 }
 0x3a1   : > { %12814 = vmatpush3.bf16.msra.mxu0 %v12811_v40  ;;  %2582 = vmatprep.mubr.f32.mxu0 %v14450_v1  ;;  %v2708_v37 = vsel %vm903_vm9, %v13785_v38, %v13799_v54  ;;  %v2711_v57 = vsel %vm903_vm9, %v13790_v5, %v13800_v50  ;;  %v13815_v63 = vunpack.i.h.bf16 %v13813_v61  ;;  %v13814_v51 = vunpack.i.l.bf16 %v13813_v61  ;;  %v11701_v38 = vld [vmem:[%s16462_s4 + $0x190] sm:$0xff] }
 0x3a2   : > { %12816 = vmatprep.subr.bf16.mxu0 %v12815_v59  ;;  %v13808_v48 = vpop.permute.xlu1 %13807  ;;  %v12819_v0 = vpack.c.bf16 %v2711_v57, %v2708_v37  ;;  %v11725_v57 = vld [vmem:[%s16462_s4 + $0x290] sm:$0xff] }
 0x3a3   : > { %v13810_v47 = vunpack.i.h.bf16 %v13808_v48  ;;  %v13809_v3 = vunpack.i.l.bf16 %v13808_v48  ;;  %v2936_v31 = vsel %vm1099_vm10, %v13814_v51, %v13804_v6  ;;  %v11728_v6 = vld [vmem:[%s16462_s4 + $0x2a8] sm:$0xff] }
 0x3a4   : > { %11682 = vmatmul.mubr.msk.f32.gmra.mrb[12].mxu0 %vm538_vm8, %v2243_v13  ;;  %v13828_v21 = vpop.permute.xlu0 %13827 }
 0x3a5   : > { %2588 = vmatprep.mubr.f32.mxu0 %v14450_v1  ;;  %v2940_v8 = vsel %vm1099_vm10, %v13809_v3, %v13810_v47  ;;  %v2939_v22 = vsel %vm1099_vm10, %v13815_v63, %v13809_v3  ;;  %v13830_v5 = vunpack.i.h.bf16 %v13828_v21  ;;  %v13829_v9 = vunpack.i.l.bf16 %v13828_v21 }
 0x3a6   : > { %v12823_v11 = vpack.c.bf16 %v2940_v8, %v2937_v10  ;;  %v13818_v17 = vpop.permute.xlu1 %13817  ;;  %v12825_v32 = vpack.c.bf16 %v2939_v22, %v2936_v31 }
 0x3a7   : > { %v13820_v62 = vunpack.i.h.bf16 %v13818_v17  ;;  %v13819_v2 = vunpack.i.l.bf16 %v13818_v17 }
 0x3a8   : > { %11683 = vmatmul.mubr.msk.f32.gmra.mrb[14].mxu0 %vm538_vm8, %v2244_v34  ;;  %v13833_v15 = vpop.permute.xlu0 %13832 }
 0x3a9   : > { %2594 = vmatprep.mubr.f32.mxu0 %v14450_v1  ;;  %v2938_v23 = vsel %vm1099_vm10, %v13805_v4, %v13819_v2  ;;  %v2941_v28 = vsel %vm1099_vm10, %v13810_v47, %v13820_v62  ;;  %v13835_v59 = vunpack.i.h.bf16 %v13833_v15  ;;  %v11727_v47 = vld [vmem:[%s16462_s4 + $0x2a0] sm:$0xff]  ;;  %v11737_v2 = vld [vmem:[%s16462_s4 + $0x310] sm:$0xff] }
 0x3aa   : > { %v12827_v36 = vpack.c.bf16 %v2941_v28, %v2938_v23  ;;  %v13823_v18 = vpop.permute.xlu1 %13822  ;;  %v11738_v23 = vld [vmem:[%s16462_s4 + $0x318] sm:$0xff]  ;;  %v11739_v28 = vld [vmem:[%s16462_s4 + $0x320] sm:$0xff] }
 0x3ab   : > { %v13825_v35 = vunpack.i.h.bf16 %v13823_v18  ;;  %v13824_v40 = vunpack.i.l.bf16 %v13823_v18 }
 0x3ac   : > { %11684 = vmatmul.mubr.msk.f32.gmra.mrb[16].mxu0 %vm538_vm8, %v2245_v55  ;;  %v13838_v50 = vpop.permute.xlu0 %13837 }
 0x3ad   : > { %12372 = vmatprep.mubr.msk.f32.mxu0 %vm538_vm8, %v2242_v60  ;;  %v11713_v60 = vld [vmem:[%s16462_s4 + $0x210] sm:$0xff]  ;;  %v12843_v54 = vpack.c.bf16 %v13825_v35, %v13830_v5  ;;  %v13840_v56 = vunpack.i.h.bf16 %v13838_v50  ;;  %v13839_v37 = vunpack.i.l.bf16 %v13838_v50 }
 0x3ae   : > { %v13843_v39 = vpop.permute.xlu1 %13842  ;;  %v11761_v50 = vld [vmem:[%s16462_s4 + $0x410] sm:$0xff] }
 0x3af   : > { %v13844_v27 = vunpack.i.l.bf16 %v13843_v39  ;;  %v3591_v48 = vsel %vm1648_vm12, %v13839_v37, %v13840_v56 }
 0x3b0   : > { %12373 = vmatmul.mubr.msk.f32.vlgmr.msra.gmra.mrb[18].mxu0 %vm538_vm8, %v2243_v13  ;;  %v13834_v13 = vunpack.i.l.bf16 %v13833_v15  ;;  %v11751_v15 = vld [vmem:[%s16462_s4 + $0x3a0] sm:$0xff] }
 0x3b1   : > { %12818 = vmatpush1.bf16.msra.mxu0 %v12817_v20  ;;  %12375 = vmatprep.mubr.msk.f32.mxu0 %vm538_vm8, %v2244_v34  ;;  %v3366_v34 = vsel %vm1458_vm11, %v13835_v59, %v13824_v40 }
 0x3b2   : > { %12820 = vmatprep.subr.bf16.mxu0 %v12819_v0  ;;  %v3364_v53 = vsel %vm1458_vm11, %v13834_v13, %v13829_v9  ;;  %v11752_v13 = vld [vmem:[%s16462_s4 + $0x3a8] sm:$0xff] }
 0x3b3   : > { %v12841_v46 = vpack.c.bf16 %v3366_v34, %v3364_v53 }
 0x3b4   : > { %12376 = vmatmul.mubr.msk.f32.gmra.mrb[20].mxu0 %vm538_vm8, %v2245_v55  ;;  %v13845_v55 = vunpack.i.h.bf16 %v13843_v39 }
 0x3b5   : > { %2794 = vmatprep.mubr.f32.mxu0 %v14450_v1 }
 0x3b6   : > { %v3589_v45 = vsel %vm1648_vm12, %v13844_v27, %v13845_v55 }
 0x3b7   : > { %v12847_v20 = vpack.c.bf16 %v3591_v48, %v3589_v45 }
 0x3b8   : > { %11693 = vmatmul.mubr.msk.f32.vlgmr.msra.gmra.mrb[10].mxu0 %vm538_vm8, %v11689_v7 }
 0x3b9   : > { %12822 = vmatpush3.bf16.msra.mxu0 %v12819_v0  ;;  %2800 = vmatprep.mubr.f32.mxu0 %v14450_v1  ;;  %v13848_v0 = vpop.permute.xlu1 %13847 }
 0x3ba   : > { %12824 = vmatprep.subr.bf16.mxu0 %v12823_v11  ;;  %v13850_v3 = vunpack.i.h.bf16 %v13848_v0  ;;  %v13849_v4 = vunpack.i.l.bf16 %v13848_v0 }
 0x3bc   : > { %11694 = vmatmul.mubr.msk.f32.gmra.mrb[12].mxu0 %vm538_vm8, %v11690_v14  ;;  %v3588_v8 = vsel %vm1648_vm12, %v13849_v4, %v13844_v27  ;;  %v11764_v27 = vld [vmem:[%s16462_s4 + $0x428] sm:$0xff] }
 0x3bd   : > { %2806 = vmatprep.mubr.f32.mxu0 %v14450_v1  ;;  %v13853_v10 = vpop.permute.xlu1 %13852 }
 0x3be   : > { %v13855_v17 = vunpack.i.h.bf16 %v13853_v10  ;;  %v13854_v61 = vunpack.i.l.bf16 %v13853_v10 }
 0x3c0   : > { %11695 = vmatmul.mubr.msk.f32.gmra.mrb[14].mxu0 %vm538_vm8, %v11691_v16 }
 0x3c1   : > { %2812 = vmatprep.mubr.f32.mxu0 %v14450_v1 }
 0x3c4   : > { %11696 = vmatmul.mubr.msk.f32.gmra.mrb[16].mxu0 %vm538_vm8, %v11692_v19 }
 0x3c5   : > { %12382 = vmatprep.mubr.msk.f32.mxu0 %vm538_vm8, %v11689_v7  ;;  %v3590_v7 = vsel %vm1648_vm12, %v13850_v3, %v13839_v37 }
 0x3c6   : > { %v12849_v11 = vpack.c.bf16 %v3590_v7, %v3588_v8 }
 0x3c8   : > { %12383 = vmatmul.mubr.msk.f32.vlgmr.msra.gmra.mrb[18].mxu0 %vm538_vm8, %v11690_v14  ;;  %v13858_v14 = vpop.permute.xlu0 %13857 }
 0x3c9   : > { %12826 = vmatpush1.bf16.msra.mxu0 %v12825_v32  ;;  %12385 = vmatprep.mubr.msk.f32.mxu0 %vm538_vm8, %v11691_v16  ;;  %v12851_v16 = vpack.c.bf16 %v13840_v56, %v13845_v55  ;;  %v13860_v63 = vunpack.i.h.bf16 %v13858_v14  ;;  %v13859_v62 = vunpack.i.l.bf16 %v13858_v14  ;;  %v11740_v32 = vld [vmem:[%s16462_s4 + $0x328] sm:$0xff]  ;;  %v11763_v55 = vld [vmem:[%s16462_s4 + $0x420] sm:$0xff] }
 0x3ca   : > { %12828 = vmatprep.subr.bf16.mxu0 %v12827_v36  ;;  %v4300_v14 = vld [vmem:[#allocation2 + $0x20] sm:$0xff] }
 0x3cb   : > { %v3813_v51 = vsel %vm1838_vm13, %v13859_v62, %v13860_v63 }
 0x3cc   : > { %12386 = vmatmul.mubr.msk.f32.gmra.mrb[20].mxu0 %vm538_vm8, %v11692_v19  ;;  %v3815_v19 = vsel %vm1838_vm13, %v13854_v61, %v13855_v17  ;;  %v13863_v31 = vpop.permute.xlu0 %13862 }
 0x3cd   : > { %3024 = vmatprep.mubr.f32.mxu0 %v14450_v1  ;;  %v12855_v22 = vpack.c.bf16 %v3815_v19, %v3813_v51 }
 0x3d0   : > { %11705 = vmatmul.mubr.msk.f32.vlgmr.msra.gmra.mrb[10].mxu0 %vm538_vm8, %v11701_v38  ;;  %v13868_v21 = vpop.permute.xlu0 %13867 }
 0x3d1   : > { %12830 = vmatpush3.bf16.msra.mxu0 %v12827_v36  ;;  %3030 = vmatprep.mubr.f32.mxu0 %v14450_v1  ;;  %v13865_v36 = vunpack.i.h.bf16 %v13863_v31 }
 0x3d2   : > { %12832 = vmatprep.subr.bf16.mxu0 %v12831_v30  ;;  %v12835_v30 = vpack.c.bf16 %v14938_v43, %v14940_v44  ;;  %v3367_v43 = vsel %vm1458_vm11, %v13824_v40, %v13825_v35  ;;  %v3365_v44 = vsel %vm1458_vm11, %v13829_v9, %v13830_v5  ;;  %v13870_v5 = vunpack.i.h.bf16 %v13868_v21 }
 0x3d3   : > { %v12839_v12 = vpack.c.bf16 %v3367_v43, %v3365_v44  ;;  %v13869_v9 = vunpack.i.l.bf16 %v13868_v21 }
 0x3d4   : > { %11706 = vmatmul.mubr.msk.f32.gmra.mrb[12].mxu0 %vm538_vm8, %v11702_v41  ;;  %v4247_v56 = vpop.permute.xlu0 %4246 }
 0x3d5   : > { %3036 = vmatprep.mubr.f32.mxu0 %v14450_v1  ;;  %v4039_v44 = vsel %vm304_vm2, %v13869_v9, %v13870_v5 }
 0x3d8   : > { %11707 = vmatmul.mubr.msk.f32.gmra.mrb[14].mxu0 %vm538_vm8, %v11703_v42 }
 0x3d9   : > { %3042 = vmatprep.mubr.f32.mxu0 %v14450_v1 }
 0x3dc   : > { %11708 = vmatmul.mubr.msk.f32.gmra.mrb[16].mxu0 %vm538_vm8, %v11704_v49 }
 0x3dd   : > { %12392 = vmatprep.mubr.msk.f32.mxu0 %vm538_vm8, %v11701_v38  ;;  %v13864_v38 = vunpack.i.l.bf16 %v13863_v31 }
 0x3e0   : > { %12393 = vmatmul.mubr.msk.f32.vlgmr.msra.gmra.mrb[18].mxu0 %vm538_vm8, %v11702_v41  ;;  %v3814_v41 = vsel %vm1838_vm13, %v13865_v36, %v13854_v61 }
 0x3e1   : > { %12834 = vmatpush1.bf16.msra.mxu0 %v12833_v24  ;;  %12395 = vmatprep.mubr.msk.f32.mxu0 %vm538_vm8, %v11703_v42  ;;  %v11715_v24 = vld [vmem:[%s16462_s4 + $0x220] sm:$0xff]  ;;  %v3812_v42 = vsel %vm1838_vm13, %v13864_v38, %v13859_v62 }
 0x3e2   : > { %12836 = vmatprep.subr.bf16.mxu0 %v12835_v30  ;;  %v12857_v18 = vpack.c.bf16 %v3814_v41, %v3812_v42 }
 0x3e4   : > { %12396 = vmatmul.mubr.msk.f32.gmra.mrb[20].mxu0 %vm538_vm8, %v11704_v49  ;;  %v13873_v49 = vpop.permute.xlu1 %13872 }
 0x3e5   : > { %3226 = vmatprep.mubr.f32.mxu0 %v14450_v1  ;;  %v13875_v35 = vunpack.i.h.bf16 %v13873_v49  ;;  %v13874_v40 = vunpack.i.l.bf16 %v13873_v49 }
 0x3e7   : > { %v4037_v43 = vsel %vm304_vm2, %v13874_v40, %v13875_v35 }
 0x3e8   : > { %11717 = vmatmul.mubr.msk.f32.vlgmr.msra.gmra.mrb[10].mxu0 %vm538_vm8, %v11713_v60 }
 0x3e9   : > { %12838 = vmatpush3.bf16.msra.mxu0 %v12835_v30  ;;  %3232 = vmatprep.mubr.f32.mxu0 %v14450_v1  ;;  %v12859_v30 = vpack.c.bf16 %v13855_v17, %v13860_v63 }
 0x3ea   : > { %12840 = vmatprep.subr.bf16.mxu0 %v12839_v12  ;;  %v12863_v12 = vpack.c.bf16 %v4039_v44, %v4037_v43 }
 0x3ec   : > { %11718 = vmatmul.mubr.msk.f32.gmra.mrb[12].mxu0 %vm538_vm8, %v11714_v52 }
 0x3ed   : > { %3238 = vmatprep.mubr.f32.mxu0 %v14450_v1 }
 0x3f0   : > { %11719 = vmatmul.mubr.msk.f32.gmra.mrb[14].mxu0 %vm538_vm8, %v11715_v24 }
 0x3f1   : > { %3244 = vmatprep.mubr.f32.mxu0 %v14450_v1 }
 0x3f4   : > { %11720 = vmatmul.mubr.msk.f32.gmra.mrb[16].mxu0 %vm538_vm8, %v11716_v33 }
 0x3f5   : > { %12402 = vmatprep.mubr.msk.f32.mxu0 %vm538_vm8, %v11713_v60  ;;  %v11749_v60 = vld [vmem:[%s16462_s4 + $0x390] sm:$0xff] }
 0x3f8   : > { %12403 = vmatmul.mubr.msk.f32.vlgmr.msra.gmra.mrb[18].mxu0 %vm538_vm8, %v11714_v52  ;;  %v11750_v52 = vld [vmem:[%s16462_s4 + $0x398] sm:$0xff] }
 0x3f9   : > { %12842 = vmatpush1.bf16.msra.mxu0 %v12841_v46  ;;  %12405 = vmatprep.mubr.msk.f32.mxu0 %vm538_vm8, %v11715_v24  ;;  %v13878_v24 = vpop.permute.xlu1 %13877  ;;  %v12867_v46 = vpack.c.bf16 %v13870_v5, %v13875_v35  ;;  %v4294_v5 = vld [vmem:[%s16463_s5 + $0x30] sm:$0xff] }
 0x3fa   : > { %12844 = vmatprep.subr.bf16.mxu0 %v12843_v54  ;;  %v13879_v59 = vunpack.i.l.bf16 %v13878_v24 }
 0x3fc   : > { %12406 = vmatmul.mubr.msk.f32.gmra.mrb[20].mxu0 %vm538_vm8, %v11716_v33  ;;  %v13880_v33 = vunpack.i.h.bf16 %v13878_v24  ;;  %v4036_v53 = vsel %vm304_vm2, %v13879_v59, %v13874_v40  ;;  %v2232_v40 = vld [vmem:[%s16463_s5 + $0x20] sm:$0xff] }
 0x3fd   : > { %3450 = vmatprep.mubr.f32.mxu0 %v14450_v1 }
 0x3fe   : > { %v4038_v34 = vsel %vm304_vm2, %v13880_v33, %v13869_v9  ;;  %v2233_v9 = vld [vmem:[%s16463_s5 + $0x28] sm:$0xff] }
 0x3ff   : > { %v12865_v39 = vpack.c.bf16 %v4038_v34, %v4036_v53 }
 0x400   : > { %11729 = vmatmul.mubr.msk.f32.vlgmr.msra.gmra.mrb[10].mxu0 %vm538_vm8, %v11725_v57 }
 0x401   : > { %12846 = vmatpush3.bf16.msra.mxu0 %v12843_v54  ;;  %3456 = vmatprep.mubr.f32.mxu0 %v14450_v1  ;;  %v11762_v54 = vld [vmem:[%s16462_s4 + $0x418] sm:$0xff] }
 0x402   : > { %12848 = vmatprep.subr.bf16.mxu0 %v12847_v20 }
 0x404   : > { %11730 = vmatmul.mubr.msk.f32.gmra.mrb[12].mxu0 %vm538_vm8, %v11726_v58 }
 0x405   : > { %3462 = vmatprep.mubr.f32.mxu0 %v14450_v1 }
 0x408   : > { %11731 = vmatmul.mubr.msk.f32.gmra.mrb[14].mxu0 %vm538_vm8, %v11727_v47 }
 0x409   : > { %3468 = vmatprep.mubr.f32.mxu0 %v14450_v1 }
 0x40c   : > { %11732 = vmatmul.mubr.msk.f32.gmra.mrb[16].mxu0 %vm538_vm8, %v11728_v6 }
 0x40d   : > { %12412 = vmatprep.mubr.msk.f32.mxu0 %vm538_vm8, %v11725_v57 }
 0x410   : > { %12413 = vmatmul.mubr.msk.f32.vlgmr.msra.gmra.mrb[18].mxu0 %vm538_vm8, %v11726_v58  ;;  %v4252_v58 = vpop.permute.xlu1 %4251 }
 0x411   : > { %12850 = vmatpush1.bf16.msra.mxu0 %v12849_v11  ;;  %12415 = vmatprep.mubr.msk.f32.mxu0 %vm538_vm8, %v11727_v47  ;;  %v4296_v11 = vld [vmem:[#allocation2] sm:$0xff] }
 0x412   : > { %12852 = vmatprep.subr.bf16.mxu0 %v12851_v16  ;;  %v13891_v62 = vpack.i.bf16 %v4300_v14, %v4296_v11 }
 0x414   : > { %12416 = vmatmul.mubr.msk.f32.gmra.mrb[20].mxu0 %vm538_vm8, %v11728_v6 }
 0x415   : > { %3674 = vmatprep.mubr.f32.mxu0 %v14450_v1 }
 0x418   : > { %11741 = vmatmul.mubr.msk.f32.vlgmr.msra.gmra.mrb[10].mxu0 %vm538_vm8, %v11737_v2 }
 0x419   : > { %12854 = vmatpush3.bf16.msra.mxu0 %v12851_v16  ;;  %3680 = vmatprep.mubr.f32.mxu0 %v14450_v1 }
 0x41a   : > { %12856 = vmatprep.subr.bf16.mxu0 %v12855_v22 }
 0x41c   : > { %11742 = vmatmul.mubr.msk.f32.gmra.mrb[12].mxu0 %vm538_vm8, %v11738_v23 }
 0x41d   : > { %3686 = vmatprep.mubr.f32.mxu0 %v14450_v1 }
 0x420   : > { %11743 = vmatmul.mubr.msk.f32.gmra.mrb[14].mxu0 %vm538_vm8, %v11739_v28 }
 0x421   : > { %3692 = vmatprep.mubr.f32.mxu0 %v14450_v1 }
 0x424   : > { %11744 = vmatmul.mubr.msk.f32.gmra.mrb[16].mxu0 %vm538_vm8, %v11740_v32 }
 0x425   : > { %12422 = vmatprep.mubr.msk.f32.mxu0 %vm538_vm8, %v11737_v2 }
 0x428   : > { %12423 = vmatmul.mubr.msk.f32.vlgmr.msra.gmra.mrb[18].mxu0 %vm538_vm8, %v11738_v23 }
 0x429   : > { %12858 = vmatpush1.bf16.msra.mxu0 %v12857_v18  ;;  %12425 = vmatprep.mubr.msk.f32.mxu0 %vm538_vm8, %v11739_v28 }
 0x42a   : > { %12860 = vmatprep.subr.bf16.mxu0 %v12859_v30 }
 0x42c   : > { %12426 = vmatmul.mubr.msk.f32.gmra.mrb[20].mxu0 %vm538_vm8, %v11740_v32 }
 0x42d   : > { %3898 = vmatprep.mubr.f32.mxu0 %v14450_v1 }
 0x430   : > { %11753 = vmatmul.mubr.msk.f32.vlgmr.msra.gmra.mrb[10].mxu0 %vm538_vm8, %v11749_v60 }
 0x431   : > { %12862 = vmatpush3.bf16.msra.mxu0 %v12859_v30  ;;  %3904 = vmatprep.mubr.f32.mxu0 %v14450_v1 }
 0x432   : > { %12864 = vmatprep.subr.bf16.mxu0 %v12863_v12 }
 0x434   : > { %11754 = vmatmul.mubr.msk.f32.gmra.mrb[12].mxu0 %vm538_vm8, %v11750_v52 }
 0x435   : > { %3910 = vmatprep.mubr.f32.mxu0 %v14450_v1 }
 0x438   : > { %11755 = vmatmul.mubr.msk.f32.gmra.mrb[14].mxu0 %vm538_vm8, %v11751_v15 }
 0x439   : > { %3916 = vmatprep.mubr.f32.mxu0 %v14450_v1 }
 0x43c   : > { %11756 = vmatmul.mubr.msk.f32.gmra.mrb[16].mxu0 %vm538_vm8, %v11752_v13 }
 0x43d   : > { %12432 = vmatprep.mubr.msk.f32.mxu0 %vm538_vm8, %v11749_v60  ;;  %v4295_v60 = vld [vmem:[%s16463_s5 + $0x38] sm:$0xff] }
 0x440   : > { %12433 = vmatmul.mubr.msk.f32.vlgmr.msra.gmra.mrb[18].mxu0 %vm538_vm8, %v11750_v52 }
 0x441   : > { %12866 = vmatpush1.bf16.msra.mxu0 %v12865_v39  ;;  %12435 = vmatprep.mubr.msk.f32.mxu0 %vm538_vm8, %v11751_v15 }
 0x442   : > { %12868 = vmatprep.subr.bf16.mxu0 %v12867_v46 }
 0x444   : > { %12436 = vmatmul.mubr.msk.f32.gmra.mrb[20].mxu0 %vm538_vm8, %v11752_v13 }
 0x445   : > { %4122 = vmatprep.mubr.f32.mxu0 %v14450_v1 }
 0x448   : > { %11765 = vmatmul.mubr.msk.f32.vlgmr.msra.gmra.mrb[10].mxu0 %vm538_vm8, %v11761_v50 }
 0x449   : > { %12870 = vmatpush3.bf16.msra.mxu0 %v12867_v46  ;;  %4128 = vmatprep.mubr.f32.mxu0 %v14450_v1 }
 0x44c   : > { %11766 = vmatmul.mubr.msk.f32.gmra.mrb[12].mxu0 %vm538_vm8, %v11762_v54 }
 0x44d   : > { %4134 = vmatprep.mubr.f32.mxu0 %v14450_v1 }
 0x450   : > { %11767 = vmatmul.mubr.msk.f32.gmra.mrb[14].mxu0 %vm538_vm8, %v11763_v55 }
 0x451   : > { %4140 = vmatprep.mubr.f32.mxu0 %v14450_v1 }
 0x454   : > { %11768 = vmatmul.mubr.msk.f32.gmra.mrb[16].mxu0 %vm538_vm8, %v11764_v27 }
 0x455   : > { %12442 = vmatprep.mubr.msk.f32.mxu0 %vm538_vm8, %v11761_v50 }
 0x458   : > { %12443 = vmatmul.mubr.msk.f32.vlgmr.msra.gmra.mrb[18].mxu0 %vm538_vm8, %v11762_v54 }
 0x459   : > { %12445 = vmatprep.mubr.msk.f32.mxu0 %vm538_vm8, %v11763_v55  ;;  %v11773_v55 = vld [vmem:[%s16462_s4 + $0xb0] sm:$0xff] }
 0x45c   : > { %12446 = vmatmul.mubr.msk.f32.gmra.mrb[20].mxu0 %vm538_vm8, %v11764_v27  ;;  %v11774_v27 = vld [vmem:[%s16462_s4 + $0xb8] sm:$0xff] }
 0x45d   : > { %4414 = vmatprep.mubr.f32.mxu0 %v14450_v1 }
 0x51b   : > { %v4124_v37 = vpop.f32.mrb[10].mxu0 }
 0x51c   : > { %v4264_v57 = vadd.f32 %v4247_v56, %v4124_v37  ;;  %v4126_v45 = vpop.f32.mrb[11].mxu0 }
 0x51d   : > { %v4265_v48 = vadd.f32 %v4247_v56, %v4126_v45 }
 0x51e   : > { %v4276_v20 = vmax.f32 %v4264_v57, 0.0 }
 0x51f   : > { %v4277_v0 = vmax.f32 %v4265_v48, 0.0  ;;  %v4130_v47 = vpop.f32.mrb[12].mxu0 }
 0x520   : > { %v15240_v3 = vmul.f32 %v4276_v20, %v14548_v26  ;;  %v4267_v4 = vadd.f32 %v4252_v58, %v4130_v47  ;;  %v4132_v6 = vpop.f32.mrb[13].mxu0 }
 0x521   : > { %v15243_v7 = vmul.f32 %v4277_v0, %v14550_v29  ;;  %v4268_v8 = vadd.f32 %v4252_v58, %v4132_v6 }
 0x522   : > { %v4279_v10 = vmax.f32 %v4267_v4, 0.0 }
 0x523   : > { %v4280_v16 = vmax.f32 %v4268_v8, 0.0  ;;  %v13881_v17 = vpack.i.bf16 %v15243_v7, %v15240_v3 }
 0x524   : > { %v15248_v61 = vmul.f32 %v4279_v10, %v14548_v26 }
 0x525   : > { %v15251_v63 = vmul.f32 %v4280_v16, %v14550_v29  ;;  %13882 = vrot.lane.b32.xlu0 %v13881_v17, %s14455_s16 }
 0x526   : > { %v13971_v2 = vpack.i.bf16 %v15248_v61, %v15240_v3  ;;  %v12905_v19 = vpack.c.bf16 %v15248_v61, %v15240_v3  ;;  %v11796_v3 = vld [vmem:[%s16462_s4 + $0x238] sm:$0xff] }
 0x527   : > { %v13886_v51 = vpack.i.bf16 %v15251_v63, %v15248_v61  ;;  %v12903_v22 = vpack.c.bf16 %v15251_v63, %v15243_v7 }
 0x529   : > { %13892 = vrot.lane.b32.xlu0 %v13891_v62, %s14455_s16  ;;  %13887 = vrot.lane.b32.xlu1 %v13886_v51, %s14455_s16 }
 0x52b   : > { %v12444_v23 = vpop.f32.mrb[18].mxu0 }
 0x52c   : > { %v4269_v28 = vadd.f32 %v12444_v23, %v4252_v58  ;;  %v4213_v31 = vpop.f32.mrb[19].mxu0 }
 0x52d   : > { %v4266_v32 = vadd.f32 %v4247_v56, %v4213_v31  ;;  %13897 = vrot.lane.b32.xlu0 %v13881_v17, %s14453_s12 }
 0x52e   : > { %v4281_v36 = vmax.f32 %v4269_v28, 0.0 }
 0x52f   : > { %v4278_v38 = vmax.f32 %v4266_v32, 0.0 }
 0x530   : > { %v4287_v41 = vmul.f32 %v4281_v36, %v14546_v25 }
 0x531   : > { %v4284_v42 = vmul.f32 %v4278_v38, %v14546_v25  ;;  %13912 = vrot.lane.b32.xlu0 %v13891_v62, %s14453_s12 }
 0x532   : > { %4293 = vst.msk [vmem:[#allocation2 + $0x38] sm:$0xff] %vm481_vm5, %v4287_v41 }
 0x533   : > { %4290 = vst.msk [vmem:[#allocation2 + $0x18] sm:$0xff] %vm481_vm5, %v4284_v42 }
 0x535   : > { %13917 = vrot.lane.b32.xlu0 %v13881_v17, %s14454_s15 }
 0x539   : > { %v15271_v49 = vld [vmem:[#allocation2 + $0x38] sm:$0xff]  ;;  %13932 = vrot.lane.b32.xlu0 %v13891_v62, %s14454_s15 }
 0x53a   : > { %v15274_v18 = vld [vmem:[#allocation2 + $0x18] sm:$0xff]  ;;  %v13976_v35 = vpack.i.bf16 %v15271_v49, %v15251_v63 }
 0x53b   : > { %v13901_v21 = vpack.i.bf16 %v15271_v49, %v15274_v18  ;;  %v13966_v30 = vpack.i.bf16 %v15274_v18, %v15243_v7  ;;  %v11795_v7 = vld [vmem:[%s16462_s4 + $0x230] sm:$0xff] }
 0x53d   : > { %13902 = vrot.lane.b32.xlu1 %v13901_v21, %s14455_s16  ;;  %13937 = vrot.lane.b32.xlu0 %v13881_v17, %s14456_s17 }
 0x541   : > { %13907 = vrot.lane.b32.xlu1 %v13886_v51, %s14453_s12  ;;  %13952 = vrot.lane.b32.xlu0 %v13891_v62, %s14456_s17 }
 0x545   : > { %13922 = vrot.lane.b32.xlu1 %v13901_v21, %s14453_s12  ;;  %13967 = vrot.lane.b32.xlu0 %v13966_v30, %s14457_s18 }
 0x549   : > { %13927 = vrot.lane.b32.xlu1 %v13886_v51, %s14454_s15  ;;  %13972 = vrot.lane.b32.xlu0 %v13971_v2, %s14457_s18 }
 0x54d   : > { %13942 = vrot.lane.b32.xlu1 %v13901_v21, %s14454_s15  ;;  %13977 = vrot.lane.b32.xlu0 %v13976_v35, %s14458_s19 }
 0x551   : > { %13947 = vrot.lane.b32.xlu1 %v13886_v51, %s14456_s17  ;;  %13997 = vrot.lane.b32.xlu0 %v13966_v30, %s14459_s20 }
 0x555   : > { %13957 = vrot.lane.b32.xlu1 %v13901_v21, %s14456_s17  ;;  %14002 = vrot.lane.b32.xlu0 %v13971_v2, %s14459_s20  ;;  %v4304_v21 = vld [vmem:[%s16462_s4 + $0x30] sm:$0xff] }
 0x559   : > { %13962 = vrot.lane.b32.xlu1 %v13976_v35, %s14457_s18  ;;  %14007 = vrot.lane.b32.xlu0 %v13976_v35, %s14451_s29 }
 0x55d   : > { %13982 = vrot.lane.b32.xlu1 %v13966_v30, %s14458_s19  ;;  %4256 = vperm.xlu0 %13600, %v2232_v40  }
 0x561   : > { %13987 = vrot.lane.b32.xlu1 %v13971_v2, %s14458_s19  ;;  %5996 = vperm.xlu0 %13600, %v4294_v5  }
 0x565   : > { %13992 = vrot.lane.b32.xlu1 %v13976_v35, %s14459_s20 }
 0x569   : > { %14012 = vrot.lane.b32.xlu1 %v13966_v30, %s14451_s29 }
 0x56d   : > { %14017 = vrot.lane.b32.xlu1 %v13971_v2, %s14451_s29 }
 0x571   : > { %4261 = vperm.xlu1 %13599, %v2233_v9  }
 0x575   : > { %6001 = vperm.xlu1 %13599, %v4295_v60  }
 0x597   : > { %v13883_v43 = vpop.permute.xlu0 %13882 }
 0x598   : > { %v13885_v44 = vunpack.i.h.bf16 %v13883_v43  ;;  %v13884_v12 = vunpack.i.l.bf16 %v13883_v43 }
 0x59a   : > { %v4333_v39 = vsel %vm525_vm6, %v13884_v12, %v13885_v44 }
 0x59b   : > { %v13893_v52 = vpop.permute.xlu0 %13892  ;;  %v13888_v24 = vpop.permute.xlu1 %13887 }
 0x59c   : > { %v13895_v15 = vunpack.i.h.bf16 %v13893_v52  ;;  %v13894_v33 = vunpack.i.l.bf16 %v13893_v52  ;;  %v13890_v59 = vunpack.i.h.bf16 %v13888_v24  ;;  %v13889_v13 = vunpack.i.l.bf16 %v13888_v24 }
 0x59e   : > { %v4332_v34 = vsel %vm525_vm6, %v13894_v33, %v13884_v12  ;;  %v4335_v53 = vsel %vm525_vm6, %v13895_v15, %v13889_v13  ;;  %v4336_v46 = vsel %vm525_vm6, %v13889_v13, %v13890_v59 }
 0x59f   : > { %v12871_v50 = vpack.c.bf16 %v4336_v46, %v4333_v39  ;;  %v12873_v54 = vpack.c.bf16 %v4335_v53, %v4332_v34  ;;  %v13898_v56 = vpop.permute.xlu0 %13897 }
 0x5a0   : > { %v13900_v20 = vunpack.i.h.bf16 %v13898_v56  ;;  %v13899_v58 = vunpack.i.l.bf16 %v13898_v56 }
 0x5a1   : > { %12872 = vmatprep.subr.bf16.mxu0 %v12871_v50 }
 0x5a2   : > { %12874 = vmatpush1.bf16.msra.mxu0 %v12873_v54  ;;  %v4519_v2 = vsel %vm713_vm7, %v13899_v58, %v13900_v20 }
 0x5a3   : > { %v13913_v37 = vpop.permute.xlu0 %13912 }
 0x5a4   : > { %v13915_v0 = vunpack.i.h.bf16 %v13913_v37  ;;  %v13914_v47 = vunpack.i.l.bf16 %v13913_v37 }
 0x5a5   : > { %11775 = vmatmul.mubr.msk.f32.vlgmr.msra.gmra.mrb[14].mxu0 %vm538_vm8, %v11773_v55 }
 0x5a6   : > { %4420 = vmatprep.mubr.f32.mxu0 %v14450_v1  ;;  %v4518_v17 = vsel %vm713_vm7, %v13914_v47, %v13899_v58 }
 0x5a7   : > { %v13918_v8 = vpop.permute.xlu0 %13917 }
 0x5a8   : > { %v13920_v41 = vunpack.i.h.bf16 %v13918_v8  ;;  %v13919_v42 = vunpack.i.l.bf16 %v13918_v8 }
 0x5a9   : > { %11776 = vmatmul.mubr.msk.f32.gmra.mrb[16].mxu0 %vm538_vm8, %v11774_v27 }
 0x5aa   : > { %12452 = vmatprep.mubr.msk.f32.mxu0 %vm538_vm8, %v11773_v55  ;;  %v4707_v12 = vsel %vm903_vm9, %v13919_v42, %v13920_v41 }
 0x5ab   : > { %v13933_v38 = vpop.permute.xlu0 %13932 }
 0x5ac   : > { %v13935_v43 = vunpack.i.h.bf16 %v13933_v38  ;;  %v13934_v24 = vunpack.i.l.bf16 %v13933_v38 }
 0x5ae   : > { %v4706_v55 = vsel %vm903_vm9, %v13934_v24, %v13919_v42 }
 0x5af   : > { %v13903_v57 = vpop.permute.xlu1 %13902  ;;  %v13938_v15 = vpop.permute.xlu0 %13937 }
 0x5b0   : > { %v13905_v45 = vunpack.i.h.bf16 %v13903_v57  ;;  %v13904_v48 = vunpack.i.l.bf16 %v13903_v57  ;;  %v13940_v39 = vunpack.i.h.bf16 %v13938_v15  ;;  %v13939_v46 = vunpack.i.l.bf16 %v13938_v15 }
 0x5b2   : > { %v4334_v4 = vsel %vm525_vm6, %v13885_v44, %v13904_v48  ;;  %v4337_v6 = vsel %vm525_vm6, %v13890_v59, %v13905_v45  ;;  %v4305_v44 = vld [vmem:[%s16462_s4 + $0x38] sm:$0xff]  ;;  %v11783_v48 = vld [vmem:[%s16462_s4 + $0x130] sm:$0xff] }
 0x5b3   : > { %v13908_v10 = vpop.permute.xlu1 %13907  ;;  %v12875_v11 = vpack.c.bf16 %v4337_v6, %v4334_v4  ;;  %v13953_v4 = vpop.permute.xlu0 %13952 }
 0x5b4   : > { %v13910_v14 = vunpack.i.h.bf16 %v13908_v10  ;;  %v13909_v16 = vunpack.i.l.bf16 %v13908_v10  ;;  %v13955_v6 = vunpack.i.h.bf16 %v13953_v4 }
 0x5b5   : > { %12876 = vmatprep.subr.bf16.mxu0 %v12875_v11 }
 0x5b6   : > { %v4521_v62 = vsel %vm713_vm7, %v13915_v0, %v13909_v16  ;;  %12878 = vmatpush3.bf16.msra.mxu0 %v12875_v11  ;;  %v4522_v51 = vsel %vm713_vm7, %v13909_v16, %v13910_v14  ;;  %v11784_v11 = vld [vmem:[%s16462_s4 + $0x138] sm:$0xff] }
 0x5b7   : > { %v13923_v23 = vpop.permute.xlu1 %13922  ;;  %v12879_v28 = vpack.c.bf16 %v4522_v51, %v4519_v2  ;;  %v12881_v31 = vpack.c.bf16 %v4521_v62, %v4518_v17 }
 0x5b8   : > { %v13925_v32 = vunpack.i.h.bf16 %v13923_v23  ;;  %v13924_v36 = vunpack.i.l.bf16 %v13923_v23 }
 0x5b9   : > { %12453 = vmatmul.mubr.msk.f32.vlgmr.msra.gmra.mrb[20].mxu0 %vm538_vm8, %v11774_v27  ;;  %12880 = vmatprep.subr.bf16.mxu0 %v12879_v28  ;;  %v11789_v28 = vld [vmem:[%s16462_s4 + $0x1b0] sm:$0xff] }
 0x5ba   : > { %12882 = vmatpush1.bf16.msra.mxu0 %v12881_v31  ;;  %4600 = vmatprep.mubr.f32.mxu0 %v14450_v1  ;;  %v4520_v30 = vsel %vm713_vm7, %v13900_v20, %v13924_v36  ;;  %v4523_v35 = vsel %vm713_vm7, %v13910_v14, %v13925_v32  ;;  %v4901_v20 = vsel %vm1099_vm10, %v13939_v46, %v13940_v39  ;;  %v13954_v14 = vunpack.i.l.bf16 %v13953_v4  ;;  %v11790_v31 = vld [vmem:[%s16462_s4 + $0x1b8] sm:$0xff]  ;;  %v13968_v36 = vpop.permute.xlu0 %13967 }
 0x5bb   : > { %v13928_v40 = vpop.permute.xlu1 %13927  ;;  %v12883_v5 = vpack.c.bf16 %v4523_v35, %v4520_v30  ;;  %v13970_v42 = vunpack.i.h.bf16 %v13968_v36  ;;  %v12907_v30 = vpack.c.bf16 %v15271_v49, %v15274_v18 }
 0x5bc   : > { %v13930_v9 = vunpack.i.h.bf16 %v13928_v40  ;;  %v13929_v60 = vunpack.i.l.bf16 %v13928_v40  ;;  %v4900_v2 = vsel %vm1099_vm10, %v13954_v14, %v13939_v46  ;;  %v11802_v46 = vld [vmem:[%s16462_s4 + $0x2b8] sm:$0xff] }
 0x5bd   : > { %11779 = vmatmul.mubr.msk.f32.vlgmr.msra.gmra.mrb[14].mxu0 %vm538_vm8, %v4304_v21  ;;  %12884 = vmatprep.subr.bf16.mxu0 %v12883_v5 }
 0x5be   : > { %12886 = vmatpush3.bf16.msra.mxu0 %v12883_v5  ;;  %4606 = vmatprep.mubr.f32.mxu0 %v14450_v1  ;;  %v4710_v52 = vsel %vm903_vm9, %v13929_v60, %v13930_v9  ;;  %v4709_v53 = vsel %vm903_vm9, %v13935_v43, %v13929_v60 }
 0x5bf   : > { %v13943_v33 = vpop.permute.xlu1 %13942  ;;  %v12887_v59 = vpack.c.bf16 %v4710_v52, %v4707_v12  ;;  %v12889_v45 = vpack.c.bf16 %v4709_v53, %v4706_v55 }
 0x5c0   : > { %v13945_v13 = vunpack.i.h.bf16 %v13943_v33  ;;  %v13944_v34 = vunpack.i.l.bf16 %v13943_v33  ;;  %v11801_v33 = vld [vmem:[%s16462_s4 + $0x2b0] sm:$0xff] }
 0x5c1   : > { %11780 = vmatmul.mubr.msk.f32.gmra.mrb[16].mxu0 %vm538_vm8, %v4305_v44  ;;  %12888 = vmatprep.subr.bf16.mxu0 %v12887_v59 }
 0x5c2   : > { %12459 = vmatprep.mubr.msk.f32.mxu0 %vm538_vm8, %v4304_v21  ;;  %v4708_v50 = vsel %vm903_vm9, %v13920_v41, %v13944_v34  ;;  %v4711_v54 = vsel %vm903_vm9, %v13930_v9, %v13945_v13  ;;  %v13969_v21 = vunpack.i.l.bf16 %v13968_v36 }
 0x5c3   : > { %v13948_v27 = vpop.permute.xlu1 %13947  ;;  %v12891_v56 = vpack.c.bf16 %v4711_v54, %v4708_v50 }
 0x5c4   : > { %v13950_v37 = vunpack.i.h.bf16 %v13948_v27  ;;  %v13949_v57 = vunpack.i.l.bf16 %v13948_v27  ;;  %v5257_v35 = vsel %vm1458_vm11, %v13969_v21, %v13970_v42 }
 0x5c5   : > { %12460 = vmatmul.mubr.msk.f32.vlgmr.msra.gmra.mrb[20].mxu0 %vm538_vm8, %v4305_v44 }
 0x5c6   : > { %12890 = vmatpush1.bf16.msra.mxu0 %v12889_v45  ;;  %4788 = vmatprep.mubr.f32.mxu0 %v14450_v1  ;;  %v4904_v58 = vsel %vm1099_vm10, %v13949_v57, %v13950_v37  ;;  %v4903_v16 = vsel %vm1099_vm10, %v13955_v6, %v13949_v57 }
 0x5c7   : > { %12892 = vmatprep.subr.bf16.mxu0 %v12891_v56  ;;  %v13958_v0 = vpop.permute.xlu1 %13957  ;;  %v12895_v47 = vpack.c.bf16 %v4904_v58, %v4901_v20  ;;  %v12897_v51 = vpack.c.bf16 %v4903_v16, %v4900_v2  ;;  %v11807_v58 = vld [vmem:[%s16462_s4 + $0x330] sm:$0xff] }
 0x5c8   : > { %v13960_v8 = vunpack.i.h.bf16 %v13958_v0  ;;  %v13959_v10 = vunpack.i.l.bf16 %v13958_v0 }
 0x5c9   : > { %11785 = vmatmul.mubr.msk.f32.vlgmr.msra.gmra.mrb[14].mxu0 %vm538_vm8, %v11783_v48 }
 0x5ca   : > { %12894 = vmatpush3.bf16.msra.mxu0 %v12891_v56  ;;  %4794 = vmatprep.mubr.f32.mxu0 %v14450_v1  ;;  %v4902_v17 = vsel %vm1099_vm10, %v13940_v39, %v13959_v10  ;;  %v4905_v62 = vsel %vm1099_vm10, %v13950_v37, %v13960_v8  ;;  %v11808_v8 = vld [vmem:[%s16462_s4 + $0x338] sm:$0xff] }
 0x5cb   : > { %12896 = vmatprep.subr.bf16.mxu0 %v12895_v47  ;;  %v12899_v23 = vpack.c.bf16 %v4905_v62, %v4902_v17  ;;  %v13963_v32 = vpop.permute.xlu1 %13962 }
 0x5cc   : > { %v13965_v38 = vunpack.i.h.bf16 %v13963_v32  ;;  %v13964_v41 = vunpack.i.l.bf16 %v13963_v32 }
 0x5cd   : > { %11786 = vmatmul.mubr.msk.f32.gmra.mrb[16].mxu0 %vm538_vm8, %v11784_v11 }
 0x5ce   : > { %12466 = vmatprep.mubr.msk.f32.mxu0 %vm538_vm8, %v11783_v48  ;;  %v5259_v63 = vsel %vm1458_vm11, %v13964_v41, %v13965_v38  ;;  %v12915_v15 = vpack.c.bf16 %v13965_v38, %v13970_v42  ;;  %v11813_v38 = vld [vmem:[%s16462_s4 + $0x3b0] sm:$0xff] }
 0x5cf   : > { %v12911_v40 = vpack.c.bf16 %v5259_v63, %v5257_v35  ;;  %v13983_v49 = vpop.permute.xlu1 %13982  ;;  %v11814_v63 = vld [vmem:[%s16462_s4 + $0x3b8] sm:$0xff] }
 0x5d0   : > { %v13985_v9 = vunpack.i.h.bf16 %v13983_v49  ;;  %v13984_v60 = vunpack.i.l.bf16 %v13983_v49 }
 0x5d1   : > { %12467 = vmatmul.mubr.msk.f32.vlgmr.msra.gmra.mrb[20].mxu0 %vm538_vm8, %v11784_v11 }
 0x5d2   : > { %12898 = vmatpush1.bf16.msra.mxu0 %v12897_v51  ;;  %4982 = vmatprep.mubr.f32.mxu0 %v14450_v1  ;;  %v5445_v59 = vsel %vm1648_vm12, %v13984_v60, %v13985_v9 }
 0x5d3   : > { %12900 = vmatprep.subr.bf16.mxu0 %v12899_v23  ;;  %v13988_v24 = vpop.permute.xlu1 %13987 }
 0x5d4   : > { %v13990_v34 = vunpack.i.h.bf16 %v13988_v24  ;;  %v13989_v53 = vunpack.i.l.bf16 %v13988_v24 }
 0x5d5   : > { %11791 = vmatmul.mubr.msk.f32.vlgmr.msra.gmra.mrb[14].mxu0 %vm538_vm8, %v11789_v28 }
 0x5d6   : > { %12902 = vmatpush3.bf16.msra.mxu0 %v12899_v23  ;;  %4988 = vmatprep.mubr.f32.mxu0 %v14450_v1  ;;  %v5444_v27 = vsel %vm1648_vm12, %v13989_v53, %v13984_v60 }
 0x5d7   : > { %12904 = vmatprep.subr.bf16.mxu0 %v12903_v22  ;;  %v13973_v22 = vpop.permute.xlu0 %13972  ;;  %v13993_v50 = vpop.permute.xlu1 %13992 }
 0x5d8   : > { %v13975_v61 = vunpack.i.h.bf16 %v13973_v22  ;;  %v13995_v56 = vunpack.i.h.bf16 %v13993_v50  ;;  %v13994_v37 = vunpack.i.l.bf16 %v13993_v50  ;;  %v6034_v50 = vld [vmem:[#allocation3 + $0x20] sm:$0xff] }
 0x5d9   : > { %11792 = vmatmul.mubr.msk.f32.gmra.mrb[16].mxu0 %vm538_vm8, %v11790_v31 }
 0x5da   : > { %12473 = vmatprep.mubr.msk.f32.mxu0 %vm538_vm8, %v11789_v28  ;;  %v5258_v5 = vsel %vm1458_vm11, %v13975_v61, %v13964_v41  ;;  %v5635_v0 = vsel %vm1838_vm13, %v13994_v37, %v13995_v56  ;;  %v11819_v61 = vld [vmem:[%s16462_s4 + $0x430] sm:$0xff] }
 0x5db   : > { %v13978_v18 = vpop.permute.xlu0 %13977  ;;  %v14013_v14 = vpop.permute.xlu1 %14012 }
 0x5dc   : > { %v13980_v44 = vunpack.i.h.bf16 %v13978_v18  ;;  %v13979_v12 = vunpack.i.l.bf16 %v13978_v18  ;;  %v14015_v62 = vunpack.i.h.bf16 %v14013_v14  ;;  %v14014_v2 = vunpack.i.l.bf16 %v14013_v14 }
 0x5dd   : > { %12474 = vmatmul.mubr.msk.f32.vlgmr.msra.gmra.mrb[20].mxu0 %vm538_vm8, %v11790_v31 }
 0x5de   : > { %12906 = vmatpush1.bf16.msra.mxu0 %v12905_v19  ;;  %5148 = vmatprep.mubr.f32.mxu0 %v14450_v1  ;;  %v13974_v19 = vunpack.i.l.bf16 %v13973_v22  ;;  %v5447_v13 = vsel %vm1648_vm12, %v13979_v12, %v13980_v44  ;;  %v5446_v55 = vsel %vm1648_vm12, %v13990_v34, %v13979_v12  ;;  %v12923_v20 = vpack.c.bf16 %v13980_v44, %v13985_v9 }
 0x5df   : > { %12908 = vmatprep.subr.bf16.mxu0 %v12907_v30  ;;  %v12919_v39 = vpack.c.bf16 %v5447_v13, %v5445_v59  ;;  %v13998_v54 = vpop.permute.xlu0 %13997  ;;  %v12921_v48 = vpack.c.bf16 %v5446_v55, %v5444_v27  ;;  %v14018_v36 = vpop.permute.xlu1 %14017  ;;  %v5821_v41 = vsel %vm304_vm2, %v14014_v2, %v14015_v62 }
 0x5e0   : > { %v5256_v43 = vsel %vm1458_vm11, %v13974_v19, %v13969_v21  ;;  %v14000_v57 = vunpack.i.h.bf16 %v13998_v54  ;;  %v13999_v45 = vunpack.i.l.bf16 %v13998_v54  ;;  %v14020_v21 = vunpack.i.h.bf16 %v14018_v36  ;;  %v11820_v19 = vld [vmem:[%s16462_s4 + $0x438] sm:$0xff] }
 0x5e1   : > { %11797 = vmatmul.mubr.msk.f32.vlgmr.msra.gmra.mrb[14].mxu0 %vm538_vm8, %v11795_v7  ;;  %v12913_v52 = vpack.c.bf16 %v5258_v5, %v5256_v43 }
 0x5e2   : > { %12910 = vmatpush3.bf16.msra.mxu0 %v12907_v30  ;;  %5154 = vmatprep.mubr.f32.mxu0 %v14450_v1  ;;  %v5633_v4 = vsel %vm1838_vm13, %v13999_v45, %v14000_v57  ;;  %v12931_v32 = vpack.c.bf16 %v13995_v56, %v14000_v57  ;;  %v14019_v30 = vunpack.i.l.bf16 %v14018_v36 }
 0x5e3   : > { %12912 = vmatprep.subr.bf16.mxu0 %v12911_v40  ;;  %v14003_v47 = vpop.permute.xlu0 %14002  ;;  %v12927_v6 = vpack.c.bf16 %v5635_v0, %v5633_v4 }
 0x5e4   : > { %v14005_v10 = vunpack.i.h.bf16 %v14003_v47  ;;  %v14004_v11 = vunpack.i.l.bf16 %v14003_v47  ;;  %v5820_v35 = vsel %vm304_vm2, %v14019_v30, %v14014_v2 }
 0x5e5   : > { %11798 = vmatmul.mubr.msk.f32.gmra.mrb[16].mxu0 %vm538_vm8, %v11796_v3 }
 0x5e6   : > { %12480 = vmatprep.mubr.msk.f32.mxu0 %vm538_vm8, %v11795_v7  ;;  %v5634_v17 = vsel %vm1838_vm13, %v14005_v10, %v13994_v37  ;;  %v5632_v51 = vsel %vm1838_vm13, %v14004_v11, %v13999_v45 }
 0x5e7   : > { %v14008_v16 = vpop.permute.xlu0 %14007  ;;  %v12929_v31 = vpack.c.bf16 %v5634_v17, %v5632_v51  ;;  %v6028_v51 = vld [vmem:[%s16463_s5 + $0x40] sm:$0xff] }
 0x5e8   : > { %v14010_v23 = vunpack.i.h.bf16 %v14008_v16  ;;  %v14009_v28 = vunpack.i.l.bf16 %v14008_v16 }
 0x5e9   : > { %12481 = vmatmul.mubr.msk.f32.vlgmr.msra.gmra.mrb[20].mxu0 %vm538_vm8, %v11796_v3 }
 0x5ea   : > { %12914 = vmatpush1.bf16.msra.mxu0 %v12913_v52  ;;  %5336 = vmatprep.mubr.f32.mxu0 %v14450_v1  ;;  %v5823_v42 = vsel %vm304_vm2, %v14009_v28, %v14010_v23  ;;  %v5822_v22 = vsel %vm304_vm2, %v14020_v21, %v14009_v28  ;;  %v12939_v3 = vpack.c.bf16 %v14010_v23, %v14015_v62  ;;  %v6029_v23 = vld [vmem:[%s16463_s5 + $0x48] sm:$0xff] }
 0x5eb   : > { %12916 = vmatprep.subr.bf16.mxu0 %v12915_v15  ;;  %v12935_v7 = vpack.c.bf16 %v5823_v42, %v5821_v41  ;;  %v12937_v40 = vpack.c.bf16 %v5822_v22, %v5820_v35  ;;  %v4257_v49 = vpop.permute.xlu0 %4256 }
 0x5ed   : > { %11803 = vmatmul.mubr.msk.f32.vlgmr.msra.gmra.mrb[14].mxu0 %vm538_vm8, %v11801_v33 }
 0x5ee   : > { %12918 = vmatpush3.bf16.msra.mxu0 %v12915_v15  ;;  %5342 = vmatprep.mubr.f32.mxu0 %v14450_v1 }
 0x5ef   : > { %12920 = vmatprep.subr.bf16.mxu0 %v12919_v39  ;;  %v5997_v43 = vpop.permute.xlu0 %5996 }
 0x5f0   : > { %v4262_v18 = vpop.permute.xlu1 %4261 }
 0x5f1   : > { %11804 = vmatmul.mubr.msk.f32.gmra.mrb[16].mxu0 %vm538_vm8, %v11802_v46 }
 0x5f2   : > { %12487 = vmatprep.mubr.msk.f32.mxu0 %vm538_vm8, %v11801_v33 }
 0x5f4   : > { %v6002_v13 = vpop.permute.xlu1 %6001 }
 0x5f5   : > { %12488 = vmatmul.mubr.msk.f32.vlgmr.msra.gmra.mrb[20].mxu0 %vm538_vm8, %v11802_v46  ;;  %v6030_v46 = vld [vmem:[#allocation3] sm:$0xff] }
 0x5f6   : > { %12922 = vmatpush1.bf16.msra.mxu0 %v12921_v48  ;;  %5524 = vmatprep.mubr.f32.mxu0 %v14450_v1 }
 0x5f7   : > { %12924 = vmatprep.subr.bf16.mxu0 %v12923_v20 }
 0x5f9   : > { %11809 = vmatmul.mubr.msk.f32.vlgmr.msra.gmra.mrb[14].mxu0 %vm538_vm8, %v11807_v58 }
 0x5fa   : > { %12926 = vmatpush3.bf16.msra.mxu0 %v12923_v20  ;;  %5530 = vmatprep.mubr.f32.mxu0 %v14450_v1  ;;  %v14031_v20 = vpack.i.bf16 %v6034_v50, %v6030_v46 }
 0x5fb   : > { %12928 = vmatprep.subr.bf16.mxu0 %v12927_v6 }
 0x5fd   : > { %11810 = vmatmul.mubr.msk.f32.gmra.mrb[16].mxu0 %vm538_vm8, %v11808_v8 }
 0x5fe   : > { %12494 = vmatprep.mubr.msk.f32.mxu0 %vm538_vm8, %v11807_v58 }
 0x601   : > { %12495 = vmatmul.mubr.msk.f32.vlgmr.msra.gmra.mrb[20].mxu0 %vm538_vm8, %v11808_v8 }
 0x602   : > { %12930 = vmatpush1.bf16.msra.mxu0 %v12929_v31  ;;  %5712 = vmatprep.mubr.f32.mxu0 %v14450_v1 }
 0x603   : > { %12932 = vmatprep.subr.bf16.mxu0 %v12931_v32 }
 0x605   : > { %11815 = vmatmul.mubr.msk.f32.vlgmr.msra.gmra.mrb[14].mxu0 %vm538_vm8, %v11813_v38 }
 0x606   : > { %12934 = vmatpush3.bf16.msra.mxu0 %v12931_v32  ;;  %5718 = vmatprep.mubr.f32.mxu0 %v14450_v1 }
 0x607   : > { %12936 = vmatprep.subr.bf16.mxu0 %v12935_v7 }
 0x609   : > { %11816 = vmatmul.mubr.msk.f32.gmra.mrb[16].mxu0 %vm538_vm8, %v11814_v63 }
 0x60a   : > { %12501 = vmatprep.mubr.msk.f32.mxu0 %vm538_vm8, %v11813_v38 }
 0x60d   : > { %12502 = vmatmul.mubr.msk.f32.vlgmr.msra.gmra.mrb[20].mxu0 %vm538_vm8, %v11814_v63 }
 0x60e   : > { %12938 = vmatpush1.bf16.msra.mxu0 %v12937_v40  ;;  %5900 = vmatprep.mubr.f32.mxu0 %v14450_v1 }
 0x60f   : > { %12940 = vmatprep.subr.bf16.mxu0 %v12939_v3 }
 0x611   : > { %11821 = vmatmul.mubr.msk.f32.vlgmr.msra.gmra.mrb[14].mxu0 %vm538_vm8, %v11819_v61 }
 0x612   : > { %12942 = vmatpush3.bf16.msra.mxu0 %v12939_v3  ;;  %5906 = vmatprep.mubr.f32.mxu0 %v14450_v1 }
 0x615   : > { %11822 = vmatmul.mubr.msk.f32.gmra.mrb[16].mxu0 %vm538_vm8, %v11820_v19 }
 0x616   : > { %12508 = vmatprep.mubr.msk.f32.mxu0 %vm538_vm8, %v11819_v61 }
 0x619   : > { %12509 = vmatmul.mubr.msk.f32.vlgmr.msra.gmra.mrb[20].mxu0 %vm538_vm8, %v11820_v19  ;;  %v11825_v19 = vld [vmem:[%s16462_s4 + $0xc0] sm:$0xff] }
 0x61a   : > { %7888 = vmatprep.mubr.f32.mxu0 %v14450_v1 }
 0x6e4   : > { %v5902_v5 = vpop.f32.mrb[14].mxu0 }
 0x6e5   : > { %v13163_v9 = vadd.f32 %v5902_v5, %v4257_v49  ;;  %v5904_v60 = vpop.f32.mrb[15].mxu0 }
 0x6e6   : > { %v13165_v44 = vadd.f32 %v5904_v60, %v4257_v49 }
 0x6e7   : > { %v13164_v12 = vadd.f32 %v13163_v9, %v5997_v43 }
 0x6e8   : > { %v13166_v52 = vadd.f32 %v13165_v44, %v5997_v43  ;;  %v5908_v24 = vpop.f32.mrb[16].mxu0 }
 0x6e9   : > { %v15472_v15 = vmul.f32 %v13164_v12, %v14548_v26  ;;  %v13167_v33 = vadd.f32 %v5908_v24, %v4262_v18  ;;  %v5910_v59 = vpop.f32.mrb[17].mxu0 }
 0x6ea   : > { %v15475_v34 = vmul.f32 %v13166_v52, %v14550_v29  ;;  %v13169_v53 = vadd.f32 %v5910_v59, %v4262_v18 }
 0x6eb   : > { %v13168_v39 = vadd.f32 %v13167_v33, %v6002_v13 }
 0x6ec   : > { %v13170_v54 = vadd.f32 %v13169_v53, %v6002_v13  ;;  %v12510_v55 = vpop.f32.mrb[20].mxu0  ;;  %v14021_v27 = vpack.i.bf16 %v15475_v34, %v15472_v15 }
 0x6ed   : > { %v15480_v56 = vmul.f32 %v13168_v39, %v14548_v26  ;;  %v13171_v37 = vadd.f32 %v12510_v55, %v4262_v18  ;;  %v5979_v57 = vpop.f32.mrb[21].mxu0  ;;  %v11826_v18 = vld [vmem:[%s16462_s4 + $0xc8] sm:$0xff] }
 0x6ee   : > { %v15483_v45 = vmul.f32 %v13170_v54, %v14550_v29  ;;  %v13173_v48 = vadd.f32 %v5979_v57, %v4257_v49  ;;  %14022 = vrot.lane.b32.xlu0 %v14021_v27, %s14455_s16 }
 0x6ef   : > { %v13172_v58 = vadd.f32 %v13171_v37, %v6002_v13  ;;  %v14111_v0 = vpack.i.bf16 %v15480_v56, %v15472_v15  ;;  %v12977_v47 = vpack.c.bf16 %v15480_v56, %v15472_v15  ;;  %v11848_v15 = vld [vmem:[%s16462_s4 + $0x248] sm:$0xff] }
 0x6f0   : > { %v13174_v4 = vadd.f32 %v13173_v48, %v5997_v43  ;;  %v14026_v6 = vpack.i.bf16 %v15483_v45, %v15480_v56  ;;  %v12975_v8 = vpack.c.bf16 %v15483_v45, %v15475_v34 }
 0x6f1   : > { %v6021_v10 = vmul.f32 %v13172_v58, %v14546_v25 }
 0x6f2   : > { %v6018_v11 = vmul.f32 %v13174_v4, %v14546_v25  ;;  %14032 = vrot.lane.b32.xlu0 %v14031_v20, %s14455_s16  ;;  %14027 = vrot.lane.b32.xlu1 %v14026_v6, %s14455_s16 }
 0x6f3   : > { %6027 = vst.msk [vmem:[#allocation3 + $0x38] sm:$0xff] %vm481_vm5, %v6021_v10 }
 0x6f4   : > { %6024 = vst.msk [vmem:[#allocation3 + $0x18] sm:$0xff] %vm481_vm5, %v6018_v11 }
 0x6f6   : > { %14037 = vrot.lane.b32.xlu0 %v14021_v27, %s14453_s12 }
 0x6fa   : > { %v15501_v14 = vld [vmem:[#allocation3 + $0x38] sm:$0xff]  ;;  %14052 = vrot.lane.b32.xlu0 %v14031_v20, %s14453_s12 }
 0x6fb   : > { %v15504_v16 = vld [vmem:[#allocation3 + $0x18] sm:$0xff]  ;;  %v14101_v2 = vpack.i.bf16 %v15501_v14, %v15483_v45 }
 0x6fc   : > { %v14041_v17 = vpack.i.bf16 %v15501_v14, %v15504_v16  ;;  %v14106_v62 = vpack.i.bf16 %v15504_v16, %v15475_v34  ;;  %v11847_v34 = vld [vmem:[%s16462_s4 + $0x240] sm:$0xff] }
 0x6fe   : > { %14042 = vrot.lane.b32.xlu1 %v14041_v17, %s14455_s16  ;;  %14057 = vrot.lane.b32.xlu0 %v14021_v27, %s14454_s15 }
 0x702   : > { %14047 = vrot.lane.b32.xlu1 %v14026_v6, %s14453_s12  ;;  %14072 = vrot.lane.b32.xlu0 %v14031_v20, %s14454_s15 }
 0x706   : > { %14062 = vrot.lane.b32.xlu1 %v14041_v17, %s14453_s12  ;;  %14077 = vrot.lane.b32.xlu0 %v14021_v27, %s14456_s17 }
 0x70a   : > { %14067 = vrot.lane.b32.xlu1 %v14026_v6, %s14454_s15  ;;  %14092 = vrot.lane.b32.xlu0 %v14031_v20, %s14456_s17 }
 0x70e   : > { %14082 = vrot.lane.b32.xlu1 %v14041_v17, %s14454_s15  ;;  %14107 = vrot.lane.b32.xlu0 %v14106_v62, %s14457_s18 }
 0x712   : > { %14087 = vrot.lane.b32.xlu1 %v14026_v6, %s14456_s17  ;;  %14112 = vrot.lane.b32.xlu0 %v14111_v0, %s14457_s18 }
 0x716   : > { %14097 = vrot.lane.b32.xlu1 %v14041_v17, %s14456_s17  ;;  %14117 = vrot.lane.b32.xlu0 %v14101_v2, %s14458_s19  ;;  %v6038_v17 = vld [vmem:[%s16462_s4 + $0x40] sm:$0xff] }
 0x71a   : > { %14102 = vrot.lane.b32.xlu1 %v14101_v2, %s14457_s18  ;;  %14137 = vrot.lane.b32.xlu0 %v14106_v62, %s14459_s20 }
 0x71e   : > { %14122 = vrot.lane.b32.xlu1 %v14106_v62, %s14458_s19  ;;  %14142 = vrot.lane.b32.xlu0 %v14111_v0, %s14459_s20 }
 0x722   : > { %14127 = vrot.lane.b32.xlu1 %v14111_v0, %s14458_s19  ;;  %14147 = vrot.lane.b32.xlu0 %v14101_v2, %s14451_s29 }
 0x726   : > { %14132 = vrot.lane.b32.xlu1 %v14101_v2, %s14459_s20  ;;  %7730 = vperm.xlu0 %13600, %v6028_v51  }
 0x72a   : > { %14152 = vrot.lane.b32.xlu1 %v14106_v62, %s14451_s29 }
 0x72e   : > { %14157 = vrot.lane.b32.xlu1 %v14111_v0, %s14451_s29 }
 0x732   : > { %7735 = vperm.xlu1 %13599, %v6029_v23  }
 0x760   : > { %v14023_v28 = vpop.permute.xlu0 %14022 }
 0x761   : > { %v14025_v31 = vunpack.i.h.bf16 %v14023_v28  ;;  %v14024_v32 = vunpack.i.l.bf16 %v14023_v28 }
 0x763   : > { %v6067_v22 = vsel %vm525_vm6, %v14024_v32, %v14025_v31 }
 0x764   : > { %v14033_v36 = vpop.permute.xlu0 %14032  ;;  %v14028_v38 = vpop.permute.xlu1 %14027 }
 0x765   : > { %v14035_v41 = vunpack.i.h.bf16 %v14033_v36  ;;  %v14034_v42 = vunpack.i.l.bf16 %v14033_v36  ;;  %v14030_v21 = vunpack.i.h.bf16 %v14028_v38  ;;  %v14029_v30 = vunpack.i.l.bf16 %v14028_v38  ;;  %v6039_v36 = vld [vmem:[%s16462_s4 + $0x48] sm:$0xff] }
 0x767   : > { %v6066_v7 = vsel %vm525_vm6, %v14034_v42, %v14024_v32  ;;  %v6069_v63 = vsel %vm525_vm6, %v14035_v41, %v14029_v30  ;;  %v6070_v35 = vsel %vm525_vm6, %v14029_v30, %v14030_v21 }
 0x768   : > { %v12945_v40 = vpack.c.bf16 %v6069_v63, %v6066_v7  ;;  %v14038_v3 = vpop.permute.xlu0 %14037  ;;  %v12943_v61 = vpack.c.bf16 %v6070_v35, %v6067_v22 }
 0x769   : > { %v14040_v43 = vunpack.i.h.bf16 %v14038_v3  ;;  %v14039_v44 = vunpack.i.l.bf16 %v14038_v3 }
 0x76a   : > { %12944 = vmatprep.subr.bf16.mxu1 %v12943_v61 }
 0x76b   : > { %12946 = vmatpush1.bf16.msra.mxu1 %v12945_v40  ;;  %v6253_v55 = vsel %vm713_vm7, %v14039_v44, %v14040_v43 }
 0x76c   : > { %v14053_v49 = vpop.permute.xlu0 %14052 }
 0x76d   : > { %v14055_v12 = vunpack.i.h.bf16 %v14053_v49  ;;  %v14054_v52 = vunpack.i.l.bf16 %v14053_v49 }
 0x76e   : > { %11827 = vmatmul.mubr.msk.f32.vlgmr.msra.gmra.mrb[6].mxu1 %vm538_vm8, %v11825_v19 }
 0x76f   : > { %6154 = vmatprep.mubr.f32.mxu1 %v14450_v1  ;;  %v6252_v50 = vsel %vm713_vm7, %v14054_v52, %v14039_v44 }
 0x770   : > { %v14043_v5 = vpop.permute.xlu1 %14042  ;;  %v14058_v53 = vpop.permute.xlu0 %14057 }
 0x771   : > { %v14045_v9 = vunpack.i.h.bf16 %v14043_v5  ;;  %v14044_v60 = vunpack.i.l.bf16 %v14043_v5  ;;  %v14060_v4 = vunpack.i.h.bf16 %v14058_v53  ;;  %v14059_v6 = vunpack.i.l.bf16 %v14058_v53  ;;  %v11836_v53 = vld [vmem:[%s16462_s4 + $0x148] sm:$0xff] }
 0x772   : > { %11828 = vmatmul.mubr.msk.f32.gmra.mrb[8].mxu1 %vm538_vm8, %v11826_v18 }
 0x773   : > { %v6068_v24 = vsel %vm525_vm6, %v14025_v31, %v14044_v60  ;;  %v6071_v33 = vsel %vm525_vm6, %v14030_v21, %v14045_v9  ;;  %12515 = vmatprep.mubr.msk.f32.mxu1 %vm538_vm8, %v11825_v19  ;;  %v6441_v31 = vsel %vm903_vm9, %v14059_v6, %v14060_v4  ;;  %v11835_v60 = vld [vmem:[%s16462_s4 + $0x140] sm:$0xff] }
 0x774   : > { %v14048_v59 = vpop.permute.xlu1 %14047  ;;  %v12947_v13 = vpack.c.bf16 %v6071_v33, %v6068_v24  ;;  %v14073_v0 = vpop.permute.xlu0 %14072 }
 0x775   : > { %v14050_v39 = vunpack.i.h.bf16 %v14048_v59  ;;  %v14049_v46 = vunpack.i.l.bf16 %v14048_v59  ;;  %v14075_v28 = vunpack.i.h.bf16 %v14073_v0  ;;  %v14074_v38 = vunpack.i.l.bf16 %v14073_v0 }
 0x776   : > { %12948 = vmatprep.subr.bf16.mxu1 %v12947_v13 }
 0x777   : > { %v6255_v54 = vsel %vm713_vm7, %v14055_v12, %v14049_v46  ;;  %12950 = vmatpush3.bf16.msra.mxu1 %v12947_v13  ;;  %v6256_v27 = vsel %vm713_vm7, %v14049_v46, %v14050_v39  ;;  %v6440_v61 = vsel %vm903_vm9, %v14074_v38, %v14059_v6 }
 0x778   : > { %v12953_v37 = vpack.c.bf16 %v6255_v54, %v6252_v50  ;;  %v14063_v57 = vpop.permute.xlu1 %14062  ;;  %v12951_v48 = vpack.c.bf16 %v6256_v27, %v6253_v55  ;;  %v14078_v41 = vpop.permute.xlu0 %14077 }
 0x779   : > { %v14065_v20 = vunpack.i.h.bf16 %v14063_v57  ;;  %v14064_v58 = vunpack.i.l.bf16 %v14063_v57  ;;  %v14080_v22 = vunpack.i.h.bf16 %v14078_v41  ;;  %v14079_v35 = vunpack.i.l.bf16 %v14078_v41  ;;  %v11841_v57 = vld [vmem:[%s16462_s4 + $0x1c0] sm:$0xff] }
 0x77a   : > { %12952 = vmatprep.subr.bf16.mxu1 %v12951_v48  ;;  %12516 = vmatmul.mubr.msk.f32.vlgmr.msra.gmra.mrb[10].mxu1 %vm538_vm8, %v11826_v18  ;;  %v11842_v48 = vld [vmem:[%s16462_s4 + $0x1c8] sm:$0xff] }
 0x77b   : > { %12954 = vmatpush1.bf16.msra.mxu1 %v12953_v37  ;;  %v6254_v10 = vsel %vm713_vm7, %v14040_v43, %v14064_v58  ;;  %v6257_v11 = vsel %vm713_vm7, %v14050_v39, %v14065_v20  ;;  %6334 = vmatprep.mubr.f32.mxu1 %v14450_v1  ;;  %v6635_v43 = vsel %vm1099_vm10, %v14079_v35, %v14080_v22 }
 0x77c   : > { %v14068_v62 = vpop.permute.xlu1 %14067  ;;  %v12955_v2 = vpack.c.bf16 %v6257_v11, %v6254_v10  ;;  %v14093_v24 = vpop.permute.xlu0 %14092  ;;  %v12979_v11 = vpack.c.bf16 %v15501_v14, %v15504_v16 }
 0x77d   : > { %v14070_v51 = vunpack.i.h.bf16 %v14068_v62  ;;  %v14069_v23 = vunpack.i.l.bf16 %v14068_v62  ;;  %v14095_v33 = vunpack.i.h.bf16 %v14093_v24  ;;  %v14094_v39 = vunpack.i.l.bf16 %v14093_v24 }
 0x77e   : > { %12956 = vmatprep.subr.bf16.mxu1 %v12955_v2  ;;  %11831 = vmatmul.mubr.msk.f32.vlgmr.msra.gmra.mrb[6].mxu1 %vm538_vm8, %v6038_v17 }
 0x77f   : > { %12958 = vmatpush3.bf16.msra.mxu1 %v12955_v2  ;;  %v6444_v32 = vsel %vm903_vm9, %v14069_v23, %v14070_v51  ;;  %6340 = vmatprep.mubr.f32.mxu1 %v14450_v1  ;;  %v6443_v63 = vsel %vm903_vm9, %v14075_v28, %v14069_v23  ;;  %v6634_v55 = vsel %vm1099_vm10, %v14094_v39, %v14079_v35  ;;  %v11854_v35 = vld [vmem:[%s16462_s4 + $0x2c8] sm:$0xff] }
 0x780   : > { %v14083_v42 = vpop.permute.xlu1 %14082  ;;  %v12959_v21 = vpack.c.bf16 %v6444_v32, %v6441_v31  ;;  %v12961_v18 = vpack.c.bf16 %v6443_v63, %v6440_v61  ;;  %v14108_v58 = vpop.permute.xlu0 %14107 }
 0x781   : > { %v14085_v30 = vunpack.i.h.bf16 %v14083_v42  ;;  %v14084_v7 = vunpack.i.l.bf16 %v14083_v42  ;;  %v14110_v6 = vunpack.i.h.bf16 %v14108_v58  ;;  %v14109_v10 = vunpack.i.l.bf16 %v14108_v58  ;;  %v11853_v42 = vld [vmem:[%s16462_s4 + $0x2c0] sm:$0xff] }
 0x782   : > { %12960 = vmatprep.subr.bf16.mxu1 %v12959_v21  ;;  %11832 = vmatmul.mubr.msk.f32.gmra.mrb[8].mxu1 %vm538_vm8, %v6039_v36 }
 0x783   : > { %12522 = vmatprep.mubr.msk.f32.mxu1 %vm538_vm8, %v6038_v17  ;;  %v6442_v40 = vsel %vm903_vm9, %v14060_v4, %v14084_v7  ;;  %v6445_v3 = vsel %vm903_vm9, %v14070_v51, %v14085_v30  ;;  %v6991_v17 = vsel %vm1458_vm11, %v14109_v10, %v14110_v6 }
 0x784   : > { %v14088_v19 = vpop.permute.xlu1 %14087  ;;  %v12963_v49 = vpack.c.bf16 %v6445_v3, %v6442_v40 }
 0x785   : > { %v14090_v5 = vunpack.i.h.bf16 %v14088_v19  ;;  %v14089_v9 = vunpack.i.l.bf16 %v14088_v19 }
 0x786   : > { %12523 = vmatmul.mubr.msk.f32.vlgmr.msra.gmra.mrb[10].mxu1 %vm538_vm8, %v6039_v36 }
 0x787   : > { %12962 = vmatpush1.bf16.msra.mxu1 %v12961_v18  ;;  %6522 = vmatprep.mubr.f32.mxu1 %v14450_v1  ;;  %v6638_v44 = vsel %vm1099_vm10, %v14089_v9, %v14090_v5  ;;  %v6637_v46 = vsel %vm1099_vm10, %v14095_v33, %v14089_v9 }
 0x788   : > { %v14098_v12 = vpop.permute.xlu1 %14097  ;;  %12964 = vmatprep.subr.bf16.mxu1 %v12963_v49  ;;  %v12967_v52 = vpack.c.bf16 %v6638_v44, %v6635_v43  ;;  %v12969_v27 = vpack.c.bf16 %v6637_v46, %v6634_v55  ;;  %v11859_v44 = vld [vmem:[%s16462_s4 + $0x340] sm:$0xff] }
 0x789   : > { %v14100_v59 = vunpack.i.h.bf16 %v14098_v12  ;;  %v14099_v13 = vunpack.i.l.bf16 %v14098_v12 }
 0x78a   : > { %11837 = vmatmul.mubr.msk.f32.vlgmr.msra.gmra.mrb[6].mxu1 %vm538_vm8, %v11835_v60 }
 0x78b   : > { %12966 = vmatpush3.bf16.msra.mxu1 %v12963_v49  ;;  %6528 = vmatprep.mubr.f32.mxu1 %v14450_v1  ;;  %v6636_v50 = vsel %vm1099_vm10, %v14080_v22, %v14099_v13  ;;  %v6639_v54 = vsel %vm1099_vm10, %v14090_v5, %v14100_v59  ;;  %v11860_v59 = vld [vmem:[%s16462_s4 + $0x348] sm:$0xff] }
 0x78c   : > { %12968 = vmatprep.subr.bf16.mxu1 %v12967_v52  ;;  %v12971_v37 = vpack.c.bf16 %v6639_v54, %v6636_v50  ;;  %v14103_v20 = vpop.permute.xlu1 %14102 }
 0x78d   : > { %v14105_v0 = vunpack.i.h.bf16 %v14103_v20  ;;  %v14104_v4 = vunpack.i.l.bf16 %v14103_v20 }
 0x78e   : > { %11838 = vmatmul.mubr.msk.f32.gmra.mrb[8].mxu1 %vm538_vm8, %v11836_v53 }
 0x78f   : > { %12529 = vmatprep.mubr.msk.f32.mxu1 %vm538_vm8, %v11835_v60  ;;  %v6993_v45 = vsel %vm1458_vm11, %v14104_v4, %v14105_v0  ;;  %v12987_v38 = vpack.c.bf16 %v14105_v0, %v14110_v6  ;;  %v11865_v0 = vld [vmem:[%s16462_s4 + $0x3c0] sm:$0xff] }
 0x790   : > { %v12983_v62 = vpack.c.bf16 %v6993_v45, %v6991_v17  ;;  %v14123_v14 = vpop.permute.xlu1 %14122  ;;  %v11866_v45 = vld [vmem:[%s16462_s4 + $0x3c8] sm:$0xff] }
 0x791   : > { %v14125_v51 = vunpack.i.h.bf16 %v14123_v14  ;;  %v14124_v23 = vunpack.i.l.bf16 %v14123_v14 }
 0x792   : > { %12530 = vmatmul.mubr.msk.f32.vlgmr.msra.gmra.mrb[10].mxu1 %vm538_vm8, %v11836_v53 }
 0x793   : > { %12970 = vmatpush1.bf16.msra.mxu1 %v12969_v27  ;;  %6716 = vmatprep.mubr.f32.mxu1 %v14450_v1  ;;  %v7179_v21 = vsel %vm1648_vm12, %v14124_v23, %v14125_v51 }
 0x794   : > { %12972 = vmatprep.subr.bf16.mxu1 %v12971_v37  ;;  %v14128_v41 = vpop.permute.xlu1 %14127 }
 0x795   : > { %v14130_v7 = vunpack.i.h.bf16 %v14128_v41  ;;  %v14129_v63 = vunpack.i.l.bf16 %v14128_v41 }
 0x796   : > { %11843 = vmatmul.mubr.msk.f32.vlgmr.msra.gmra.mrb[6].mxu1 %vm538_vm8, %v11841_v57 }
 0x797   : > { %12974 = vmatpush3.bf16.msra.mxu1 %v12971_v37  ;;  %6722 = vmatprep.mubr.f32.mxu1 %v14450_v1  ;;  %v7178_v19 = vsel %vm1648_vm12, %v14129_v63, %v14124_v23 }
 0x798   : > { %12976 = vmatprep.subr.bf16.mxu1 %v12975_v8  ;;  %v14113_v8 = vpop.permute.xlu0 %14112  ;;  %v14133_v40 = vpop.permute.xlu1 %14132 }
 0x799   : > { %v14115_v56 = vunpack.i.h.bf16 %v14113_v8  ;;  %v14135_v49 = vunpack.i.h.bf16 %v14133_v40  ;;  %v14134_v18 = vunpack.i.l.bf16 %v14133_v40 }
 0x79a   : > { %11844 = vmatmul.mubr.msk.f32.gmra.mrb[8].mxu1 %vm538_vm8, %v11842_v48 }
 0x79b   : > { %12536 = vmatprep.mubr.msk.f32.mxu1 %vm538_vm8, %v11841_v57  ;;  %v6992_v16 = vsel %vm1458_vm11, %v14115_v56, %v14104_v4  ;;  %v7369_v12 = vsel %vm1838_vm13, %v14134_v18, %v14135_v49  ;;  %v11871_v56 = vld [vmem:[%s16462_s4 + $0x440] sm:$0xff] }
 0x79c   : > { %v14118_v2 = vpop.permute.xlu0 %14117  ;;  %v14153_v39 = vpop.permute.xlu1 %14152 }
 0x79d   : > { %v14120_v32 = vunpack.i.h.bf16 %v14118_v2  ;;  %v14119_v36 = vunpack.i.l.bf16 %v14118_v2  ;;  %v14155_v54 = vunpack.i.h.bf16 %v14153_v39  ;;  %v14154_v55 = vunpack.i.l.bf16 %v14153_v39 }
 0x79e   : > { %12537 = vmatmul.mubr.msk.f32.vlgmr.msra.gmra.mrb[10].mxu1 %vm538_vm8, %v11842_v48 }
 0x79f   : > { %12978 = vmatpush1.bf16.msra.mxu1 %v12977_v47  ;;  %6882 = vmatprep.mubr.f32.mxu1 %v14450_v1  ;;  %v14114_v47 = vunpack.i.l.bf16 %v14113_v8  ;;  %v7181_v30 = vsel %vm1648_vm12, %v14119_v36, %v14120_v32  ;;  %v7180_v61 = vsel %vm1648_vm12, %v14130_v7, %v14119_v36  ;;  %v12995_v43 = vpack.c.bf16 %v14120_v32, %v14125_v51 }
 0x7a0   : > { %12980 = vmatprep.subr.bf16.mxu1 %v12979_v11  ;;  %v12991_v22 = vpack.c.bf16 %v7181_v30, %v7179_v21  ;;  %v14138_v3 = vpop.permute.xlu0 %14137  ;;  %v12993_v60 = vpack.c.bf16 %v7180_v61, %v7178_v19  ;;  %v14158_v58 = vpop.permute.xlu1 %14157  ;;  %v7555_v4 = vsel %vm304_vm2, %v14154_v55, %v14155_v54 }
 0x7a1   : > { %v6990_v28 = vsel %vm1458_vm11, %v14114_v47, %v14109_v10  ;;  %v14140_v5 = vunpack.i.h.bf16 %v14138_v3  ;;  %v14139_v9 = vunpack.i.l.bf16 %v14138_v3  ;;  %v14160_v10 = vunpack.i.h.bf16 %v14158_v58  ;;  %v11872_v47 = vld [vmem:[%s16462_s4 + $0x448] sm:$0xff] }
 0x7a2   : > { %11849 = vmatmul.mubr.msk.f32.vlgmr.msra.gmra.mrb[6].mxu1 %vm538_vm8, %v11847_v34  ;;  %v12985_v31 = vpack.c.bf16 %v6992_v16, %v6990_v28 }
 0x7a3   : > { %12982 = vmatpush3.bf16.msra.mxu1 %v12979_v11  ;;  %6888 = vmatprep.mubr.f32.mxu1 %v14450_v1  ;;  %v7367_v24 = vsel %vm1838_vm13, %v14139_v9, %v14140_v5  ;;  %v13003_v20 = vpack.c.bf16 %v14135_v49, %v14140_v5  ;;  %v14159_v11 = vunpack.i.l.bf16 %v14158_v58 }
 0x7a4   : > { %12984 = vmatprep.subr.bf16.mxu1 %v12983_v62  ;;  %v14143_v52 = vpop.permute.xlu0 %14142  ;;  %v12999_v33 = vpack.c.bf16 %v7369_v12, %v7367_v24  ;;  %v7760_v12 = vld [vmem:[#allocation2] sm:$0xff] }
 0x7a5   : > { %v14145_v13 = vunpack.i.h.bf16 %v14143_v52  ;;  %v14144_v53 = vunpack.i.l.bf16 %v14143_v52  ;;  %v7554_v17 = vsel %vm304_vm2, %v14159_v11, %v14154_v55  ;;  %v7764_v52 = vld [vmem:[#allocation2 + $0x20] sm:$0xff]  ;;  %v15793_v11 = vld [vmem:[%s16462_s4 + $0xd8] sm:$0xff] }
 0x7a6   : > { %11850 = vmatmul.mubr.msk.f32.gmra.mrb[8].mxu1 %vm538_vm8, %v11848_v15  ;;  %v14236_v24 = vpack.i.bf16 %v7764_v52, %v7760_v12  ;;  %v15877_v12 = vld [vmem:[%s16462_s4 + $0x150] sm:$0xff] }
 0x7a7   : > { %12543 = vmatprep.mubr.msk.f32.mxu1 %vm538_vm8, %v11847_v34  ;;  %v7368_v46 = vsel %vm1838_vm13, %v14145_v13, %v14134_v18  ;;  %v7366_v27 = vsel %vm1838_vm13, %v14144_v53, %v14139_v9  ;;  %v15721_v18 = vld [vmem:[%s16462_s4 + $0xd0] sm:$0xff] }
 0x7a8   : > { %v14148_v50 = vpop.permute.xlu0 %14147  ;;  %v13001_v37 = vpack.c.bf16 %v7368_v46, %v7366_v27 }
 0x7a9   : > { %v14150_v57 = vunpack.i.h.bf16 %v14148_v50  ;;  %v14149_v48 = vunpack.i.l.bf16 %v14148_v50 }
 0x7aa   : > { %12544 = vmatmul.mubr.msk.f32.vlgmr.msra.gmra.mrb[10].mxu1 %vm538_vm8, %v11848_v15 }
 0x7ab   : > { %12986 = vmatpush1.bf16.msra.mxu1 %v12985_v31  ;;  %7070 = vmatprep.mubr.f32.mxu1 %v14450_v1  ;;  %v7557_v6 = vsel %vm304_vm2, %v14149_v48, %v14150_v57  ;;  %v7556_v8 = vsel %vm304_vm2, %v14160_v10, %v14149_v48  ;;  %v13011_v15 = vpack.c.bf16 %v14150_v57, %v14155_v54 }
 0x7ac   : > { %12988 = vmatprep.subr.bf16.mxu1 %v12987_v38  ;;  %v13007_v34 = vpack.c.bf16 %v7557_v6, %v7555_v4  ;;  %v13009_v62 = vpack.c.bf16 %v7556_v8, %v7554_v17  ;;  %v7731_v14 = vpop.permute.xlu0 %7730 }
 0x7ae   : > { %11855 = vmatmul.mubr.msk.f32.vlgmr.msra.gmra.mrb[6].mxu1 %vm538_vm8, %v11853_v42 }
 0x7af   : > { %12990 = vmatpush3.bf16.msra.mxu1 %v12987_v38  ;;  %7076 = vmatprep.mubr.f32.mxu1 %v14450_v1 }
 0x7b0   : > { %12992 = vmatprep.subr.bf16.mxu1 %v12991_v22 }
 0x7b1   : > { %v7736_v31 = vpop.permute.xlu1 %7735 }
 0x7b2   : > { %11856 = vmatmul.mubr.msk.f32.gmra.mrb[8].mxu1 %vm538_vm8, %v11854_v35 }
 0x7b3   : > { %12550 = vmatprep.mubr.msk.f32.mxu1 %vm538_vm8, %v11853_v42 }
 0x7b6   : > { %12551 = vmatmul.mubr.msk.f32.vlgmr.msra.gmra.mrb[10].mxu1 %vm538_vm8, %v11854_v35 }
 0x7b7   : > { %12994 = vmatpush1.bf16.msra.mxu1 %v12993_v60  ;;  %7258 = vmatprep.mubr.f32.mxu1 %v14450_v1 }
 0x7b8   : > { %12996 = vmatprep.subr.bf16.mxu1 %v12995_v43 }
 0x7ba   : > { %11861 = vmatmul.mubr.msk.f32.vlgmr.msra.gmra.mrb[6].mxu1 %vm538_vm8, %v11859_v44 }
 0x7bb   : > { %12998 = vmatpush3.bf16.msra.mxu1 %v12995_v43  ;;  %7264 = vmatprep.mubr.f32.mxu1 %v14450_v1 }
 0x7bc   : > { %13000 = vmatprep.subr.bf16.mxu1 %v12999_v33  ;;  %v7757_v33 = vld [vmem:[%s16463_s5 + $0x58] sm:$0xff] }
 0x7be   : > { %11862 = vmatmul.mubr.msk.f32.gmra.mrb[8].mxu1 %vm538_vm8, %v11860_v59 }
 0x7bf   : > { %12557 = vmatprep.mubr.msk.f32.mxu1 %vm538_vm8, %v11859_v44 }
 0x7c2   : > { %12558 = vmatmul.mubr.msk.f32.vlgmr.msra.gmra.mrb[10].mxu1 %vm538_vm8, %v11860_v59  ;;  %v7756_v59 = vld [vmem:[%s16463_s5 + $0x50] sm:$0xff] }
 0x7c3   : > { %13002 = vmatpush1.bf16.msra.mxu1 %v13001_v37  ;;  %7446 = vmatprep.mubr.f32.mxu1 %v14450_v1 }
 0x7c4   : > { %13004 = vmatprep.subr.bf16.mxu1 %v13003_v20 }
 0x7c6   : > { %11867 = vmatmul.mubr.msk.f32.vlgmr.msra.gmra.mrb[6].mxu1 %vm538_vm8, %v11865_v0 }
 0x7c7   : > { %13006 = vmatpush3.bf16.msra.mxu1 %v13003_v20  ;;  %7452 = vmatprep.mubr.f32.mxu1 %v14450_v1 }
 0x7c8   : > { %13008 = vmatprep.subr.bf16.mxu1 %v13007_v34 }
 0x7ca   : > { %11868 = vmatmul.mubr.msk.f32.gmra.mrb[8].mxu1 %vm538_vm8, %v11866_v45 }
 0x7cb   : > { %12564 = vmatprep.mubr.msk.f32.mxu1 %vm538_vm8, %v11865_v0 }
 0x7ce   : > { %12565 = vmatmul.mubr.msk.f32.vlgmr.msra.gmra.mrb[10].mxu1 %vm538_vm8, %v11866_v45 }
 0x7cf   : > { %13010 = vmatpush1.bf16.msra.mxu1 %v13009_v62  ;;  %7634 = vmatprep.mubr.f32.mxu1 %v14450_v1 }
 0x7d0   : > { %13012 = vmatprep.subr.bf16.mxu1 %v13011_v15 }
 0x7d2   : > { %11873 = vmatmul.mubr.msk.f32.vlgmr.msra.gmra.mrb[6].mxu1 %vm538_vm8, %v11871_v56 }
 0x7d3   : > { %13014 = vmatpush3.bf16.msra.mxu1 %v13011_v15  ;;  %7640 = vmatprep.mubr.f32.mxu1 %v14450_v1  ;;  %v15805_v15 = vld [vmem:[%s16462_s4 + $0xe0] sm:$0xff] }
 0x7d6   : > { %11874 = vmatmul.mubr.msk.f32.gmra.mrb[8].mxu1 %vm538_vm8, %v11872_v47 }
 0x7d7   : > { %12571 = vmatprep.mubr.msk.f32.mxu1 %vm538_vm8, %v11871_v56 }
 0x7da   : > { %12572 = vmatmul.mubr.msk.f32.vlgmr.msra.gmra.mrb[10].mxu1 %vm538_vm8, %v11872_v47 }
 0x7db   : > { %12578 = vmatprep.mubr.msk.f32.mxu1 %vm538_vm8, %v15721_v18 }
 0x8a5   : > { %v7636_v16 = vpop.f32.mrb[6].mxu1 }
 0x8a6   : > { %v7738_v2 = vadd.f32 %v7731_v14, %v7636_v16  ;;  %v7638_v51 = vpop.f32.mrb[7].mxu1 }
 0x8a7   : > { %v7739_v23 = vadd.f32 %v7731_v14, %v7638_v51 }
 0x8a8   : > { %v15697_v28 = vmul.f32 %v7738_v2, %v14548_v26  ;;  %v15821_v2 = vld [vmem:[%s16462_s4 + $0xe8] sm:$0xff] }
 0x8a9   : > { %v15700_v32 = vmul.f32 %v7739_v23, %v14550_v29  ;;  %v7642_v36 = vpop.f32.mrb[8].mxu1 }
 0x8aa   : > { %v7741_v38 = vadd.f32 %v7736_v31, %v7642_v36  ;;  %v7644_v41 = vpop.f32.mrb[9].mxu1 }
 0x8ab   : > { %v7742_v42 = vadd.f32 %v7736_v31, %v7644_v41  ;;  %v15833_v41 = vld [vmem:[%s16462_s4 + $0x50] sm:$0xff] }
 0x8ac   : > { %v15703_v21 = vmul.f32 %v7741_v38, %v14548_v26 }
 0x8ad   : > { %v15706_v30 = vmul.f32 %v7742_v42, %v14550_v29  ;;  %v12573_v7 = vpop.f32.mrb[10].mxu1 }
 0x8ae   : > { %v7743_v63 = vadd.f32 %v12573_v7, %v7736_v31  ;;  %v7713_v22 = vpop.f32.mrb[11].mxu1  ;;  %v14221_v35 = vpack.i.bf16 %v15703_v21, %v15697_v28  ;;  %v13049_v40 = vpack.c.bf16 %v15703_v21, %v15697_v28 }
 0x8af   : > { %v7740_v3 = vadd.f32 %v7731_v14, %v7713_v22  ;;  %v13047_v61 = vpack.c.bf16 %v15706_v30, %v15700_v32 }
 0x8b0   : > { %v7749_v19 = vmul.f32 %v7743_v63, %v14546_v25 }
 0x8b1   : > { %v7746_v49 = vmul.f32 %v7740_v3, %v14546_v25 }
 0x8b2   : > { %7755 = vst.msk [vmem:[#allocation2 + $0x38] sm:$0xff] %vm481_vm5, %v7749_v19 }
 0x8b3   : > { %7752 = vst.msk [vmem:[#allocation2 + $0x18] sm:$0xff] %vm481_vm5, %v7746_v49 }
 0x8b9   : > { %v7767_v5 = vld [vmem:[#allocation2 + $0x38] sm:$0xff] }
 0x8ba   : > { %v14166_v9 = vpack.i.bf16 %v7767_v5, %v15706_v30  ;;  %v7763_v60 = vld [vmem:[#allocation2 + $0x18] sm:$0xff] }
 0x8bb   : > { %v14161_v43 = vpack.i.bf16 %v7763_v60, %v15700_v32  ;;  %v15727_v44 = vpack.c.bf16 %v7767_v5, %v7763_v60  ;;  %v15859_v5 = vld [vmem:[%s16462_s4 + $0x60] sm:$0xff]  ;;  %v15870_v60 = vld [vmem:[%s16462_s4 + $0x68] sm:$0xff] }
 0x8bc   : > { %14167 = vrot.lane.b32.xlu1 %v14166_v9, %s14455_s16 }
 0x8bd   : > { %14162 = vrot.lane.b32.xlu0 %v14161_v43, %s14455_s16 }
 0x8c0   : > { %14177 = vrot.lane.b32.xlu1 %v14166_v9, %s14453_s12 }
 0x8c1   : > { %14172 = vrot.lane.b32.xlu0 %v14161_v43, %s14453_s12 }
 0x8c4   : > { %14187 = vrot.lane.b32.xlu1 %v14166_v9, %s14454_s15 }
 0x8c5   : > { %14182 = vrot.lane.b32.xlu0 %v14161_v43, %s14454_s15 }
 0x8c8   : > { %14197 = vrot.lane.b32.xlu1 %v14166_v9, %s14456_s17 }
 0x8c9   : > { %14192 = vrot.lane.b32.xlu0 %v14161_v43, %s14456_s17 }
 0x8cc   : > { %14202 = vrot.lane.b32.xlu1 %v14166_v9, %s14457_s18 }
 0x8cd   : > { %14207 = vrot.lane.b32.xlu0 %v14161_v43, %s14457_s18 }
 0x8d0   : > { %14222 = vrot.lane.b32.xlu1 %v14221_v35, %s14458_s19 }
 0x8d1   : > { %14212 = vrot.lane.b32.xlu0 %v14221_v35, %s14457_s18 }
 0x8d4   : > { %14232 = vrot.lane.b32.xlu1 %v14161_v43, %s14458_s19 }
 0x8d5   : > { %14217 = vrot.lane.b32.xlu0 %v14166_v9, %s14458_s19 }
 0x8d8   : > { %14237 = vrot.lane.b32.xlu1 %v14236_v24, %s14455_s16 }
 0x8d9   : > { %14227 = vrot.lane.b32.xlu0 %v14221_v35, %s14455_s16 }
 0x8dc   : > { %14247 = vrot.lane.b32.xlu1 %v14236_v24, %s14453_s12 }
 0x8dd   : > { %14242 = vrot.lane.b32.xlu0 %v14221_v35, %s14453_s12 }
 0x8e0   : > { %14252 = vrot.lane.b32.xlu1 %v14166_v9, %s14459_s20 }
 0x8e1   : > { %14257 = vrot.lane.b32.xlu0 %v14161_v43, %s14459_s20 }
 0x8e4   : > { %14267 = vrot.lane.b32.xlu1 %v14221_v35, %s14454_s15 }
 0x8e5   : > { %14262 = vrot.lane.b32.xlu0 %v14221_v35, %s14459_s20 }
 0x8e8   : > { %14282 = vrot.lane.b32.xlu1 %v14221_v35, %s14451_s29 }
 0x8e9   : > { %14272 = vrot.lane.b32.xlu0 %v14236_v24, %s14454_s15 }
 0x8ec   : > { %14292 = vrot.lane.b32.xlu1 %v14161_v43, %s14451_s29 }
 0x8ed   : > { %14277 = vrot.lane.b32.xlu0 %v14166_v9, %s14451_s29 }
 0x8f0   : > { %14297 = vrot.lane.b32.xlu1 %v14236_v24, %s14456_s17  ;;  %v15888_v24 = vld [vmem:[%s16462_s4 + $0x158] sm:$0xff] }
 0x8f1   : > { %14287 = vrot.lane.b32.xlu0 %v14221_v35, %s14456_s17  ;;  %v15849_v35 = vld [vmem:[%s16462_s4 + $0x58] sm:$0xff] }
 0x8f4   : > { %9777 = vperm.xlu1 %13599, %v7757_v33  }
 0x8f5   : > { %9772 = vperm.xlu0 %13600, %v7756_v59   ;;  %v15895_v59 = vld [vmem:[%s16462_s4 + $0x160] sm:$0xff] }
 0x92e   : > { %v15763_v13 = vpop.permute.xlu1 %14167 }
 0x92f   : > { %v14170_v53 = vunpack.i.h.bf16 %v15763_v13  ;;  %v14169_v39 = vunpack.i.l.bf16 %v15763_v13  ;;  %v15767_v46 = vpop.permute.xlu0 %14162 }
 0x930   : > { %v14165_v50 = vunpack.i.h.bf16 %v15767_v46  ;;  %v14164_v54 = vunpack.i.l.bf16 %v15767_v46  ;;  %v15934_v46 = vld [vmem:[%s16462_s4 + $0x1e0] sm:$0xff] }
 0x931   : > { %v7805_v55 = vsel %vm525_vm6, %v14169_v39, %v14170_v53 }
 0x932   : > { %v15774_v27 = vpop.permute.xlu1 %14177  ;;  %v7802_v37 = vsel %vm525_vm6, %v14164_v54, %v14165_v50  ;;  %v15904_v50 = vld [vmem:[%s16462_s4 + $0x168] sm:$0xff] }
 0x933   : > { %v14180_v57 = vunpack.i.h.bf16 %v15774_v27  ;;  %v14179_v48 = vunpack.i.l.bf16 %v15774_v27  ;;  %v15781_v20 = vpop.permute.xlu0 %14172  ;;  %v13019_v58 = vpack.c.bf16 %v7805_v55, %v7802_v37 }
 0x934   : > { %v14175_v0 = vunpack.i.h.bf16 %v15781_v20  ;;  %v14174_v4 = vunpack.i.l.bf16 %v15781_v20  ;;  %v11921_v20 = vld [vmem:[%s16462_s4 + $0x250] sm:$0xff] }
 0x935   : > { %13020 = vmatprep.subr.bf16.mxu1 %v13019_v58  ;;  %v8019_v6 = vsel %vm713_vm7, %v14179_v48, %v14180_v57 }
 0x936   : > { %v15788_v10 = vpop.permute.xlu1 %14187  ;;  %13022 = vmatpush3.bf16.msra.mxu1 %v13019_v58  ;;  %v8016_v34 = vsel %vm713_vm7, %v14174_v4, %v14175_v0  ;;  %v15912_v58 = vld [vmem:[%s16462_s4 + $0x1d0] sm:$0xff] }
 0x937   : > { %v14190_v45 = vunpack.i.h.bf16 %v15788_v10  ;;  %v14189_v8 = vunpack.i.l.bf16 %v15788_v10  ;;  %v15800_v17 = vpop.permute.xlu0 %14182  ;;  %v13027_v62 = vpack.c.bf16 %v8019_v6, %v8016_v34  ;;  %v11923_v10 = vld [vmem:[%s16462_s4 + $0x260] sm:$0xff] }
 0x938   : > { %v14185_v56 = vunpack.i.h.bf16 %v15800_v17  ;;  %v14184_v47 = vunpack.i.l.bf16 %v15800_v17 }
 0x939   : > { %12579 = vmatmul.mubr.msk.f32.vlgmr.msra.gmra.mrb[12].mxu1 %vm538_vm8, %v15793_v11  ;;  %13028 = vmatprep.subr.bf16.mxu1 %v13027_v62  ;;  %v8237_v14 = vsel %vm903_vm9, %v14189_v8, %v14190_v45 }
 0x93a   : > { %v15814_v16 = vpop.permute.xlu1 %14197  ;;  %13030 = vmatpush3.bf16.msra.mxu1 %v13027_v62  ;;  %12581 = vmatprep.mubr.msk.f32.mxu1 %vm538_vm8, %v15805_v15  ;;  %v8234_v51 = vsel %vm903_vm9, %v14184_v47, %v14185_v56 }
 0x93b   : > { %v14200_v23 = vunpack.i.h.bf16 %v15814_v16  ;;  %v14199_v31 = vunpack.i.l.bf16 %v15814_v16  ;;  %v15828_v36 = vpop.permute.xlu0 %14192  ;;  %v13035_v38 = vpack.c.bf16 %v8237_v14, %v8234_v51 }
 0x93c   : > { %v14195_v42 = vunpack.i.h.bf16 %v15828_v36  ;;  %v14194_v7 = vunpack.i.l.bf16 %v15828_v36 }
 0x93d   : > { %12582 = vmatmul.mubr.msk.f32.gmra.mrb[14].mxu1 %vm538_vm8, %v15821_v2  ;;  %13036 = vmatprep.subr.bf16.mxu1 %v13035_v38  ;;  %v8467_v63 = vsel %vm1099_vm10, %v14199_v31, %v14200_v23 }
 0x93e   : > { %v15842_v22 = vpop.permute.xlu1 %14202  ;;  %12588 = vmatprep.mubr.msk.f32.mxu1 %vm538_vm8, %v15833_v41  ;;  %v8464_v3 = vsel %vm1099_vm10, %v14194_v7, %v14195_v42 }
 0x93f   : > { %v15854_v19 = vpop.permute.xlu0 %14207  ;;  %v13043_v49 = vpack.c.bf16 %v8467_v63, %v8464_v3  ;;  %v14205_v13 = vunpack.i.h.bf16 %v15842_v22 }
 0x940   : > { %v14209_v3 = vunpack.i.l.bf16 %v15854_v19 }
 0x941   : > { %12589 = vmatmul.mubr.msk.f32.vlgmr.msra.gmra.mrb[12].mxu1 %vm538_vm8, %v15849_v35 }
 0x942   : > { %13038 = vmatpush3.bf16.msra.mxu1 %v13035_v38  ;;  %v15863_v9 = vpop.permute.xlu1 %14222  ;;  %12591 = vmatprep.mubr.msk.f32.mxu1 %vm538_vm8, %v15859_v5 }
 0x943   : > { %13044 = vmatprep.subr.bf16.mxu1 %v13043_v49  ;;  %v15872_v43 = vpop.permute.xlu0 %14212 }
 0x945   : > { %12592 = vmatmul.mubr.msk.f32.gmra.mrb[14].mxu1 %vm538_vm8, %v15870_v60 }
 0x946   : > { %v15881_v52 = vpop.permute.xlu1 %14232  ;;  %12598 = vmatprep.mubr.msk.f32.mxu1 %vm538_vm8, %v15877_v12 }
 0x947   : > { %v15890_v33 = vpop.permute.xlu0 %14217  ;;  %v14235_v36 = vunpack.i.h.bf16 %v15881_v52 }
 0x948   : > { %v14220_v16 = vunpack.i.h.bf16 %v15890_v33 }
 0x949   : > { %12599 = vmatmul.mubr.msk.f32.vlgmr.msra.gmra.mrb[12].mxu1 %vm538_vm8, %v15888_v24 }
 0x94a   : > { %13046 = vmatpush3.bf16.msra.mxu1 %v13043_v49  ;;  %v14238_v53 = vpop.permute.xlu1 %14237  ;;  %12601 = vmatprep.mubr.msk.f32.mxu1 %vm538_vm8, %v15895_v59 }
 0x94b   : > { %v14240_v55 = vunpack.i.h.bf16 %v14238_v53  ;;  %v14239_v37 = vunpack.i.l.bf16 %v14238_v53  ;;  %13048 = vmatprep.subr.bf16.mxu1 %v13047_v61  ;;  %v14228_v57 = vpop.permute.xlu0 %14227  ;;  %v15929_v61 = vld [vmem:[%s16462_s4 + $0x1d8] sm:$0xff] }
 0x94c   : > { %v14230_v0 = vunpack.i.h.bf16 %v14228_v57  ;;  %v14229_v6 = vunpack.i.l.bf16 %v14228_v57  ;;  %v15955_v57 = vld [vmem:[%s16462_s4 + $0x1e8] sm:$0xff] }
 0x94d   : > { %12602 = vmatmul.mubr.msk.f32.gmra.mrb[14].mxu1 %vm538_vm8, %v15904_v50 }
 0x94e   : > { %v7803_v34 = vsel %vm525_vm6, %v14240_v55, %v14230_v0  ;;  %v7800_v45 = vsel %vm525_vm6, %v14239_v37, %v14229_v6  ;;  %v14248_v62 = vpop.permute.xlu1 %14247  ;;  %12608 = vmatprep.mubr.msk.f32.mxu1 %vm538_vm8, %v15912_v58  ;;  %v7801_v32 = vsel %vm525_vm6, %v14229_v6, %v14164_v54  ;;  %v7804_v30 = vsel %vm525_vm6, %v14230_v0, %v14169_v39 }
 0x94f   : > { %v13017_v56 = vpack.c.bf16 %v7803_v34, %v7800_v45  ;;  %v14250_v14 = vunpack.i.h.bf16 %v14248_v62  ;;  %v14249_v51 = vunpack.i.l.bf16 %v14248_v62  ;;  %v14243_v23 = vpop.permute.xlu0 %14242  ;;  %v13015_v38 = vpack.c.bf16 %v7804_v30, %v7801_v32 }
 0x950   : > { %v14245_v42 = vunpack.i.h.bf16 %v14243_v23  ;;  %v14244_v63 = vunpack.i.l.bf16 %v14243_v23  ;;  %v14204_v39 = vunpack.i.l.bf16 %v15842_v22  ;;  %v14210_v54 = vunpack.i.h.bf16 %v15854_v19  ;;  %v11933_v19 = vld [vmem:[%s16462_s4 + $0x2d0] sm:$0xff] }
 0x951   : > { %13016 = vmatprep.subr.bf16.mxu0 %v13015_v38  ;;  %12609 = vmatmul.mubr.msk.f32.vlgmr.msra.gmra.mrb[12].mxu1 %vm538_vm8, %v15929_v61  ;;  %v11924_v38 = vld [vmem:[%s16462_s4 + $0x268] sm:$0xff] }
 0x952   : > { %v8017_v49 = vsel %vm713_vm7, %v14250_v14, %v14245_v42  ;;  %v8014_v53 = vsel %vm713_vm7, %v14249_v51, %v14244_v63  ;;  %13050 = vmatpush1.bf16.msra.mxu1 %v13049_v40  ;;  %v15947_v55 = vpop.permute.xlu1 %14252  ;;  %13018 = vmatpush1.bf16.msra.mxu0 %v13017_v56  ;;  %v8015_v37 = vsel %vm713_vm7, %v14244_v63, %v14174_v4  ;;  %v14215_v14 = vunpack.i.h.bf16 %v15872_v43 }
 0x953   : > { %v13025_v0 = vpack.c.bf16 %v8017_v49, %v8014_v53  ;;  %13052 = vmatprep.subr.bf16.mxu1 %v15727_v44  ;;  %v15958_v6 = vpop.permute.xlu0 %14257  ;;  %12611 = vmatprep.mubr.msk.f32.mxu1 %vm538_vm8, %v15934_v46  ;;  %v8018_v28 = vsel %vm713_vm7, %v14245_v42, %v14179_v48  ;;  %v8891_v27 = vsel %vm1458_vm11, %v14209_v3, %v14210_v54  ;;  %v14214_v51 = vunpack.i.l.bf16 %v15872_v43 }
 0x954   : > { %v13023_v21 = vpack.c.bf16 %v8018_v28, %v8015_v37 }
 0x955   : > { %11881 = vmatmul.mubr.msk.f32.vlgmr.msra.gmra.mrb[22].mxu0 %vm538_vm8, %v15721_v18  ;;  %12612 = vmatmul.mubr.msk.f32.gmra.mrb[14].mxu1 %vm538_vm8, %v15955_v57  ;;  %v8893_v18 = vsel %vm1458_vm11, %v14204_v39, %v14205_v13  ;;  %v8890_v37 = vsel %vm1458_vm11, %v14214_v51, %v14209_v3 }
 0x956   : > { %13024 = vmatprep.subr.bf16.mxu0 %v13023_v21  ;;  %v14268_v40 = vpop.permute.xlu1 %14267  ;;  %7894 = vmatprep.mubr.f32.mxu0 %v14450_v1  ;;  %v13055_v45 = vpack.c.bf16 %v8893_v18, %v8891_v27  ;;  %v14225_v27 = vunpack.i.h.bf16 %v15863_v9  ;;  %v14224_v18 = vunpack.i.l.bf16 %v15863_v9  ;;  %v14255_v9 = vunpack.i.h.bf16 %v15947_v55 }
 0x957   : > { %v14270_v48 = vunpack.i.h.bf16 %v14268_v40  ;;  %v14269_v4 = vunpack.i.l.bf16 %v14268_v40  ;;  %13026 = vmatpush1.bf16.msra.mxu0 %v13025_v0  ;;  %v15983_v34 = vpop.permute.xlu0 %14262  ;;  %8752 = vmatprep.mubr.f32.mxu1 %v14450_v1  ;;  %v11934_v40 = vld [vmem:[%s16462_s4 + $0x2d8] sm:$0xff] }
 0x959   : > { %11882 = vmatmul.mubr.msk.f32.gmra.mrb[24].mxu0 %vm538_vm8, %v15793_v11  ;;  %11925 = vmatmul.mubr.msk.f32.vlgmr.msra.gmra.mrb[16].mxu1 %vm538_vm8, %v11921_v20  ;;  %v8233_v62 = vsel %vm903_vm9, %v14269_v4, %v14184_v47  ;;  %v8236_v32 = vsel %vm903_vm9, %v14270_v48, %v14189_v8  ;;  %v11922_v11 = vld [vmem:[%s16462_s4 + $0x258] sm:$0xff] }
 0x95a   : > { %13054 = vmatpush3.bf16.msra.mxu1 %v15727_v44  ;;  %7900 = vmatprep.mubr.f32.mxu0 %v14450_v1  ;;  %v13031_v30 = vpack.c.bf16 %v8236_v32, %v8233_v62  ;;  %v16004_v44 = vpop.permute.xlu1 %14282  ;;  %v14254_v62 = vunpack.i.l.bf16 %v15947_v55  ;;  %v14260_v32 = vunpack.i.h.bf16 %v15958_v6 }
 0x95b   : > { %13056 = vmatprep.subr.bf16.mxu1 %v13055_v45  ;;  %v14273_v56 = vpop.permute.xlu0 %14272  ;;  %8758 = vmatprep.mubr.f32.mxu1 %v14450_v1  ;;  %v13067_v45 = vpack.c.bf16 %v14220_v16, %v14235_v36 }
 0x95c   : > { %13032 = vmatprep.subr.bf16.mxu0 %v13031_v30  ;;  %v14275_v17 = vunpack.i.h.bf16 %v14273_v56  ;;  %v14274_v47 = vunpack.i.l.bf16 %v14273_v56  ;;  %v14259_v30 = vunpack.i.l.bf16 %v15958_v6  ;;  %v9341_v55 = vsel %vm1838_vm13, %v14254_v62, %v14255_v9 }
 0x95d   : > { %11883 = vmatmul.mubr.msk.f32.gmra.mrb[26].mxu0 %vm538_vm8, %v15805_v15  ;;  %11926 = vmatmul.mubr.msk.f32.gmra.mrb[18].mxu1 %vm538_vm8, %v11922_v11  ;;  %v14264_v56 = vunpack.i.l.bf16 %v15983_v34 }
 0x95e   : > { %7906 = vmatprep.mubr.f32.mxu0 %v14450_v1  ;;  %8764 = vmatprep.mubr.f32.mxu1 %v14450_v1  ;;  %v8235_v15 = vsel %vm903_vm9, %v14275_v17, %v14270_v48  ;;  %v8232_v23 = vsel %vm903_vm9, %v14274_v47, %v14269_v4  ;;  %v16025_v43 = vpop.permute.xlu1 %14292 }
 0x95f   : > { %v16011_v8 = vpop.permute.xlu0 %14277  ;;  %v13033_v63 = vpack.c.bf16 %v8235_v15, %v8232_v23  ;;  %v9338_v47 = vsel %vm1838_vm13, %v14264_v56, %v14259_v30  ;;  %v11957_v23 = vld [vmem:[%s16462_s4 + $0x3d0] sm:$0xff] }
 0x960   : > { %v14280_v51 = vunpack.i.h.bf16 %v16011_v8  ;;  %v14279_v15 = vunpack.i.l.bf16 %v16011_v8  ;;  %v11958_v8 = vld [vmem:[%s16462_s4 + $0x3d8] sm:$0xff] }
 0x961   : > { %11884 = vmatmul.mubr.msk.f32.gmra.mrb[28].mxu0 %vm538_vm8, %v15821_v2  ;;  %11927 = vmatmul.mubr.msk.f32.gmra.mrb[20].mxu1 %vm538_vm8, %v11923_v10  ;;  %v8892_v2 = vsel %vm1458_vm11, %v14215_v14, %v14204_v39  ;;  %v14294_v14 = vunpack.i.l.bf16 %v16025_v43 }
 0x962   : > { %8102 = vmatprep.mubr.f32.mxu0 %v14450_v1  ;;  %8770 = vmatprep.mubr.f32.mxu1 %v14450_v1  ;;  %v13057_v28 = vpack.c.bf16 %v8892_v2, %v8890_v37  ;;  %v14298_v21 = vpop.permute.xlu1 %14297  ;;  %v14284_v2 = vunpack.i.l.bf16 %v16004_v44 }
 0x963   : > { %v14288_v42 = vpop.permute.xlu0 %14287  ;;  %v14300_v22 = vunpack.i.h.bf16 %v14298_v21 }
 0x964   : > { %v14290_v49 = vunpack.i.h.bf16 %v14288_v42  ;;  %v14289_v53 = vunpack.i.l.bf16 %v14288_v42  ;;  %v9565_v42 = vsel %vm304_vm2, %v14279_v15, %v14280_v51  ;;  %v9562_v37 = vsel %vm304_vm2, %v14284_v2, %v14294_v14  ;;  %v7759_v2 = vld [vmem:[%s16463_s5 + $0x68] sm:$0xff] }
 0x965   : > { %11889 = vmatmul.mubr.msk.f32.vlgmr.msra.gmra.mrb[22].mxu0 %vm538_vm8, %v15833_v41  ;;  %11928 = vmatmul.mubr.msk.f32.gmra.mrb[22].mxu1 %vm538_vm8, %v11924_v38  ;;  %v13059_v41 = vpack.c.bf16 %v14205_v13, %v14210_v54 }
 0x966   : > { %13034 = vmatpush1.bf16.msra.mxu0 %v13033_v63  ;;  %8108 = vmatprep.mubr.f32.mxu0 %v14450_v1  ;;  %v8463_v0 = vsel %vm1099_vm10, %v14289_v53, %v14194_v7  ;;  %v8466_v39 = vsel %vm1099_vm10, %v14290_v49, %v14199_v31  ;;  %v14234_v7 = vunpack.i.l.bf16 %v15881_v52  ;;  %v14219_v31 = vunpack.i.l.bf16 %v15890_v33 }
 0x967   : > { %12618 = vmatprep.mubr.msk.f32.mxu1 %vm538_vm8, %v11921_v20  ;;  %v13039_v3 = vpack.c.bf16 %v8466_v39, %v8463_v0  ;;  %v8465_v13 = vsel %vm1099_vm10, %v14300_v22, %v14290_v49  ;;  %v11960_v49 = vld [vmem:[%s16462_s4 + $0x3e8] sm:$0xff] }
 0x968   : > { %v9115_v52 = vsel %vm1648_vm12, %v14234_v7, %v14235_v36  ;;  %v9117_v33 = vsel %vm1648_vm12, %v14219_v31, %v14220_v16  ;;  %v9114_v48 = vsel %vm1648_vm12, %v14224_v18, %v14234_v7  ;;  %v9116_v4 = vsel %vm1648_vm12, %v14225_v27, %v14219_v31  ;;  %v11972_v36 = vld [vmem:[%s16462_s4 + $0x468] sm:$0xff] }
 0x969   : > { %11890 = vmatmul.mubr.msk.f32.gmra.mrb[24].mxu0 %vm538_vm8, %v15849_v35  ;;  %12619 = vmatmul.mubr.msk.f32.vlgmr.msra.gmra.mrb[12].mxu1 %vm538_vm8, %v11922_v11  ;;  %v14299_v35 = vunpack.i.l.bf16 %v14298_v21  ;;  %v14265_v11 = vunpack.i.h.bf16 %v15983_v34 }
 0x96a   : > { %13040 = vmatprep.subr.bf16.mxu0 %v13039_v3  ;;  %13058 = vmatpush1.bf16.msra.mxu1 %v13057_v28  ;;  %v11970_v3 = vld [vmem:[%s16462_s4 + $0x458] sm:$0xff] }
 0x96b   : > { %13060 = vmatprep.subr.bf16.mxu1 %v13059_v41  ;;  %8114 = vmatprep.mubr.f32.mxu0 %v14450_v1  ;;  %v8462_v54 = vsel %vm1099_vm10, %v14299_v35, %v14289_v53  ;;  %v9340_v17 = vsel %vm1838_vm13, %v14265_v11, %v14254_v62  ;;  %v14285_v53 = vunpack.i.h.bf16 %v16004_v44  ;;  %v11969_v44 = vld [vmem:[%s16462_s4 + $0x450] sm:$0xff] }
 0x96c   : > { %12621 = vmatprep.mubr.msk.f32.mxu1 %vm538_vm8, %v11923_v10  ;;  %v13041_v20 = vpack.c.bf16 %v8465_v13, %v8462_v54  ;;  %v13073_v34 = vpack.c.bf16 %v9340_v17, %v9338_v47  ;;  %v13075_v10 = vpack.c.bf16 %v14255_v9, %v14260_v32 }
 0x96d   : > { %11891 = vmatmul.mubr.msk.f32.gmra.mrb[26].mxu0 %vm538_vm8, %v15859_v5  ;;  %12622 = vmatmul.mubr.msk.f32.gmra.mrb[14].mxu1 %vm538_vm8, %v11924_v38  ;;  %v13063_v5 = vpack.c.bf16 %v9117_v33, %v9115_v52  ;;  %v9564_v0 = vsel %vm304_vm2, %v14285_v53, %v14279_v15  ;;  %v9820_v53 = vld [vmem:[%s16463_s5 + $0x70] sm:$0xff] }
 0x96e   : > { %8120 = vmatprep.mubr.f32.mxu0 %v14450_v1  ;;  %8976 = vmatprep.mubr.f32.mxu1 %v14450_v1  ;;  %v13081_v39 = vpack.c.bf16 %v9564_v0, %v9562_v37  ;;  %v9821_v37 = vld [vmem:[%s16463_s5 + $0x78] sm:$0xff] }
 0x971   : > { %11892 = vmatmul.mubr.msk.f32.gmra.mrb[28].mxu0 %vm538_vm8, %v15870_v60  ;;  %11937 = vmatmul.mubr.msk.f32.vlgmr.msra.gmra.mrb[16].mxu1 %vm538_vm8, %v11933_v19  ;;  %v11935_v60 = vld [vmem:[%s16462_s4 + $0x2e0] sm:$0xff] }
 0x972   : > { %13062 = vmatpush3.bf16.msra.mxu1 %v13059_v41  ;;  %8320 = vmatprep.mubr.f32.mxu0 %v14450_v1  ;;  %v11971_v41 = vld [vmem:[%s16462_s4 + $0x460] sm:$0xff] }
 0x973   : > { %13064 = vmatprep.subr.bf16.mxu1 %v13063_v5  ;;  %8982 = vmatprep.mubr.f32.mxu1 %v14450_v1 }
 0x974   : > { %v9773_v5 = vpop.permute.xlu0 %9772 }
 0x975   : > { %11901 = vmatmul.mubr.msk.f32.vlgmr.msra.gmra.mrb[22].mxu0 %vm538_vm8, %v15877_v12  ;;  %11938 = vmatmul.mubr.msk.f32.gmra.mrb[18].mxu1 %vm538_vm8, %v11934_v40  ;;  %v11936_v12 = vld [vmem:[%s16462_s4 + $0x2e8] sm:$0xff] }
 0x976   : > { %13042 = vmatpush1.bf16.msra.mxu0 %v13041_v20  ;;  %8988 = vmatprep.mubr.f32.mxu1 %v14450_v1 }
 0x977   : > { %8326 = vmatprep.mubr.f32.mxu0 %v14450_v1 }
 0x979   : > { %11939 = vmatmul.mubr.msk.f32.gmra.mrb[20].mxu1 %vm538_vm8, %v11935_v60  ;;  %11902 = vmatmul.mubr.msk.f32.gmra.mrb[24].mxu0 %vm538_vm8, %v15888_v24  ;;  %v13065_v24 = vpack.c.bf16 %v9116_v4, %v9114_v48  ;;  %v9778_v4 = vpop.permute.xlu1 %9777 }
 0x97a   : > { %8994 = vmatprep.mubr.f32.mxu1 %v14450_v1  ;;  %8332 = vmatprep.mubr.f32.mxu0 %v14450_v1 }
 0x97d   : > { %11940 = vmatmul.mubr.msk.f32.gmra.mrb[22].mxu1 %vm538_vm8, %v11936_v12  ;;  %11903 = vmatmul.mubr.msk.f32.gmra.mrb[26].mxu0 %vm538_vm8, %v15895_v59  ;;  %v11945_v59 = vld [vmem:[%s16462_s4 + $0x350] sm:$0xff] }
 0x97e   : > { %12628 = vmatprep.mubr.msk.f32.mxu1 %vm538_vm8, %v11933_v19  ;;  %8338 = vmatprep.mubr.f32.mxu0 %v14450_v1 }
 0x981   : > { %12629 = vmatmul.mubr.msk.f32.vlgmr.msra.gmra.mrb[12].mxu1 %vm538_vm8, %v11934_v40  ;;  %11904 = vmatmul.mubr.msk.f32.gmra.mrb[28].mxu0 %vm538_vm8, %v15904_v50  ;;  %v9339_v50 = vsel %vm1838_vm13, %v14259_v30, %v14260_v32 }
 0x982   : > { %13066 = vmatpush1.bf16.msra.mxu1 %v13065_v24  ;;  %12631 = vmatprep.mubr.msk.f32.mxu1 %vm538_vm8, %v11935_v60  ;;  %v13071_v6 = vpack.c.bf16 %v9341_v55, %v9339_v50  ;;  %v9822_v50 = vld [vmem:[#allocation3] sm:$0xff] }
 0x983   : > { %13068 = vmatprep.subr.bf16.mxu1 %v13067_v45  ;;  %8550 = vmatprep.mubr.f32.mxu0 %v14450_v1  ;;  %v9826_v55 = vld [vmem:[#allocation3 + $0x20] sm:$0xff] }
 0x984   : > { %v14311_v56 = vpack.i.bf16 %v9826_v55, %v9822_v50 }
 0x985   : > { %12632 = vmatmul.mubr.msk.f32.gmra.mrb[14].mxu1 %vm538_vm8, %v11936_v12  ;;  %11913 = vmatmul.mubr.msk.f32.vlgmr.msra.gmra.mrb[22].mxu0 %vm538_vm8, %v15912_v58  ;;  %v11946_v58 = vld [vmem:[%s16462_s4 + $0x358] sm:$0xff] }
 0x986   : > { %9200 = vmatprep.mubr.f32.mxu1 %v14450_v1  ;;  %8556 = vmatprep.mubr.f32.mxu0 %v14450_v1 }
 0x989   : > { %11949 = vmatmul.mubr.msk.f32.vlgmr.msra.gmra.mrb[16].mxu1 %vm538_vm8, %v11945_v59  ;;  %11914 = vmatmul.mubr.msk.f32.gmra.mrb[24].mxu0 %vm538_vm8, %v15929_v61  ;;  %v11947_v61 = vld [vmem:[%s16462_s4 + $0x360] sm:$0xff] }
 0x98a   : > { %13070 = vmatpush3.bf16.msra.mxu1 %v13067_v45  ;;  %9206 = vmatprep.mubr.f32.mxu1 %v14450_v1 }
 0x98b   : > { %13072 = vmatprep.subr.bf16.mxu1 %v13071_v6  ;;  %8562 = vmatprep.mubr.f32.mxu0 %v14450_v1 }
 0x98d   : > { %11950 = vmatmul.mubr.msk.f32.gmra.mrb[18].mxu1 %vm538_vm8, %v11946_v58  ;;  %11915 = vmatmul.mubr.msk.f32.gmra.mrb[26].mxu0 %vm538_vm8, %v15934_v46  ;;  %v11948_v46 = vld [vmem:[%s16462_s4 + $0x368] sm:$0xff] }
 0x98e   : > { %9212 = vmatprep.mubr.f32.mxu1 %v14450_v1  ;;  %8568 = vmatprep.mubr.f32.mxu0 %v14450_v1 }
 0x991   : > { %11951 = vmatmul.mubr.msk.f32.gmra.mrb[20].mxu1 %vm538_vm8, %v11947_v61  ;;  %11916 = vmatmul.mubr.msk.f32.gmra.mrb[28].mxu0 %vm538_vm8, %v15955_v57  ;;  %v14295_v57 = vunpack.i.h.bf16 %v16025_v43  ;;  %v11959_v43 = vld [vmem:[%s16462_s4 + $0x3e0] sm:$0xff] }
 0x992   : > { %9218 = vmatprep.mubr.f32.mxu1 %v14450_v1 }
 0x993   : > { %v9563_v38 = vsel %vm304_vm2, %v14294_v14, %v14295_v57  ;;  %v13083_v28 = vpack.c.bf16 %v14280_v51, %v14295_v57 }
 0x994   : > { %v13079_v63 = vpack.c.bf16 %v9565_v42, %v9563_v38 }
 0x995   : > { %11952 = vmatmul.mubr.msk.f32.gmra.mrb[22].mxu1 %vm538_vm8, %v11948_v46 }
 0x996   : > { %12638 = vmatprep.mubr.msk.f32.mxu1 %vm538_vm8, %v11945_v59 }
 0x999   : > { %12639 = vmatmul.mubr.msk.f32.vlgmr.msra.gmra.mrb[12].mxu1 %vm538_vm8, %v11946_v58 }
 0x99a   : > { %13074 = vmatpush1.bf16.msra.mxu1 %v13073_v34  ;;  %12641 = vmatprep.mubr.msk.f32.mxu1 %vm538_vm8, %v11947_v61 }
 0x99b   : > { %13076 = vmatprep.subr.bf16.mxu1 %v13075_v10 }
 0x99d   : > { %12642 = vmatmul.mubr.msk.f32.gmra.mrb[14].mxu1 %vm538_vm8, %v11948_v46 }
 0x99e   : > { %9424 = vmatprep.mubr.f32.mxu1 %v14450_v1 }
 0x9a1   : > { %11961 = vmatmul.mubr.msk.f32.vlgmr.msra.gmra.mrb[16].mxu1 %vm538_vm8, %v11957_v23 }
 0x9a2   : > { %13078 = vmatpush3.bf16.msra.mxu1 %v13075_v10  ;;  %9430 = vmatprep.mubr.f32.mxu1 %v14450_v1 }
 0x9a3   : > { %13080 = vmatprep.subr.bf16.mxu1 %v13079_v63 }
 0x9a5   : > { %11962 = vmatmul.mubr.msk.f32.gmra.mrb[18].mxu1 %vm538_vm8, %v11958_v8 }
 0x9a6   : > { %9436 = vmatprep.mubr.f32.mxu1 %v14450_v1 }
 0x9a9   : > { %11963 = vmatmul.mubr.msk.f32.gmra.mrb[20].mxu1 %vm538_vm8, %v11959_v43 }
 0x9aa   : > { %9442 = vmatprep.mubr.f32.mxu1 %v14450_v1 }
 0x9ad   : > { %11964 = vmatmul.mubr.msk.f32.gmra.mrb[22].mxu1 %vm538_vm8, %v11960_v49 }
 0x9ae   : > { %12648 = vmatprep.mubr.msk.f32.mxu1 %vm538_vm8, %v11957_v23 }
 0x9b1   : > { %12649 = vmatmul.mubr.msk.f32.vlgmr.msra.gmra.mrb[12].mxu1 %vm538_vm8, %v11958_v8 }
 0x9b2   : > { %13082 = vmatpush1.bf16.msra.mxu1 %v13081_v39  ;;  %12651 = vmatprep.mubr.msk.f32.mxu1 %vm538_vm8, %v11959_v43 }
 0x9b3   : > { %13084 = vmatprep.subr.bf16.mxu1 %v13083_v28 }
 0x9b5   : > { %12652 = vmatmul.mubr.msk.f32.gmra.mrb[14].mxu1 %vm538_vm8, %v11960_v49  ;;  %v7758_v49 = vld [vmem:[%s16463_s5 + $0x60] sm:$0xff] }
 0x9b6   : > { %9648 = vmatprep.mubr.f32.mxu1 %v14450_v1 }
 0x9b9   : > { %11973 = vmatmul.mubr.msk.f32.vlgmr.msra.gmra.mrb[16].mxu1 %vm538_vm8, %v11969_v44 }
 0x9ba   : > { %13086 = vmatpush3.bf16.msra.mxu1 %v13083_v28  ;;  %9654 = vmatprep.mubr.f32.mxu1 %v14450_v1 }
 0x9bd   : > { %11974 = vmatmul.mubr.msk.f32.gmra.mrb[18].mxu1 %vm538_vm8, %v11970_v3 }
 0x9be   : > { %9660 = vmatprep.mubr.f32.mxu1 %v14450_v1 }
 0x9c1   : > { %11975 = vmatmul.mubr.msk.f32.gmra.mrb[20].mxu1 %vm538_vm8, %v11971_v41 }
 0x9c2   : > { %9666 = vmatprep.mubr.f32.mxu1 %v14450_v1 }
 0x9c5   : > { %11976 = vmatmul.mubr.msk.f32.gmra.mrb[22].mxu1 %vm538_vm8, %v11972_v36 }
 0x9c6   : > { %12658 = vmatprep.mubr.msk.f32.mxu1 %vm538_vm8, %v11969_v44 }
 0x9c9   : > { %12659 = vmatmul.mubr.msk.f32.vlgmr.msra.gmra.mrb[12].mxu1 %vm538_vm8, %v11970_v3 }
 0x9ca   : > { %12661 = vmatprep.mubr.msk.f32.mxu1 %vm538_vm8, %v11971_v41 }
 0x9cd   : > { %12662 = vmatmul.mubr.msk.f32.gmra.mrb[14].mxu1 %vm538_vm8, %v11972_v36 }
 0x9ce   : > { %9940 = vmatprep.mubr.f32.mxu1 %v14450_v1 }
 0xa58   : > { %v8552_v7 = vpop.f32.mrb[22].mxu0 }
 0xa59   : > { %v8554_v16 = vpop.f32.mrb[23].mxu0 }
 0xa5c   : > { %v8558_v31 = vpop.f32.mrb[24].mxu0 }
 0xa5d   : > { %v8560_v21 = vpop.f32.mrb[25].mxu0 }
 0xa60   : > { %v16212_v22 = vpop.f32.mrb[26].mxu0 }
 0xa61   : > { %v16214_v35 = vpop.f32.mrb[27].mxu0 }
 0xa64   : > { %v16216_v19 = vpop.f32.mrb[28].mxu0 }
 0xa65   : > { %v16218_v52 = vpop.f32.mrb[29].mxu0 }
 0xa8c   : > { %v9650_v33 = vpop.f32.mrb[16].mxu1 }
 0xa8d   : > { %v13175_v13 = vadd.f32 %v9650_v33, %v8552_v7  ;;  %v9652_v54 = vpop.f32.mrb[17].mxu1 }
 0xa8e   : > { %v13176_v40 = vadd.f32 %v9652_v54, %v8554_v16 }
 0xa8f   : > { %v9790_v20 = vadd.f32 %v13175_v13, %v9773_v5 }
 0xa90   : > { %v9791_v60 = vadd.f32 %v13176_v40, %v9773_v5  ;;  %v9656_v12 = vpop.f32.mrb[18].mxu1  ;;  %v11981_v40 = vld [vmem:[%s16462_s4 + $0xf0] sm:$0xff] }
 0xa91   : > { %v9802_v27 = vmax.f32 %v9790_v20, 0.0  ;;  %v13177_v18 = vadd.f32 %v9656_v12, %v8558_v31  ;;  %v9658_v48 = vpop.f32.mrb[19].mxu1 }
 0xa92   : > { %v9803_v24 = vmax.f32 %v9791_v60, 0.0  ;;  %v13178_v45 = vadd.f32 %v9658_v48, %v8560_v21  ;;  %v11982_v60 = vld [vmem:[%s16462_s4 + $0xf8] sm:$0xff] }
 0xa93   : > { %v16221_v9 = vmul.f32 %v9802_v27, %v14548_v26  ;;  %v9793_v62 = vadd.f32 %v13177_v18, %v9778_v4 }
 0xa94   : > { %v16224_v32 = vmul.f32 %v9803_v24, %v14550_v29  ;;  %v9794_v30 = vadd.f32 %v13178_v45, %v9778_v4 }
 0xa95   : > { %v9805_v59 = vmax.f32 %v9793_v62, 0.0 }
 0xa96   : > { %v9806_v6 = vmax.f32 %v9794_v30, 0.0  ;;  %v14301_v58 = vpack.i.bf16 %v16224_v32, %v16221_v9 }
 0xa97   : > { %v16229_v61 = vmul.f32 %v9805_v59, %v14548_v26 }
 0xa98   : > { %v16232_v11 = vmul.f32 %v9806_v6, %v14550_v29  ;;  %14302 = vrot.lane.b32.xlu0 %v14301_v58, %s14455_s16 }
 0xa99   : > { %v14391_v46 = vpack.i.bf16 %v16229_v61, %v16221_v9  ;;  %v13121_v17 = vpack.c.bf16 %v16229_v61, %v16221_v9  ;;  %v12004_v9 = vld [vmem:[%s16462_s4 + $0x278] sm:$0xff] }
 0xa9a   : > { %v14306_v47 = vpack.i.bf16 %v16232_v11, %v16229_v61  ;;  %v13119_v34 = vpack.c.bf16 %v16232_v11, %v16224_v32 }
 0xa9c   : > { %v12660_v26 = vpop.f32.mrb[12].mxu1  ;;  %14312 = vrot.lane.b32.xlu0 %v14311_v56, %s14455_s16  ;;  %14307 = vrot.lane.b32.xlu1 %v14306_v47, %s14455_s16 }
 0xa9d   : > { %v9795_v29 = vadd.f32 %v12660_v26, %v9778_v4  ;;  %v9739_v10 = vpop.f32.mrb[13].mxu1 }
 0xa9e   : > { %v9792_v57 = vadd.f32 %v9773_v5, %v9739_v10 }
 0xa9f   : > { %v9807_v14 = vmax.f32 %v9795_v29, 0.0 }
 0xaa0   : > { %v9804_v51 = vmax.f32 %v9792_v57, 0.0  ;;  %14317 = vrot.lane.b32.xlu0 %v14301_v58, %s14453_s12 }
 0xaa1   : > { %v9813_v15 = vmul.f32 %v9807_v14, %v14546_v25 }
 0xaa2   : > { %v9810_v23 = vmul.f32 %v9804_v51, %v14546_v25 }
 0xaa3   : > { %9819 = vst.msk [vmem:[#allocation3 + $0x38] sm:$0xff] %vm481_vm5, %v9813_v15 }
 0xaa4   : > { %9816 = vst.msk [vmem:[#allocation3 + $0x18] sm:$0xff] %vm481_vm5, %v9810_v23  ;;  %14332 = vrot.lane.b32.xlu0 %v14311_v56, %s14453_s12 }
 0xaa8   : > { %14337 = vrot.lane.b32.xlu0 %v14301_v58, %s14454_s15 }
 0xaaa   : > { %v9829_v38 = vld [vmem:[#allocation3 + $0x38] sm:$0xff] }
 0xaab   : > { %v9825_v42 = vld [vmem:[#allocation3 + $0x18] sm:$0xff]  ;;  %v14396_v43 = vpack.i.bf16 %v9829_v38, %v16232_v11 }
 0xaac   : > { %v14321_v63 = vpack.i.bf16 %v9829_v38, %v9825_v42  ;;  %14352 = vrot.lane.b32.xlu0 %v14311_v56, %s14454_s15  ;;  %v16253_v8 = vpack.c.bf16 %v9829_v38, %v9825_v42  ;;  %v14386_v25 = vpack.i.bf16 %v9825_v42, %v16224_v32  ;;  %v12003_v32 = vld [vmem:[%s16462_s4 + $0x270] sm:$0xff] }
 0xaae   : > { %14322 = vrot.lane.b32.xlu1 %v14321_v63, %s14455_s16 }
 0xab0   : > { %14357 = vrot.lane.b32.xlu0 %v14301_v58, %s14456_s17 }
 0xab2   : > { %14327 = vrot.lane.b32.xlu1 %v14306_v47, %s14453_s12 }
 0xab4   : > { %14372 = vrot.lane.b32.xlu0 %v14311_v56, %s14456_s17 }
 0xab6   : > { %14342 = vrot.lane.b32.xlu1 %v14321_v63, %s14453_s12  ;;  %s13580_s12 = smul.u32 48, %s16466_s22 }
 0xab8   : > { %14387 = vrot.lane.b32.xlu0 %v14386_v25, %s14457_s18  ;;  %s251_s10 = scalar_lea.vmem %s16464_s6, %s13580_s12 }
 0xaba   : > { %14347 = vrot.lane.b32.xlu1 %v14306_v47, %s14454_s15 }
 0xabc   : > { %14392 = vrot.lane.b32.xlu0 %v14391_v46, %s14457_s18 }
 0xabe   : > { %14362 = vrot.lane.b32.xlu1 %v14321_v63, %s14454_s15 }
 0xac0   : > { %14397 = vrot.lane.b32.xlu0 %v14396_v43, %s14458_s19 }
 0xac2   : > { %14367 = vrot.lane.b32.xlu1 %v14306_v47, %s14456_s17 }
 0xac4   : > { %14417 = vrot.lane.b32.xlu0 %v14386_v25, %s14459_s20 }
 0xac6   : > { %14377 = vrot.lane.b32.xlu1 %v14321_v63, %s14456_s17  ;;  %v9830_v63 = vld [vmem:[%s16462_s4 + $0x70] sm:$0xff] }
 0xac8   : > { %14422 = vrot.lane.b32.xlu0 %v14391_v46, %s14459_s20 }
 0xaca   : > { %14382 = vrot.lane.b32.xlu1 %v14396_v43, %s14457_s18 }
 0xacc   : > { %14427 = vrot.lane.b32.xlu0 %v14396_v43, %s14451_s29 }
 0xace   : > { %14402 = vrot.lane.b32.xlu1 %v14386_v25, %s14458_s19 }
 0xad0   : > { %9782 = vperm.xlu0 %13600, %v7758_v49  }
 0xad2   : > { %14407 = vrot.lane.b32.xlu1 %v14391_v46, %s14458_s19 }
 0xad4   : > { %11522 = vperm.xlu0 %13600, %v9820_v53  }
 0xad6   : > { %14412 = vrot.lane.b32.xlu1 %v14396_v43, %s14459_s20 }
 0xada   : > { %14432 = vrot.lane.b32.xlu1 %v14386_v25, %s14451_s29 }
 0xade   : > { %14437 = vrot.lane.b32.xlu1 %v14391_v46, %s14451_s29 }
 0xae2   : > { %9787 = vperm.xlu1 %13599, %v7759_v2  }
 0xae6   : > { %11527 = vperm.xlu1 %13599, %v9821_v37  }
 0xb0a   : > { %v14303_v0 = vpop.permute.xlu0 %14302 }
 0xb0b   : > { %v14305_v39 = vunpack.i.h.bf16 %v14303_v0  ;;  %v14304_v28 = vunpack.i.l.bf16 %v14303_v0 }
 0xb0d   : > { %v9859_v33 = vsel %vm525_vm6, %v14304_v28, %v14305_v39 }
 0xb0e   : > { %v14313_v44 = vpop.permute.xlu0 %14312  ;;  %v14308_v3 = vpop.permute.xlu1 %14307 }
 0xb0f   : > { %v14315_v41 = vunpack.i.h.bf16 %v14313_v44  ;;  %v14314_v36 = vunpack.i.l.bf16 %v14313_v44  ;;  %v14310_v7 = vunpack.i.h.bf16 %v14308_v3  ;;  %v14309_v16 = vunpack.i.l.bf16 %v14308_v3 }
 0xb11   : > { %v9858_v31 = vsel %vm525_vm6, %v14314_v36, %v14304_v28  ;;  %v9861_v21 = vsel %vm525_vm6, %v14315_v41, %v14309_v16  ;;  %v9862_v13 = vsel %vm525_vm6, %v14309_v16, %v14310_v7 }
 0xb12   : > { %v13089_v54 = vpack.c.bf16 %v9861_v21, %v9858_v31  ;;  %v13087_v5 = vpack.c.bf16 %v9862_v13, %v9859_v33  ;;  %v14318_v20 = vpop.permute.xlu0 %14317 }
 0xb13   : > { %v14320_v4 = vunpack.i.h.bf16 %v14318_v20  ;;  %v14319_v24 = vunpack.i.l.bf16 %v14318_v20 }
 0xb14   : > { %13088 = vmatprep.subr.bf16.mxu1 %v13087_v5 }
 0xb15   : > { %13090 = vmatpush1.bf16.msra.mxu1 %v13089_v54  ;;  %v10045_v26 = vsel %vm713_vm7, %v14319_v24, %v14320_v4 }
 0xb16   : > { %v14333_v12 = vpop.permute.xlu0 %14332 }
 0xb17   : > { %v14335_v45 = vunpack.i.h.bf16 %v14333_v12  ;;  %v14334_v62 = vunpack.i.l.bf16 %v14333_v12 }
 0xb18   : > { %11983 = vmatmul.mubr.msk.f32.vlgmr.msra.gmra.mrb[20].mxu1 %vm538_vm8, %v11981_v40 }
 0xb19   : > { %9946 = vmatprep.mubr.f32.mxu1 %v14450_v1  ;;  %v10044_v46 = vsel %vm713_vm7, %v14334_v62, %v14319_v24 }
 0xb1a   : > { %v14338_v50 = vpop.permute.xlu0 %14337 }
 0xb1b   : > { %v14340_v38 = vunpack.i.h.bf16 %v14338_v50  ;;  %v14339_v42 = vunpack.i.l.bf16 %v14338_v50 }
 0xb1c   : > { %11984 = vmatmul.mubr.msk.f32.gmra.mrb[22].mxu1 %vm538_vm8, %v11982_v60 }
 0xb1d   : > { %12668 = vmatprep.mubr.msk.f32.mxu1 %vm538_vm8, %v11981_v40  ;;  %v10233_v28 = vsel %vm903_vm9, %v14339_v42, %v14340_v38 }
 0xb1e   : > { %v14353_v23 = vpop.permute.xlu0 %14352 }
 0xb1f   : > { %v14355_v0 = vunpack.i.h.bf16 %v14353_v23  ;;  %v14354_v3 = vunpack.i.l.bf16 %v14353_v23 }
 0xb20   : > { %v14323_v27 = vpop.permute.xlu1 %14322 }
 0xb21   : > { %v14325_v18 = vunpack.i.h.bf16 %v14323_v27  ;;  %v14324_v48 = vunpack.i.l.bf16 %v14323_v27  ;;  %v10232_v40 = vsel %vm903_vm9, %v14354_v3, %v14339_v42 }
 0xb22   : > { %v14358_v41 = vpop.permute.xlu0 %14357 }
 0xb23   : > { %v9860_v30 = vsel %vm525_vm6, %v14305_v39, %v14324_v48  ;;  %v9863_v59 = vsel %vm525_vm6, %v14310_v7, %v14325_v18  ;;  %v9831_v39 = vld [vmem:[%s16462_s4 + $0x78] sm:$0xff]  ;;  %v14360_v33 = vunpack.i.h.bf16 %v14358_v41  ;;  %v14359_v13 = vunpack.i.l.bf16 %v14358_v41  ;;  %v11991_v48 = vld [vmem:[%s16462_s4 + $0x170] sm:$0xff] }
 0xb24   : > { %v14328_v55 = vpop.permute.xlu1 %14327  ;;  %v13091_v6 = vpack.c.bf16 %v9863_v59, %v9860_v30 }
 0xb25   : > { %v14330_v58 = vunpack.i.h.bf16 %v14328_v55  ;;  %v14329_v56 = vunpack.i.l.bf16 %v14328_v55 }
 0xb26   : > { %13092 = vmatprep.subr.bf16.mxu1 %v13091_v6  ;;  %v14373_v30 = vpop.permute.xlu0 %14372 }
 0xb27   : > { %v10047_v47 = vsel %vm713_vm7, %v14335_v45, %v14329_v56  ;;  %13094 = vmatpush3.bf16.msra.mxu1 %v13091_v6  ;;  %v10048_v29 = vsel %vm713_vm7, %v14329_v56, %v14330_v58  ;;  %v14375_v59 = vunpack.i.h.bf16 %v14373_v30  ;;  %v11992_v6 = vld [vmem:[%s16462_s4 + $0x178] sm:$0xff] }
 0xb28   : > { %v13097_v10 = vpack.c.bf16 %v10047_v47, %v10044_v46  ;;  %v14343_v57 = vpop.permute.xlu1 %14342  ;;  %v13095_v14 = vpack.c.bf16 %v10048_v29, %v10045_v26 }
 0xb29   : > { %v14345_v51 = vunpack.i.h.bf16 %v14343_v57  ;;  %v14344_v15 = vunpack.i.l.bf16 %v14343_v57  ;;  %v11997_v57 = vld [vmem:[%s16462_s4 + $0x1f0] sm:$0xff] }
 0xb2a   : > { %12669 = vmatmul.mubr.msk.f32.vlgmr.msra.gmra.mrb[14].mxu1 %vm538_vm8, %v11982_v60  ;;  %13096 = vmatprep.subr.bf16.mxu1 %v13095_v14  ;;  %v11998_v14 = vld [vmem:[%s16462_s4 + $0x1f8] sm:$0xff] }
 0xb2b   : > { %13098 = vmatpush1.bf16.msra.mxu1 %v13097_v10  ;;  %10126 = vmatprep.mubr.f32.mxu1 %v14450_v1  ;;  %v10046_v25 = vsel %vm713_vm7, %v14320_v4, %v14344_v15  ;;  %v10049_v43 = vsel %vm713_vm7, %v14330_v58, %v14345_v51  ;;  %v10427_v4 = vsel %vm1099_vm10, %v14359_v13, %v14360_v33  ;;  %v14374_v58 = vunpack.i.l.bf16 %v14373_v30  ;;  %v14388_v15 = vpop.permute.xlu0 %14387 }
 0xb2c   : > { %v14348_v49 = vpop.permute.xlu1 %14347  ;;  %v13099_v53 = vpack.c.bf16 %v10049_v43, %v10046_v25  ;;  %v14390_v42 = vunpack.i.h.bf16 %v14388_v15 }
 0xb2d   : > { %v14350_v2 = vunpack.i.h.bf16 %v14348_v49  ;;  %v14349_v37 = vunpack.i.l.bf16 %v14348_v49  ;;  %v10426_v26 = vsel %vm1099_vm10, %v14374_v58, %v14359_v13  ;;  %v12010_v13 = vld [vmem:[%s16462_s4 + $0x2f8] sm:$0xff] }
 0xb2e   : > { %11987 = vmatmul.mubr.msk.f32.vlgmr.msra.gmra.mrb[20].mxu1 %vm538_vm8, %v9830_v63  ;;  %13100 = vmatprep.subr.bf16.mxu1 %v13099_v53 }
 0xb2f   : > { %13102 = vmatpush3.bf16.msra.mxu1 %v13099_v53  ;;  %10132 = vmatprep.mubr.f32.mxu1 %v14450_v1  ;;  %v10236_v44 = vsel %vm903_vm9, %v14349_v37, %v14350_v2  ;;  %v10235_v21 = vsel %vm903_vm9, %v14355_v0, %v14349_v37 }
 0xb30   : > { %v14363_v36 = vpop.permute.xlu1 %14362  ;;  %v13103_v7 = vpack.c.bf16 %v10236_v44, %v10233_v28  ;;  %v13105_v12 = vpack.c.bf16 %v10235_v21, %v10232_v40 }
 0xb31   : > { %v14365_v16 = vunpack.i.h.bf16 %v14363_v36  ;;  %v14364_v31 = vunpack.i.l.bf16 %v14363_v36  ;;  %v12009_v36 = vld [vmem:[%s16462_s4 + $0x2f0] sm:$0xff] }
 0xb32   : > { %11988 = vmatmul.mubr.msk.f32.gmra.mrb[22].mxu1 %vm538_vm8, %v9831_v39  ;;  %13104 = vmatprep.subr.bf16.mxu1 %v13103_v7 }
 0xb33   : > { %12675 = vmatprep.mubr.msk.f32.mxu1 %vm538_vm8, %v9830_v63  ;;  %v10234_v54 = vsel %vm903_vm9, %v14340_v38, %v14364_v31  ;;  %v10237_v5 = vsel %vm903_vm9, %v14350_v2, %v14365_v16  ;;  %v14389_v63 = vunpack.i.l.bf16 %v14388_v15 }
 0xb34   : > { %v14368_v20 = vpop.permute.xlu1 %14367  ;;  %v13107_v60 = vpack.c.bf16 %v10237_v5, %v10234_v54 }
 0xb35   : > { %v14370_v27 = vunpack.i.h.bf16 %v14368_v20  ;;  %v14369_v18 = vunpack.i.l.bf16 %v14368_v20  ;;  %v10783_v25 = vsel %vm1458_vm11, %v14389_v63, %v14390_v42 }
 0xb36   : > { %12676 = vmatmul.mubr.msk.f32.vlgmr.msra.gmra.mrb[14].mxu1 %vm538_vm8, %v9831_v39 }
 0xb37   : > { %13106 = vmatpush1.bf16.msra.mxu1 %v13105_v12  ;;  %10314 = vmatprep.mubr.f32.mxu1 %v14450_v1  ;;  %v10430_v24 = vsel %vm1099_vm10, %v14369_v18, %v14370_v27  ;;  %v10429_v56 = vsel %vm1099_vm10, %v14375_v59, %v14369_v18 }
 0xb38   : > { %13108 = vmatprep.subr.bf16.mxu1 %v13107_v60  ;;  %v14378_v45 = vpop.permute.xlu1 %14377  ;;  %v13111_v62 = vpack.c.bf16 %v10430_v24, %v10427_v4  ;;  %v13113_v29 = vpack.c.bf16 %v10429_v56, %v10426_v26  ;;  %v12015_v24 = vld [vmem:[%s16462_s4 + $0x370] sm:$0xff] }
 0xb39   : > { %v14380_v50 = vunpack.i.h.bf16 %v14378_v45  ;;  %v14379_v55 = vunpack.i.l.bf16 %v14378_v45 }
 0xb3a   : > { %11993 = vmatmul.mubr.msk.f32.vlgmr.msra.gmra.mrb[20].mxu1 %vm538_vm8, %v11991_v48 }
 0xb3b   : > { %13110 = vmatpush3.bf16.msra.mxu1 %v13107_v60  ;;  %10320 = vmatprep.mubr.f32.mxu1 %v14450_v1  ;;  %v10428_v46 = vsel %vm1099_vm10, %v14360_v33, %v14379_v55  ;;  %v10431_v47 = vsel %vm1099_vm10, %v14370_v27, %v14380_v50  ;;  %v12016_v50 = vld [vmem:[%s16462_s4 + $0x378] sm:$0xff] }
 0xb3c   : > { %13112 = vmatprep.subr.bf16.mxu1 %v13111_v62  ;;  %v13115_v10 = vpack.c.bf16 %v10431_v47, %v10428_v46  ;;  %v14383_v51 = vpop.permute.xlu1 %14382 }
 0xb3d   : > { %v14385_v23 = vunpack.i.h.bf16 %v14383_v51  ;;  %v14384_v38 = vunpack.i.l.bf16 %v14383_v51 }
 0xb3e   : > { %11994 = vmatmul.mubr.msk.f32.gmra.mrb[22].mxu1 %vm538_vm8, %v11992_v6 }
 0xb3f   : > { %12682 = vmatprep.mubr.msk.f32.mxu1 %vm538_vm8, %v11991_v48  ;;  %v10785_v11 = vsel %vm1458_vm11, %v14384_v38, %v14385_v23  ;;  %v13131_v3 = vpack.c.bf16 %v14385_v23, %v14390_v42  ;;  %v12021_v23 = vld [vmem:[%s16462_s4 + $0x3f0] sm:$0xff] }
 0xb40   : > { %v13127_v43 = vpack.c.bf16 %v10785_v11, %v10783_v25  ;;  %v14403_v49 = vpop.permute.xlu1 %14402 }
 0xb41   : > { %v14405_v37 = vunpack.i.h.bf16 %v14403_v49  ;;  %v14404_v0 = vunpack.i.l.bf16 %v14403_v49  ;;  %v12028_v49 = vld [vmem:[%s16462_s4 + $0x478] sm:$0xff] }
 0xb42   : > { %12683 = vmatmul.mubr.msk.f32.vlgmr.msra.gmra.mrb[14].mxu1 %vm538_vm8, %v11992_v6 }
 0xb43   : > { %13114 = vmatpush1.bf16.msra.mxu1 %v13113_v29  ;;  %10508 = vmatprep.mubr.f32.mxu1 %v14450_v1  ;;  %v10971_v7 = vsel %vm1648_vm12, %v14404_v0, %v14405_v37 }
 0xb44   : > { %13116 = vmatprep.subr.bf16.mxu1 %v13115_v10  ;;  %v14408_v41 = vpop.permute.xlu1 %14407 }
 0xb45   : > { %v14410_v31 = vunpack.i.h.bf16 %v14408_v41  ;;  %v14409_v21 = vunpack.i.l.bf16 %v14408_v41 }
 0xb46   : > { %11999 = vmatmul.mubr.msk.f32.vlgmr.msra.gmra.mrb[20].mxu1 %vm538_vm8, %v11997_v57 }
 0xb47   : > { %13118 = vmatpush3.bf16.msra.mxu1 %v13115_v10  ;;  %10514 = vmatprep.mubr.f32.mxu1 %v14450_v1  ;;  %v10970_v20 = vsel %vm1648_vm12, %v14409_v21, %v14404_v0 }
 0xb48   : > { %13120 = vmatprep.subr.bf16.mxu1 %v13119_v34  ;;  %v14393_v34 = vpop.permute.xlu0 %14392  ;;  %v14413_v54 = vpop.permute.xlu1 %14412 }
 0xb49   : > { %v14395_v61 = vunpack.i.h.bf16 %v14393_v34  ;;  %v14415_v60 = vunpack.i.h.bf16 %v14413_v54  ;;  %v14414_v12 = vunpack.i.l.bf16 %v14413_v54 }
 0xb4a   : > { %12000 = vmatmul.mubr.msk.f32.gmra.mrb[22].mxu1 %vm538_vm8, %v11998_v14 }
 0xb4b   : > { %12689 = vmatprep.mubr.msk.f32.mxu1 %vm538_vm8, %v11997_v57  ;;  %v10784_v2 = vsel %vm1458_vm11, %v14395_v61, %v14384_v38  ;;  %v11161_v45 = vsel %vm1838_vm13, %v14414_v12, %v14415_v60 }
 0xb4c   : > { %v14398_v53 = vpop.permute.xlu0 %14397  ;;  %v14433_v58 = vpop.permute.xlu1 %14432 }
 0xb4d   : > { %v14400_v39 = vunpack.i.h.bf16 %v14398_v53  ;;  %v14399_v28 = vunpack.i.l.bf16 %v14398_v53  ;;  %v14435_v47 = vunpack.i.h.bf16 %v14433_v58  ;;  %v14434_v26 = vunpack.i.l.bf16 %v14433_v58 }
 0xb4e   : > { %12690 = vmatmul.mubr.msk.f32.vlgmr.msra.gmra.mrb[14].mxu1 %vm538_vm8, %v11998_v14 }
 0xb4f   : > { %13122 = vmatpush1.bf16.msra.mxu1 %v13121_v17  ;;  %10674 = vmatprep.mubr.f32.mxu1 %v14450_v1  ;;  %v14394_v17 = vunpack.i.l.bf16 %v14393_v34  ;;  %v10973_v16 = vsel %vm1648_vm12, %v14399_v28, %v14400_v39  ;;  %v10972_v40 = vsel %vm1648_vm12, %v14410_v31, %v14399_v28  ;;  %v13139_v4 = vpack.c.bf16 %v14400_v39, %v14405_v37  ;;  %v12022_v34 = vld [vmem:[%s16462_s4 + $0x3f8] sm:$0xff] }
 0xb50   : > { %13124 = vmatprep.subr.bf16.mxu1 %v16253_v8  ;;  %v13135_v33 = vpack.c.bf16 %v10973_v16, %v10971_v7  ;;  %v14418_v5 = vpop.permute.xlu0 %14417  ;;  %v13137_v48 = vpack.c.bf16 %v10972_v40, %v10970_v20  ;;  %v14438_v15 = vpop.permute.xlu1 %14437  ;;  %v11347_v38 = vsel %vm304_vm2, %v14434_v26, %v14435_v47 }
 0xb51   : > { %v14420_v27 = vunpack.i.h.bf16 %v14418_v5  ;;  %v14419_v18 = vunpack.i.l.bf16 %v14418_v5 }
 0xb52   : > { %12005 = vmatmul.mubr.msk.f32.vlgmr.msra.gmra.mrb[20].mxu1 %vm538_vm8, %v12003_v32 }
 0xb53   : > { %13126 = vmatpush3.bf16.msra.mxu1 %v16253_v8  ;;  %10680 = vmatprep.mubr.f32.mxu1 %v14450_v1  ;;  %v10782_v8 = vsel %vm1458_vm11, %v14394_v17, %v14389_v63  ;;  %v11159_v30 = vsel %vm1838_vm13, %v14419_v18, %v14420_v27  ;;  %v13147_v51 = vpack.c.bf16 %v14415_v60, %v14420_v27  ;;  %v14440_v63 = vunpack.i.h.bf16 %v14438_v15  ;;  %v12027_v17 = vld [vmem:[%s16462_s4 + $0x470] sm:$0xff] }
 0xb54   : > { %13128 = vmatprep.subr.bf16.mxu1 %v13127_v43  ;;  %v13129_v44 = vpack.c.bf16 %v10784_v2, %v10782_v8  ;;  %v14423_v62 = vpop.permute.xlu0 %14422  ;;  %v13143_v59 = vpack.c.bf16 %v11161_v45, %v11159_v30 }
 0xb55   : > { %v14425_v55 = vunpack.i.h.bf16 %v14423_v62  ;;  %v14424_v6 = vunpack.i.l.bf16 %v14423_v62 }
 0xb56   : > { %12006 = vmatmul.mubr.msk.f32.gmra.mrb[22].mxu1 %vm538_vm8, %v12004_v9 }
 0xb57   : > { %12696 = vmatprep.mubr.msk.f32.mxu1 %vm538_vm8, %v12003_v32  ;;  %v11160_v46 = vsel %vm1838_vm13, %v14425_v55, %v14414_v12  ;;  %v11158_v29 = vsel %vm1838_vm13, %v14424_v6, %v14419_v18  ;;  %v14439_v32 = vunpack.i.l.bf16 %v14438_v15 }
 0xb58   : > { %v14428_v56 = vpop.permute.xlu0 %14427  ;;  %v13145_v14 = vpack.c.bf16 %v11160_v46, %v11158_v29 }
 0xb59   : > { %v14430_v10 = vunpack.i.h.bf16 %v14428_v56  ;;  %v14429_v57 = vunpack.i.l.bf16 %v14428_v56  ;;  %v11346_v43 = vsel %vm304_vm2, %v14439_v32, %v14434_v26 }
 0xb5a   : > { %12697 = vmatmul.mubr.msk.f32.vlgmr.msra.gmra.mrb[14].mxu1 %vm538_vm8, %v12004_v9 }
 0xb5b   : > { %13130 = vmatpush1.bf16.msra.mxu1 %v13129_v44  ;;  %10862 = vmatprep.mubr.f32.mxu1 %v14450_v1  ;;  %v11349_v42 = vsel %vm304_vm2, %v14429_v57, %v14430_v10  ;;  %v11348_v25 = vsel %vm304_vm2, %v14440_v63, %v14429_v57  ;;  %v13155_v61 = vpack.c.bf16 %v14430_v10, %v14435_v47 }
 0xb5c   : > { %13132 = vmatprep.subr.bf16.mxu1 %v13131_v3  ;;  %v13151_v11 = vpack.c.bf16 %v11349_v42, %v11347_v38  ;;  %v13153_v9 = vpack.c.bf16 %v11348_v25, %v11346_v43  ;;  %v9783_v53 = vpop.permute.xlu0 %9782 }
 0xb5d   : > { %v13179_v2 = vadd.f32 %v9783_v53, %v16212_v22  ;;  %v13182_v8 = vadd.f32 %v9783_v53, %v16214_v35 }
 0xb5e   : > { %12011 = vmatmul.mubr.msk.f32.vlgmr.msra.gmra.mrb[20].mxu1 %vm538_vm8, %v12009_v36 }
 0xb5f   : > { %13134 = vmatpush3.bf16.msra.mxu1 %v13131_v3  ;;  %10868 = vmatprep.mubr.f32.mxu1 %v14450_v1 }
 0xb60   : > { %13136 = vmatprep.subr.bf16.mxu1 %v13135_v33  ;;  %v11523_v28 = vpop.permute.xlu0 %11522 }
 0xb61   : > { %v9788_v37 = vpop.permute.xlu1 %9787 }
 0xb62   : > { %12012 = vmatmul.mubr.msk.f32.gmra.mrb[22].mxu1 %vm538_vm8, %v12010_v13  ;;  %v13185_v41 = vadd.f32 %v9788_v37, %v16216_v19  ;;  %v13188_v16 = vadd.f32 %v9788_v37, %v16218_v52 }
 0xb63   : > { %12703 = vmatprep.mubr.msk.f32.mxu1 %vm538_vm8, %v12009_v36 }
 0xb65   : > { %v11528_v21 = vpop.permute.xlu1 %11527 }
 0xb66   : > { %12704 = vmatmul.mubr.msk.f32.vlgmr.msra.gmra.mrb[14].mxu1 %vm538_vm8, %v12010_v13 }
 0xb67   : > { %13138 = vmatpush1.bf16.msra.mxu1 %v13137_v48  ;;  %11050 = vmatprep.mubr.f32.mxu1 %v14450_v1 }
 0xb68   : > { %13140 = vmatprep.subr.bf16.mxu1 %v13139_v4 }
 0xb6a   : > { %12017 = vmatmul.mubr.msk.f32.vlgmr.msra.gmra.mrb[20].mxu1 %vm538_vm8, %v12015_v24 }
 0xb6b   : > { %13142 = vmatpush3.bf16.msra.mxu1 %v13139_v4  ;;  %11056 = vmatprep.mubr.f32.mxu1 %v14450_v1 }
 0xb6c   : > { %13144 = vmatprep.subr.bf16.mxu1 %v13143_v59 }
 0xb6e   : > { %12018 = vmatmul.mubr.msk.f32.gmra.mrb[22].mxu1 %vm538_vm8, %v12016_v50 }
 0xb6f   : > { %12710 = vmatprep.mubr.msk.f32.mxu1 %vm538_vm8, %v12015_v24 }
 0xb72   : > { %12711 = vmatmul.mubr.msk.f32.vlgmr.msra.gmra.mrb[14].mxu1 %vm538_vm8, %v12016_v50 }
 0xb73   : > { %13146 = vmatpush1.bf16.msra.mxu1 %v13145_v14  ;;  %11238 = vmatprep.mubr.f32.mxu1 %v14450_v1 }
 0xb74   : > { %13148 = vmatprep.subr.bf16.mxu1 %v13147_v51 }
 0xb76   : > { %12023 = vmatmul.mubr.msk.f32.vlgmr.msra.gmra.mrb[20].mxu1 %vm538_vm8, %v12021_v23 }
 0xb77   : > { %13150 = vmatpush3.bf16.msra.mxu1 %v13147_v51  ;;  %11244 = vmatprep.mubr.f32.mxu1 %v14450_v1 }
 0xb78   : > { %13152 = vmatprep.subr.bf16.mxu1 %v13151_v11 }
 0xb7a   : > { %12024 = vmatmul.mubr.msk.f32.gmra.mrb[22].mxu1 %vm538_vm8, %v12022_v34 }
 0xb7b   : > { %12717 = vmatprep.mubr.msk.f32.mxu1 %vm538_vm8, %v12021_v23 }
 0xb7e   : > { %12718 = vmatmul.mubr.msk.f32.vlgmr.msra.gmra.mrb[14].mxu1 %vm538_vm8, %v12022_v34 }
 0xb7f   : > { %13154 = vmatpush1.bf16.msra.mxu1 %v13153_v9  ;;  %11426 = vmatprep.mubr.f32.mxu1 %v14450_v1 }
 0xb80   : > { %13156 = vmatprep.subr.bf16.mxu1 %v13155_v61 }
 0xb82   : > { %12029 = vmatmul.mubr.msk.f32.vlgmr.msra.gmra.mrb[20].mxu1 %vm538_vm8, %v12027_v17 }
 0xb83   : > { %13158 = vmatpush3.bf16.msra.mxu1 %v13155_v61  ;;  %11432 = vmatprep.mubr.f32.mxu1 %v14450_v1 }
 0xb86   : > { %12030 = vmatmul.mubr.msk.f32.gmra.mrb[22].mxu1 %vm538_vm8, %v12028_v49 }
 0xb87   : > { %12724 = vmatprep.mubr.msk.f32.mxu1 %vm538_vm8, %v12027_v17 }
 0xb8a   : > { %12725 = vmatmul.mubr.msk.f32.vlgmr.msra.gmra.mrb[14].mxu1 %vm538_vm8, %v12028_v49 }
 0xc55   : > { %v11428_v0 = vpop.f32.mrb[20].mxu1 }
 0xc56   : > { %v13180_v39 = vadd.f32 %v13179_v2, %v11428_v0  ;;  %v11430_v1 = vpop.f32.mrb[21].mxu1 }
 0xc57   : > { %v13183_v44 = vadd.f32 %v13182_v8, %v11430_v1 }
 0xc58   : > { %v13181_v3 = vadd.f32 %v13180_v39, %v11523_v28 }
 0xc59   : > { %v13184_v36 = vadd.f32 %v13183_v44, %v11523_v28  ;;  %v11434_v7 = vpop.f32.mrb[22].mxu1 }
 0xc5a   : > { %11542 = vst [vmem:[%s251_s10] sm:$0xff] %v13181_v3  ;;  %v13186_v22 = vadd.f32 %v13185_v41, %v11434_v7  ;;  %v11436_v31 = vpop.f32.mrb[23].mxu1 }
 0xc5b   : > { %11543 = vst [vmem:[%s251_s10 + $0x8] sm:$0xff] %v13184_v36  ;;  %v13189_v35 = vadd.f32 %v13188_v16, %v11436_v31 }
 0xc5c   : > { %v13187_v33 = vadd.f32 %v13186_v22, %v11528_v21 }
 0xc5d   : > { %v13190_v13 = vadd.f32 %v13189_v35, %v11528_v21  ;;  %v12726_v54 = vpop.f32.mrb[14].mxu1 }
 0xc5e   : > { %11545 = vst [vmem:[%s251_s10 + $0x18] sm:$0xff] %v13187_v33  ;;  %v13191_v5 = vadd.f32 %v12726_v54, %v9788_v37  ;;  %v11505_v40 = vpop.f32.mrb[15].mxu1 }
 0xc5f   : > { %11546 = vst [vmem:[%s251_s10 + $0x20] sm:$0xff] %v13190_v13  ;;  %v13193_v20 = vadd.f32 %v11505_v40, %v9783_v53 }
 0xc60   : > { %v13192_v60 = vadd.f32 %v13191_v5, %v11528_v21 }
 0xc61   : > { %v13194_v19 = vadd.f32 %v13193_v20, %v11523_v28 }
 0xc62   : > { %11547 = vst.msk [vmem:[%s251_s10 + $0x28] sm:$0xff] %vm481_vm5, %v13192_v60 }
 0xc63   : > { %11544 = vst.msk [vmem:[%s251_s10 + $0x10] sm:$0xff] %vm481_vm5, %v13194_v19 }
 0xc64 PF: > { %s16_s21 = sadd.s32 1, %s14448_s21  }
 0xc65   : > { %p13_p4 = scmp.ge.s32.totalorder %s16_s21, 4  }
 0xc67   :  { %15 = sbr.rel (!%p13_p4) target bundleno = 1 (0x1), region = 82 }

</bundles_post_ra>
